<compile_context>
chip_gen: v7x
topology: tpu7x:2x2x1
jax: 0.10.0
libtpu: 0.0.40
codegen_flags: <defaults>
</compile_context>

<pallas_src>
import math
import functools

import jax
import jax.numpy as jnp
from jax.experimental import pallas as pl
from jax.experimental.pallas import tpu as pltpu

F32 = jnp.float32


def _gelu(h):
    # TODO(synk): PyTorch nn.GELU default is erf-based; tanh approximation here.
    return 0.5 * h * (1.0 + jnp.tanh(0.7978845608028654 * (h + 0.044715 * h * h * h)))


# ----------------------------------------------------------------------------
# Fused kernel: walks a static "plan" describing the whole flow chain.
# Layout inside the kernel: x (D, tb), logp (1, tb), cond (C, tb)  -- batch on lanes.
# ----------------------------------------------------------------------------
def _fused_kernel(x_ref, logp_ref, sc_ref, *rest,
                  plan, n_arrays, dim, inv_sqrt_c):
    p_refs = rest[:n_arrays]
    y_ref, lp_ref = rest[n_arrays], rest[n_arrays + 1]

    x = x_ref[...]           # (D, tb)
    logp = logp_ref[...]     # (1, tb)
    cond = None

    for entry in plan:
        kind = entry[0]

        if kind == "actnorm":
            _, si, bi, li = entry
            # exp(logs) and logdet precomputed at build time (no exp / reduce here).
            x = x * p_refs[si][...] + p_refs[bi][...]
            logp = logp - sc_ref[li]                     # scalar from SMEM

        elif kind == "voronoi":
            _, ai, a2i, ei = entry
            a = p_refs[ai][...]                          # (K, D)
            a2 = p_refs[a2i][...]                        # (K, 1)  precomputed ||a||^2
            xa = jnp.dot(a, x, preferred_element_type=F32)          # (K, tb)
            x2 = jnp.sum(x * x, axis=0, keepdims=True)               # (1, tb)
            d2 = a2 + x2 - 2.0 * xa                                  # (K, tb)
            mn = jnp.min(d2, axis=0, keepdims=True)                  # (1, tb)
            # one-hot nearest anchor with first-index tie-break (argmin semantics)
            taken = jnp.zeros(mn.shape, dtype=jnp.bool_)
            rows = []
            for k in range(d2.shape[0]):
                is_min = d2[k:k + 1, :] <= mn
                rows.append((is_min & jnp.logical_not(taken)).astype(F32))
                taken = jnp.logical_or(taken, is_min)
            mask = jnp.concatenate(rows, axis=0)                     # (K, tb)
            # cls_embed lookup as embedT @ one_hot, scaled by 1/sqrt(C)
            cond = jnp.dot(p_refs[ei][...], mask,
                           preferred_element_type=F32) * inv_sqrt_c  # (C, tb)

        else:  # "mlp": ConditionalAffine1d or affine coupling (block_fn)
            (_, mkind, in_tags, w1_idx,
             b1i, w2i, b2i, w3li, b3li, w3si, b3si) = entry
            if mkind == "coupling":
                d1 = dim // 2
                x_id, x_tr = x[:d1, :], x[d1:, :]
            else:
                x_id, x_tr = None, x
            # hypernet: Linear -> GELU -> Linear -> GELU -> Linear (split w3)
            h = p_refs[b1i][...]                                     # (H, 1) broadcast
            for tag, wi in zip(in_tags, w1_idx):
                inp = x_id if tag == "x1" else cond
                w = p_refs[wi][...]
                if w.shape[1] == 1:
                    h = h + w * inp          # contraction dim 1 -> broadcast outer prod
                else:
                    h = h + jnp.dot(w, inp, preferred_element_type=F32)
            h = _gelu(h)
            h = _gelu(jnp.dot(p_refs[w2i][...], h, preferred_element_type=F32)
                      + p_refs[b2i][...])
            logs = jnp.dot(p_refs[w3li][...], h,
                           preferred_element_type=F32) + p_refs[b3li][...]
            shift = jnp.dot(p_refs[w3si][...], h,
                            preferred_element_type=F32) + p_refs[b3si][...]
            y = x_tr * jnp.exp(logs) + shift
            logp = logp - jnp.sum(logs, axis=0, keepdims=True)
            x = jnp.concatenate([x_id, y], axis=0) if mkind == "coupling" else y

    y_ref[...] = x
    lp_ref[...] = logp


# ----------------------------------------------------------------------------
# Parameter flattening: produces (vmem_arrays, smem_scalars, static plan)
# ----------------------------------------------------------------------------
def _prepare(params):
    arrays, logdets, plan = [], [], []

    def add(a):
        assert a.ndim == 2
        arrays.append(a)
        return len(arrays) - 1

    def add_chain(chain):
        for layer in chain:
            kind = layer["kind"]
            if kind == "actnorm":
                li = len(logdets)
                logdets.append(layer["logdet"])
                plan.append(("actnorm", add(layer["exp_logs"]),
                             add(layer["bias"]), li))
            else:  # condaffine / coupling
                plan.append(("mlp", kind, tuple(layer["in_tags"]),
                             tuple(add(w) for w in layer["w1"]),
                             add(layer["b1"]), add(layer["w2"]), add(layer["b2"]),
                             add(layer["w3_logs"]), add(layer["b3_logs"]),
                             add(layer["w3_shift"]), add(layer["b3_shift"])))

    add_chain(params["flows"][0])
    for vm, chain in zip(params["vormixes"], params["flows"][1:]):
        plan.append(("voronoi", add(vm["anchors"]), add(vm["a2"]), add(vm["embedT"])))
        add_chain(chain)

    scalars = (jnp.stack(logdets).astype(F32) if logdets
               else jnp.zeros((1,), F32))
    return arrays, scalars, tuple(plan)


# ----------------------------------------------------------------------------
# Forward wrapper: one pallas_call for the whole model
# ----------------------------------------------------------------------------
def forward(params, x, *, logp=None, tb=None):
    return_logp = logp is not None
    N, D = x.shape
    if logp is None:
        logp = jnp.zeros((N, 1), F32)

    arrays, scalars, plan = _prepare(params)
    if params["vormixes"]:
        inv_sqrt_c = 1.0 / math.sqrt(params["vormixes"][0]["embedT"].shape[0])
    else:
        inv_sqrt_c = 1.0

    # Pad batch to a lane multiple (no dropped rows), go feature-major.
    n_pad = (-N) % 128
    npad = N + n_pad
    x_t = jnp.pad(x.astype(F32), ((0, n_pad), (0, 0))).T       # (D, npad)
    lp_t = jnp.pad(logp.astype(F32), ((0, n_pad), (0, 0))).T   # (1, npad)

    if tb is None:
        tb = npad
        for cand in (1024, 512, 256, 128):
            # prefer >= 2 grid steps so both v7x TensorCores get work
            if npad % cand == 0 and npad // cand >= 2:
                tb = cand
                break
    grid = (npad // tb,)

    kern = functools.partial(_fused_kernel, plan=plan, n_arrays=len(arrays),
                             dim=D, inv_sqrt_c=inv_sqrt_c)

    y_t, lp_out_t = pl.pallas_call(
        kern,
        out_shape=(jax.ShapeDtypeStruct((D, npad), F32),
                   jax.ShapeDtypeStruct((1, npad), F32)),
        grid=grid,
        in_specs=[pl.BlockSpec((D, tb), lambda i: (0, i)),
                  pl.BlockSpec((1, tb), lambda i: (0, i)),
                  pl.BlockSpec(memory_space=pltpu.MemorySpace.SMEM)]
                 + [pl.BlockSpec(a.shape, lambda i: (0, 0)) for a in arrays],
        out_specs=(pl.BlockSpec((D, tb), lambda i: (0, i)),
                   pl.BlockSpec((1, tb), lambda i: (0, i))),
        compiler_params=pltpu.CompilerParams(
            dimension_semantics=("parallel",)),
    )(x_t, lp_t, scalars, *arrays)

    z = y_t.T[:N]
    lp = lp_out_t.T[:N]
    return (z, lp) if return_logp else z


# ----------------------------------------------------------------------------
# Deterministic parameter construction (pre-transposed / pre-reduced forms)
# ----------------------------------------------------------------------------
def _init_actnorm(key, dim):
    # TODO(synk): layers.ActNorm1d uses data-dependent init; deterministic here.
    k1, k2 = jax.random.split(key)
    logs = 0.05 * jax.random.normal(k1, (dim, 1), F32)
    bias = 0.05 * jax.random.normal(k2, (dim, 1), F32)
    return {"kind": "actnorm", "exp_logs": jnp.exp(logs), "bias": bias,
            "logdet": jnp.sum(logs)}


def _init_mlp(key, kind, in_tags, in_dims, hidden, d_out, scale=0.1):
    # Weights stored transposed (out, in) for the feature-major layout;
    # w1 is split per input part, w3/b3 split into (logs, shift) halves.
    k1, k2, k3 = jax.random.split(key, 3)
    c_in = sum(in_dims)
    w1 = jax.random.normal(k1, (hidden, c_in), F32) * (scale / math.sqrt(c_in))
    w2 = jax.random.normal(k2, (hidden, hidden), F32) * (scale / math.sqrt(hidden))
    w3 = jax.random.normal(k3, (2 * d_out, hidden), F32) * (scale / math.sqrt(hidden))
    w1_parts, off = [], 0
    for w in in_dims:
        w1_parts.append(w1[:, off:off + w])
        off += w
    return {"kind": kind, "in_tags": tuple(in_tags),
            "w1": w1_parts, "b1": jnp.zeros((hidden, 1), F32),
            "w2": w2, "b2": jnp.zeros((hidden, 1), F32),
            "w3_logs": w3[:d_out], "b3_logs": jnp.zeros((d_out, 1), F32),
            "w3_shift": w3[d_out:], "b3_shift": jnp.zeros((d_out, 1), F32)}


def build_params(key, *, nblocks, dim, n_mixtures, cond_embed_dim, hidden=32):
    keys = iter(jax.random.split(key, 256))
    d1 = dim // 2
    d2 = dim - d1
    flows = []
    for k, nb in enumerate(nblocks):
        use_cond = (k > 0) and (cond_embed_dim > 0)
        chain = [_init_actnorm(next(keys), dim)]
        if use_cond:
            chain.append(_init_mlp(next(keys), "condaffine", ("cond",),
                                   (cond_embed_dim,), hidden, dim))
        for _ in range(nb):
            if use_cond:
                chain.append(_init_mlp(next(keys), "coupling", ("x1", "cond"),
                                       (d1, cond_embed_dim), hidden, d2))
            else:
                chain.append(_init_mlp(next(keys), "coupling", ("x1",),
                                       (d1,), hidden, d2))
            chain.append(_init_actnorm(next(keys), dim))
            if use_cond:
                chain.append(_init_mlp(next(keys), "condaffine", ("cond",),
                                       (cond_embed_dim,), hidden, dim))
        flows.append(chain)
    vormixes = []
    for _ in range(len(nblocks) - 1):
        anchors = jax.random.normal(next(keys), (n_mixtures, dim), F32)
        embed = jax.random.normal(next(keys), (n_mixtures, cond_embed_dim), F32)
        vormixes.append({"anchors": anchors,
                         "a2": jnp.sum(anchors * anchors, axis=1, keepdims=True),
                         "embedT": embed.T})
    return {"flows": flows, "vormixes": vormixes}


# ----------------------------------------------------------------------------
# Pure-JAX reference (row-major) for correctness checking
# ----------------------------------------------------------------------------
def reference_forward(params, x, logp):
    def mlp_row(layer, parts):
        h = sum(p @ w.T for w, p in zip(layer["w1"], parts)) + layer["b1"].T
        h = _gelu(h)
        h = _gelu(h @ layer["w2"].T + layer["b2"].T)
        logs = h @ layer["w3_logs"].T + layer["b3_logs"].T
        shift = h @ layer["w3_shift"].T + layer["b3_shift"].T
        return logs, shift

    def run_chain(chain, x, logp, cond):
        for layer in chain:
            if layer["kind"] == "actnorm":
                x = x * layer["exp_logs"].T + layer["bias"].T
                logp = logp - layer["logdet"]
            elif layer["kind"] == "condaffine":
                logs, shift = mlp_row(layer, [cond])
                x = x * jnp.exp(logs) + shift
                logp = logp - jnp.sum(logs, axis=-1, keepdims=True)
            else:  # coupling
                d1 = x.shape[1] // 2
                x1, x2 = x[:, :d1], x[:, d1:]
                parts = [x1 if t == "x1" else cond for t in layer["in_tags"]]
                logs, shift = mlp_row(layer, parts)
                y2 = x2 * jnp.exp(logs) + shift
                x = jnp.concatenate([x1, y2], axis=-1)
                logp = logp - jnp.sum(logs, axis=-1, keepdims=True)
        return x, logp

    x, logp = run_chain(params["flows"][0], x, logp, None)
    for vm, chain in zip(params["vormixes"], params["flows"][1:]):
        a = vm["anchors"]
        d2 = jnp.sum(x * x, axis=1, keepdims=True) - 2.0 * (x @ a.T) + vm["a2"].T
        idx = jnp.argmin(d2, axis=1)
        embed = vm["embedT"].T                       # (K, C)
        cond = embed[idx] / math.sqrt(embed.shape[1])
        x, logp = run_chain(chain, x, logp, cond)
    return x, logp


# ----------------------------------------------------------------------------
if __name__ == "__main__":
    key = jax.random.PRNGKey(0)
    kp, kx = jax.random.split(key)

    N, DIM, N_MIX, CDIM = 256, 2, 4, 32              # 2-D points (train_disjoint2d)
    params = build_params(kp, nblocks=(1, 1), dim=DIM,
                          n_mixtures=N_MIX, cond_embed_dim=CDIM)
    x = jax.random.normal(kx, (N, DIM), F32)

    fwd = jax.jit(lambda xx: forward(params, xx,
                                     logp=jnp.zeros((xx.shape[0], 1), F32)))
    z, logp = fwd(x)
    jax.block_until_ready((z, logp))

    assert z.shape == (N, DIM) and z.dtype == F32
    assert logp.shape == (N, 1) and logp.dtype == F32
    assert bool(jnp.all(jnp.isfinite(z))) and bool(jnp.all(jnp.isfinite(logp)))

    z_ref, lp_ref = reference_forward(params, x, jnp.zeros((N, 1), F32))
    assert bool(jnp.allclose(z, z_ref, atol=5e-3, rtol=0.0)), \
        ("z mismatch", float(jnp.max(jnp.abs(z - z_ref))))
    assert bool(jnp.allclose(logp, lp_ref, atol=5e-3, rtol=0.0)), \
        ("logp mismatch", float(jnp.max(jnp.abs(logp - lp_ref))))

    print("KERNEL_OK")
</pallas_src>

<mosaic_0001>
module attributes {stable_mosaic.version = 11 : i64} {
  func.func @_fused_kernel(%arg0: i32, %arg1: memref<2x128xf32, #tpu.memory_space<vmem>>, %arg2: memref<1x128xf32, #tpu.memory_space<vmem>>, %arg3: memref<4xf32, #tpu.memory_space<smem>>, %arg4: memref<2x1xf32, #tpu.memory_space<vmem>>, %arg5: memref<2x1xf32, #tpu.memory_space<vmem>>, %arg6: memref<32x1xf32, #tpu.memory_space<vmem>>, %arg7: memref<32x1xf32, #tpu.memory_space<vmem>>, %arg8: memref<32x32xf32, #tpu.memory_space<vmem>>, %arg9: memref<32x1xf32, #tpu.memory_space<vmem>>, %arg10: memref<1x32xf32, #tpu.memory_space<vmem>>, %arg11: memref<1x1xf32, #tpu.memory_space<vmem>>, %arg12: memref<1x32xf32, #tpu.memory_space<vmem>>, %arg13: memref<1x1xf32, #tpu.memory_space<vmem>>, %arg14: memref<2x1xf32, #tpu.memory_space<vmem>>, %arg15: memref<2x1xf32, #tpu.memory_space<vmem>>, %arg16: memref<4x2xf32, #tpu.memory_space<vmem>>, %arg17: memref<4x1xf32, #tpu.memory_space<vmem>>, %arg18: memref<32x4xf32, #tpu.memory_space<vmem>>, %arg19: memref<2x1xf32, #tpu.memory_space<vmem>>, %arg20: memref<2x1xf32, #tpu.memory_space<vmem>>, %arg21: memref<32x32xf32, #tpu.memory_space<vmem>>, %arg22: memref<32x1xf32, #tpu.memory_space<vmem>>, %arg23: memref<32x32xf32, #tpu.memory_space<vmem>>, %arg24: memref<32x1xf32, #tpu.memory_space<vmem>>, %arg25: memref<2x32xf32, #tpu.memory_space<vmem>>, %arg26: memref<2x1xf32, #tpu.memory_space<vmem>>, %arg27: memref<2x32xf32, #tpu.memory_space<vmem>>, %arg28: memref<2x1xf32, #tpu.memory_space<vmem>>, %arg29: memref<32x1xf32, #tpu.memory_space<vmem>>, %arg30: memref<32x32xf32, #tpu.memory_space<vmem>>, %arg31: memref<32x1xf32, #tpu.memory_space<vmem>>, %arg32: memref<32x32xf32, #tpu.memory_space<vmem>>, %arg33: memref<32x1xf32, #tpu.memory_space<vmem>>, %arg34: memref<1x32xf32, #tpu.memory_space<vmem>>, %arg35: memref<1x1xf32, #tpu.memory_space<vmem>>, %arg36: memref<1x32xf32, #tpu.memory_space<vmem>>, %arg37: memref<1x1xf32, #tpu.memory_space<vmem>>, %arg38: memref<2x1xf32, #tpu.memory_space<vmem>>, %arg39: memref<2x1xf32, #tpu.memory_space<vmem>>, %arg40: memref<32x32xf32, #tpu.memory_space<vmem>>, %arg41: memref<32x1xf32, #tpu.memory_space<vmem>>, %arg42: memref<32x32xf32, #tpu.memory_space<vmem>>, %arg43: memref<32x1xf32, #tpu.memory_space<vmem>>, %arg44: memref<2x32xf32, #tpu.memory_space<vmem>>, %arg45: memref<2x1xf32, #tpu.memory_space<vmem>>, %arg46: memref<2x32xf32, #tpu.memory_space<vmem>>, %arg47: memref<2x1xf32, #tpu.memory_space<vmem>>, %arg48: memref<2x128xf32, #tpu.memory_space<vmem>>, %arg49: memref<1x128xf32, #tpu.memory_space<vmem>>) attributes {dimension_semantics = [#tpu.dimension_semantics<parallel>], iteration_bounds = array<i64: 2>, scalar_prefetch = 0 : i64, scratch_operands = 0 : i64, tpu.core_type = #tpu.core_type<tc>, window_params = [{transform_indices = @transform_0, window_bounds = array<i64: 2, 128>}, {transform_indices = @transform_1, window_bounds = array<i64: 1, 128>}, {transform_indices = @transform_2, window_bounds = array<i64: 4>}, {pipeline_mode = #tpu.pipeline_mode<synchronous>, transform_indices = @transform_3, window_bounds = array<i64: 2, 1>}, {pipeline_mode = #tpu.pipeline_mode<synchronous>, transform_indices = @transform_4, window_bounds = array<i64: 2, 1>}, {pipeline_mode = #tpu.pipeline_mode<synchronous>, transform_indices = @transform_5, window_bounds = array<i64: 32, 1>}, {pipeline_mode = #tpu.pipeline_mode<synchronous>, transform_indices = @transform_6, window_bounds = array<i64: 32, 1>}, {pipeline_mode = #tpu.pipeline_mode<synchronous>, transform_indices = @transform_7, window_bounds = array<i64: 32, 32>}, {pipeline_mode = #tpu.pipeline_mode<synchronous>, transform_indices = @transform_8, window_bounds = array<i64: 32, 1>}, {pipeline_mode = #tpu.pipeline_mode<synchronous>, transform_indices = @transform_9, window_bounds = array<i64: 1, 32>}, {pipeline_mode = #tpu.pipeline_mode<synchronous>, transform_indices = @transform_10, window_bounds = array<i64: 1, 1>}, {pipeline_mode = #tpu.pipeline_mode<synchronous>, transform_indices = @transform_11, window_bounds = array<i64: 1, 32>}, {pipeline_mode = #tpu.pipeline_mode<synchronous>, transform_indices = @transform_12, window_bounds = array<i64: 1, 1>}, {pipeline_mode = #tpu.pipeline_mode<synchronous>, transform_indices = @transform_13, window_bounds = array<i64: 2, 1>}, {pipeline_mode = #tpu.pipeline_mode<synchronous>, transform_indices = @transform_14, window_bounds = array<i64: 2, 1>}, {pipeline_mode = #tpu.pipeline_mode<synchronous>, transform_indices = @transform_15, window_bounds = array<i64: 4, 2>}, {pipeline_mode = #tpu.pipeline_mode<synchronous>, transform_indices = @transform_16, window_bounds = array<i64: 4, 1>}, {pipeline_mode = #tpu.pipeline_mode<synchronous>, transform_indices = @transform_17, window_bounds = array<i64: 32, 4>}, {pipeline_mode = #tpu.pipeline_mode<synchronous>, transform_indices = @transform_18, window_bounds = array<i64: 2, 1>}, {pipeline_mode = #tpu.pipeline_mode<synchronous>, transform_indices = @transform_19, window_bounds = array<i64: 2, 1>}, {pipeline_mode = #tpu.pipeline_mode<synchronous>, transform_indices = @transform_20, window_bounds = array<i64: 32, 32>}, {pipeline_mode = #tpu.pipeline_mode<synchronous>, transform_indices = @transform_21, window_bounds = array<i64: 32, 1>}, {pipeline_mode = #tpu.pipeline_mode<synchronous>, transform_indices = @transform_22, window_bounds = array<i64: 32, 32>}, {pipeline_mode = #tpu.pipeline_mode<synchronous>, transform_indices = @transform_23, window_bounds = array<i64: 32, 1>}, {pipeline_mode = #tpu.pipeline_mode<synchronous>, transform_indices = @transform_24, window_bounds = array<i64: 2, 32>}, {pipeline_mode = #tpu.pipeline_mode<synchronous>, transform_indices = @transform_25, window_bounds = array<i64: 2, 1>}, {pipeline_mode = #tpu.pipeline_mode<synchronous>, transform_indices = @transform_26, window_bounds = array<i64: 2, 32>}, {pipeline_mode = #tpu.pipeline_mode<synchronous>, transform_indices = @transform_27, window_bounds = array<i64: 2, 1>}, {pipeline_mode = #tpu.pipeline_mode<synchronous>, transform_indices = @transform_28, window_bounds = array<i64: 32, 1>}, {pipeline_mode = #tpu.pipeline_mode<synchronous>, transform_indices = @transform_29, window_bounds = array<i64: 32, 32>}, {pipeline_mode = #tpu.pipeline_mode<synchronous>, transform_indices = @transform_30, window_bounds = array<i64: 32, 1>}, {pipeline_mode = #tpu.pipeline_mode<synchronous>, transform_indices = @transform_31, window_bounds = array<i64: 32, 32>}, {pipeline_mode = #tpu.pipeline_mode<synchronous>, transform_indices = @transform_32, window_bounds = array<i64: 32, 1>}, {pipeline_mode = #tpu.pipeline_mode<synchronous>, transform_indices = @transform_33, window_bounds = array<i64: 1, 32>}, {pipeline_mode = #tpu.pipeline_mode<synchronous>, transform_indices = @transform_34, window_bounds = array<i64: 1, 1>}, {pipeline_mode = #tpu.pipeline_mode<synchronous>, transform_indices = @transform_35, window_bounds = array<i64: 1, 32>}, {pipeline_mode = #tpu.pipeline_mode<synchronous>, transform_indices = @transform_36, window_bounds = array<i64: 1, 1>}, {pipeline_mode = #tpu.pipeline_mode<synchronous>, transform_indices = @transform_37, window_bounds = array<i64: 2, 1>}, {pipeline_mode = #tpu.pipeline_mode<synchronous>, transform_indices = @transform_38, window_bounds = array<i64: 2, 1>}, {pipeline_mode = #tpu.pipeline_mode<synchronous>, transform_indices = @transform_39, window_bounds = array<i64: 32, 32>}, {pipeline_mode = #tpu.pipeline_mode<synchronous>, transform_indices = @transform_40, window_bounds = array<i64: 32, 1>}, {pipeline_mode = #tpu.pipeline_mode<synchronous>, transform_indices = @transform_41, window_bounds = array<i64: 32, 32>}, {pipeline_mode = #tpu.pipeline_mode<synchronous>, transform_indices = @transform_42, window_bounds = array<i64: 32, 1>}, {pipeline_mode = #tpu.pipeline_mode<synchronous>, transform_indices = @transform_43, window_bounds = array<i64: 2, 32>}, {pipeline_mode = #tpu.pipeline_mode<synchronous>, transform_indices = @transform_44, window_bounds = array<i64: 2, 1>}, {pipeline_mode = #tpu.pipeline_mode<synchronous>, transform_indices = @transform_45, window_bounds = array<i64: 2, 32>}, {pipeline_mode = #tpu.pipeline_mode<synchronous>, transform_indices = @transform_46, window_bounds = array<i64: 2, 1>}, {transform_indices = @transform_47, window_bounds = array<i64: 2, 128>}, {transform_indices = @transform_48, window_bounds = array<i64: 1, 128>}]} {
    %c0 = arith.constant 0 : index
    %c0_0 = arith.constant 0 : index
    %0 = vector.load %arg1[%c0, %c0_0] : memref<2x128xf32, #tpu.memory_space<vmem>>, vector<2x128xf32>
    %c0_1 = arith.constant 0 : index
    %c0_2 = arith.constant 0 : index
    %1 = vector.load %arg2[%c0_1, %c0_2] : memref<1x128xf32, #tpu.memory_space<vmem>>, vector<1x128xf32>
    %c0_3 = arith.constant 0 : index
    %c0_4 = arith.constant 0 : index
    %2 = vector.load %arg4[%c0_3, %c0_4] : memref<2x1xf32, #tpu.memory_space<vmem>>, vector<2x1xf32>
    %3 = vector.broadcast %2 : vector<2x1xf32> to vector<2x128xf32>
    %4 = arith.mulf %0, %3 : vector<2x128xf32>
    %c0_5 = arith.constant 0 : index
    %c0_6 = arith.constant 0 : index
    %5 = vector.load %arg5[%c0_5, %c0_6] : memref<2x1xf32, #tpu.memory_space<vmem>>, vector<2x1xf32>
    %6 = vector.broadcast %5 : vector<2x1xf32> to vector<2x128xf32>
    %7 = arith.addf %4, %6 : vector<2x128xf32>
    %c0_7 = arith.constant 0 : index
    %8 = memref.load %arg3[%c0_7] : memref<4xf32, #tpu.memory_space<smem>>
    %9 = vector.broadcast %8 : f32 to vector<1x128xf32>
    %10 = arith.subf %1, %9 : vector<1x128xf32>
    %11 = vector.extract_strided_slice %7 {offsets = [0, 0], sizes = [1, 128], strides = [1, 1]} : vector<2x128xf32> to vector<1x128xf32>
    %12 = vector.extract_strided_slice %7 {offsets = [1, 0], sizes = [1, 128], strides = [1, 1]} : vector<2x128xf32> to vector<1x128xf32>
    %c0_8 = arith.constant 0 : index
    %c0_9 = arith.constant 0 : index
    %13 = vector.load %arg7[%c0_8, %c0_9] : memref<32x1xf32, #tpu.memory_space<vmem>>, vector<32x1xf32>
    %c0_10 = arith.constant 0 : index
    %c0_11 = arith.constant 0 : index
    %14 = vector.load %arg6[%c0_10, %c0_11] : memref<32x1xf32, #tpu.memory_space<vmem>>, vector<32x1xf32>
    %15 = vector.broadcast %14 : vector<32x1xf32> to vector<32x128xf32>
    %16 = vector.broadcast %11 : vector<1x128xf32> to vector<32x128xf32>
    %17 = arith.mulf %15, %16 : vector<32x128xf32>
    %18 = vector.broadcast %13 : vector<32x1xf32> to vector<32x128xf32>
    %19 = arith.addf %18, %17 : vector<32x128xf32>
    %cst = arith.constant 5.000000e-01 : f32
    %20 = vector.broadcast %cst : f32 to vector<32x128xf32>
    %21 = arith.mulf %20, %19 : vector<32x128xf32>
    %cst_12 = arith.constant 4.471500e-02 : f32
    %22 = vector.broadcast %cst_12 : f32 to vector<32x128xf32>
    %23 = arith.mulf %22, %19 : vector<32x128xf32>
    %24 = arith.mulf %23, %19 : vector<32x128xf32>
    %25 = arith.mulf %24, %19 : vector<32x128xf32>
    %26 = arith.addf %19, %25 : vector<32x128xf32>
    %cst_13 = arith.constant 0.797884583 : f32
    %27 = vector.broadcast %cst_13 : f32 to vector<32x128xf32>
    %28 = arith.mulf %27, %26 : vector<32x128xf32>
    %29 = math.tanh %28 : vector<32x128xf32>
    %cst_14 = arith.constant 1.000000e+00 : f32
    %30 = vector.broadcast %cst_14 : f32 to vector<32x128xf32>
    %31 = arith.addf %30, %29 : vector<32x128xf32>
    %32 = arith.mulf %21, %31 : vector<32x128xf32>
    %c0_15 = arith.constant 0 : index
    %c0_16 = arith.constant 0 : index
    %33 = vector.load %arg8[%c0_15, %c0_16] : memref<32x32xf32, #tpu.memory_space<vmem>>, vector<32x32xf32>
    %cst_17 = arith.constant dense<0.000000e+00> : vector<32x128xf32>
    %34 = tpu.matmul %33, %32, %cst_17 {dimension_numbers = #tpu.dot_dimension_numbers<[1], [0], [0], [1], [0, 0, 1, 1], [], []>} : vector<32x32xf32>, vector<32x128xf32>, vector<32x128xf32> -> vector<32x128xf32>
    %c0_18 = arith.constant 0 : index
    %c0_19 = arith.constant 0 : index
    %35 = vector.load %arg9[%c0_18, %c0_19] : memref<32x1xf32, #tpu.memory_space<vmem>>, vector<32x1xf32>
    %36 = vector.broadcast %35 : vector<32x1xf32> to vector<32x128xf32>
    %37 = arith.addf %34, %36 : vector<32x128xf32>
    %cst_20 = arith.constant 5.000000e-01 : f32
    %38 = vector.broadcast %cst_20 : f32 to vector<32x128xf32>
    %39 = arith.mulf %38, %37 : vector<32x128xf32>
    %cst_21 = arith.constant 4.471500e-02 : f32
    %40 = vector.broadcast %cst_21 : f32 to vector<32x128xf32>
    %41 = arith.mulf %40, %37 : vector<32x128xf32>
    %42 = arith.mulf %41, %37 : vector<32x128xf32>
    %43 = arith.mulf %42, %37 : vector<32x128xf32>
    %44 = arith.addf %37, %43 : vector<32x128xf32>
    %cst_22 = arith.constant 0.797884583 : f32
    %45 = vector.broadcast %cst_22 : f32 to vector<32x128xf32>
    %46 = arith.mulf %45, %44 : vector<32x128xf32>
    %47 = math.tanh %46 : vector<32x128xf32>
    %cst_23 = arith.constant 1.000000e+00 : f32
    %48 = vector.broadcast %cst_23 : f32 to vector<32x128xf32>
    %49 = arith.addf %48, %47 : vector<32x128xf32>
    %50 = arith.mulf %39, %49 : vector<32x128xf32>
    %c0_24 = arith.constant 0 : index
    %c0_25 = arith.constant 0 : index
    %51 = vector.load %arg10[%c0_24, %c0_25] : memref<1x32xf32, #tpu.memory_space<vmem>>, vector<1x32xf32>
    %cst_26 = arith.constant dense<0.000000e+00> : vector<1x128xf32>
    %52 = tpu.matmul %51, %50, %cst_26 {dimension_numbers = #tpu.dot_dimension_numbers<[1], [0], [0], [1], [0, 0, 1, 1], [], []>} : vector<1x32xf32>, vector<32x128xf32>, vector<1x128xf32> -> vector<1x128xf32>
    %c0_27 = arith.constant 0 : index
    %c0_28 = arith.constant 0 : index
    %53 = vector.load %arg11[%c0_27, %c0_28] : memref<1x1xf32, #tpu.memory_space<vmem>>, vector<1x1xf32>
    %54 = vector.broadcast %53 : vector<1x1xf32> to vector<1x128xf32>
    %55 = arith.addf %52, %54 : vector<1x128xf32>
    %c0_29 = arith.constant 0 : index
    %c0_30 = arith.constant 0 : index
    %56 = vector.load %arg12[%c0_29, %c0_30] : memref<1x32xf32, #tpu.memory_space<vmem>>, vector<1x32xf32>
    %cst_31 = arith.constant dense<0.000000e+00> : vector<1x128xf32>
    %57 = tpu.matmul %56, %50, %cst_31 {dimension_numbers = #tpu.dot_dimension_numbers<[1], [0], [0], [1], [0, 0, 1, 1], [], []>} : vector<1x32xf32>, vector<32x128xf32>, vector<1x128xf32> -> vector<1x128xf32>
    %c0_32 = arith.constant 0 : index
    %c0_33 = arith.constant 0 : index
    %58 = vector.load %arg13[%c0_32, %c0_33] : memref<1x1xf32, #tpu.memory_space<vmem>>, vector<1x1xf32>
    %59 = vector.broadcast %58 : vector<1x1xf32> to vector<1x128xf32>
    %60 = arith.addf %57, %59 : vector<1x128xf32>
    %61 = math.exp %55 : vector<1x128xf32>
    %62 = arith.mulf %12, %61 : vector<1x128xf32>
    %63 = arith.addf %62, %60 : vector<1x128xf32>
    %cst_34 = arith.constant dense<0.000000e+00> : vector<128xf32>
    %64 = vector.multi_reduction <add>, %55, %cst_34 [0] : vector<1x128xf32> to vector<128xf32>
    %65 = vector.shape_cast %64 : vector<128xf32> to vector<1x128xf32>
    %66 = arith.subf %10, %65 : vector<1x128xf32>
    %67 = tpu.concatenate %11, %63 in 0 : vector<1x128xf32>, vector<1x128xf32> -> vector<2x128xf32>
    %c0_35 = arith.constant 0 : index
    %c0_36 = arith.constant 0 : index
    %68 = vector.load %arg14[%c0_35, %c0_36] : memref<2x1xf32, #tpu.memory_space<vmem>>, vector<2x1xf32>
    %69 = vector.broadcast %68 : vector<2x1xf32> to vector<2x128xf32>
    %70 = arith.mulf %67, %69 : vector<2x128xf32>
    %c0_37 = arith.constant 0 : index
    %c0_38 = arith.constant 0 : index
    %71 = vector.load %arg15[%c0_37, %c0_38] : memref<2x1xf32, #tpu.memory_space<vmem>>, vector<2x1xf32>
    %72 = vector.broadcast %71 : vector<2x1xf32> to vector<2x128xf32>
    %73 = arith.addf %70, %72 : vector<2x128xf32>
    %c1 = arith.constant 1 : index
    %74 = memref.load %arg3[%c1] : memref<4xf32, #tpu.memory_space<smem>>
    %75 = vector.broadcast %74 : f32 to vector<1x128xf32>
    %76 = arith.subf %66, %75 : vector<1x128xf32>
    %c0_39 = arith.constant 0 : index
    %c0_40 = arith.constant 0 : index
    %77 = vector.load %arg16[%c0_39, %c0_40] : memref<4x2xf32, #tpu.memory_space<vmem>>, vector<4x2xf32>
    %c0_41 = arith.constant 0 : index
    %c0_42 = arith.constant 0 : index
    %78 = vector.load %arg17[%c0_41, %c0_42] : memref<4x1xf32, #tpu.memory_space<vmem>>, vector<4x1xf32>
    %cst_43 = arith.constant dense<0.000000e+00> : vector<4x128xf32>
    %79 = tpu.matmul %77, %73, %cst_43 {dimension_numbers = #tpu.dot_dimension_numbers<[1], [0], [0], [1], [0, 0, 1, 1], [], []>} : vector<4x2xf32>, vector<2x128xf32>, vector<4x128xf32> -> vector<4x128xf32>
    %80 = arith.mulf %73, %73 : vector<2x128xf32>
    %cst_44 = arith.constant dense<0.000000e+00> : vector<128xf32>
    %81 = vector.multi_reduction <add>, %80, %cst_44 [0] : vector<2x128xf32> to vector<128xf32>
    %82 = vector.shape_cast %81 : vector<128xf32> to vector<1x128xf32>
    %83 = vector.broadcast %78 : vector<4x1xf32> to vector<4x128xf32>
    %84 = vector.broadcast %82 : vector<1x128xf32> to vector<4x128xf32>
    %85 = arith.addf %83, %84 : vector<4x128xf32>
    %cst_45 = arith.constant 2.000000e+00 : f32
    %86 = vector.broadcast %cst_45 : f32 to vector<4x128xf32>
    %87 = arith.mulf %86, %79 : vector<4x128xf32>
    %88 = arith.subf %85, %87 : vector<4x128xf32>
    %cst_46 = arith.constant dense<0x7F800000> : vector<128xf32>
    %89 = vector.multi_reduction <minimumf>, %88, %cst_46 [0] : vector<4x128xf32> to vector<128xf32>
    %90 = vector.shape_cast %89 : vector<128xf32> to vector<1x128xf32>
    %false = arith.constant false
    %91 = vector.broadcast %false : i1 to vector<1x128xi1>
    %92 = vector.extract_strided_slice %88 {offsets = [0, 0], sizes = [1, 128], strides = [1, 1]} : vector<4x128xf32> to vector<1x128xf32>
    %93 = arith.cmpf ole, %92, %90 : vector<1x128xf32>
    %cst_47 = arith.constant dense<true> : vector<1x128xi1>
    %94 = arith.xori %91, %cst_47 : vector<1x128xi1>
    %95 = arith.andi %93, %94 : vector<1x128xi1>
    %96 = arith.extui %95 : vector<1x128xi1> to vector<1x128xi32>
    %97 = arith.sitofp %96 : vector<1x128xi32> to vector<1x128xf32>
    %98 = arith.ori %91, %93 : vector<1x128xi1>
    %99 = vector.extract_strided_slice %88 {offsets = [1, 0], sizes = [1, 128], strides = [1, 1]} : vector<4x128xf32> to vector<1x128xf32>
    %100 = arith.cmpf ole, %99, %90 : vector<1x128xf32>
    %cst_48 = arith.constant dense<true> : vector<1x128xi1>
    %101 = arith.xori %98, %cst_48 : vector<1x128xi1>
    %102 = arith.andi %100, %101 : vector<1x128xi1>
    %103 = arith.extui %102 : vector<1x128xi1> to vector<1x128xi32>
    %104 = arith.sitofp %103 : vector<1x128xi32> to vector<1x128xf32>
    %105 = arith.ori %98, %100 : vector<1x128xi1>
    %106 = vector.extract_strided_slice %88 {offsets = [2, 0], sizes = [1, 128], strides = [1, 1]} : vector<4x128xf32> to vector<1x128xf32>
    %107 = arith.cmpf ole, %106, %90 : vector<1x128xf32>
    %cst_49 = arith.constant dense<true> : vector<1x128xi1>
    %108 = arith.xori %105, %cst_49 : vector<1x128xi1>
    %109 = arith.andi %107, %108 : vector<1x128xi1>
    %110 = arith.extui %109 : vector<1x128xi1> to vector<1x128xi32>
    %111 = arith.sitofp %110 : vector<1x128xi32> to vector<1x128xf32>
    %112 = arith.ori %105, %107 : vector<1x128xi1>
    %113 = vector.extract_strided_slice %88 {offsets = [3, 0], sizes = [1, 128], strides = [1, 1]} : vector<4x128xf32> to vector<1x128xf32>
    %114 = arith.cmpf ole, %113, %90 : vector<1x128xf32>
    %cst_50 = arith.constant dense<true> : vector<1x128xi1>
    %115 = arith.xori %112, %cst_50 : vector<1x128xi1>
    %116 = arith.andi %114, %115 : vector<1x128xi1>
    %117 = arith.extui %116 : vector<1x128xi1> to vector<1x128xi32>
    %118 = arith.sitofp %117 : vector<1x128xi32> to vector<1x128xf32>
    %119 = tpu.concatenate %97, %104, %111, %118 in 0 : vector<1x128xf32>, vector<1x128xf32>, vector<1x128xf32>, vector<1x128xf32> -> vector<4x128xf32>
    %c0_51 = arith.constant 0 : index
    %c0_52 = arith.constant 0 : index
    %120 = vector.load %arg18[%c0_51, %c0_52] : memref<32x4xf32, #tpu.memory_space<vmem>>, vector<32x4xf32>
    %cst_53 = arith.constant dense<0.000000e+00> : vector<32x128xf32>
    %121 = tpu.matmul %120, %119, %cst_53 {dimension_numbers = #tpu.dot_dimension_numbers<[1], [0], [0], [1], [0, 0, 1, 1], [], []>} : vector<32x4xf32>, vector<4x128xf32>, vector<32x128xf32> -> vector<32x128xf32>
    %cst_54 = arith.constant 0.176776692 : f32
    %122 = vector.broadcast %cst_54 : f32 to vector<32x128xf32>
    %123 = arith.mulf %121, %122 : vector<32x128xf32>
    %c0_55 = arith.constant 0 : index
    %c0_56 = arith.constant 0 : index
    %124 = vector.load %arg19[%c0_55, %c0_56] : memref<2x1xf32, #tpu.memory_space<vmem>>, vector<2x1xf32>
    %125 = vector.broadcast %124 : vector<2x1xf32> to vector<2x128xf32>
    %126 = arith.mulf %73, %125 : vector<2x128xf32>
    %c0_57 = arith.constant 0 : index
    %c0_58 = arith.constant 0 : index
    %127 = vector.load %arg20[%c0_57, %c0_58] : memref<2x1xf32, #tpu.memory_space<vmem>>, vector<2x1xf32>
    %128 = vector.broadcast %127 : vector<2x1xf32> to vector<2x128xf32>
    %129 = arith.addf %126, %128 : vector<2x128xf32>
    %c2 = arith.constant 2 : index
    %130 = memref.load %arg3[%c2] : memref<4xf32, #tpu.memory_space<smem>>
    %131 = vector.broadcast %130 : f32 to vector<1x128xf32>
    %132 = arith.subf %76, %131 : vector<1x128xf32>
    %c0_59 = arith.constant 0 : index
    %c0_60 = arith.constant 0 : index
    %133 = vector.load %arg22[%c0_59, %c0_60] : memref<32x1xf32, #tpu.memory_space<vmem>>, vector<32x1xf32>
    %c0_61 = arith.constant 0 : index
    %c0_62 = arith.constant 0 : index
    %134 = vector.load %arg21[%c0_61, %c0_62] : memref<32x32xf32, #tpu.memory_space<vmem>>, vector<32x32xf32>
    %cst_63 = arith.constant dense<0.000000e+00> : vector<32x128xf32>
    %135 = tpu.matmul %134, %123, %cst_63 {dimension_numbers = #tpu.dot_dimension_numbers<[1], [0], [0], [1], [0, 0, 1, 1], [], []>} : vector<32x32xf32>, vector<32x128xf32>, vector<32x128xf32> -> vector<32x128xf32>
    %136 = vector.broadcast %133 : vector<32x1xf32> to vector<32x128xf32>
    %137 = arith.addf %136, %135 : vector<32x128xf32>
    %cst_64 = arith.constant 5.000000e-01 : f32
    %138 = vector.broadcast %cst_64 : f32 to vector<32x128xf32>
    %139 = arith.mulf %138, %137 : vector<32x128xf32>
    %cst_65 = arith.constant 4.471500e-02 : f32
    %140 = vector.broadcast %cst_65 : f32 to vector<32x128xf32>
    %141 = arith.mulf %140, %137 : vector<32x128xf32>
    %142 = arith.mulf %141, %137 : vector<32x128xf32>
    %143 = arith.mulf %142, %137 : vector<32x128xf32>
    %144 = arith.addf %137, %143 : vector<32x128xf32>
    %cst_66 = arith.constant 0.797884583 : f32
    %145 = vector.broadcast %cst_66 : f32 to vector<32x128xf32>
    %146 = arith.mulf %145, %144 : vector<32x128xf32>
    %147 = math.tanh %146 : vector<32x128xf32>
    %cst_67 = arith.constant 1.000000e+00 : f32
    %148 = vector.broadcast %cst_67 : f32 to vector<32x128xf32>
    %149 = arith.addf %148, %147 : vector<32x128xf32>
    %150 = arith.mulf %139, %149 : vector<32x128xf32>
    %c0_68 = arith.constant 0 : index
    %c0_69 = arith.constant 0 : index
    %151 = vector.load %arg23[%c0_68, %c0_69] : memref<32x32xf32, #tpu.memory_space<vmem>>, vector<32x32xf32>
    %cst_70 = arith.constant dense<0.000000e+00> : vector<32x128xf32>
    %152 = tpu.matmul %151, %150, %cst_70 {dimension_numbers = #tpu.dot_dimension_numbers<[1], [0], [0], [1], [0, 0, 1, 1], [], []>} : vector<32x32xf32>, vector<32x128xf32>, vector<32x128xf32> -> vector<32x128xf32>
    %c0_71 = arith.constant 0 : index
    %c0_72 = arith.constant 0 : index
    %153 = vector.load %arg24[%c0_71, %c0_72] : memref<32x1xf32, #tpu.memory_space<vmem>>, vector<32x1xf32>
    %154 = vector.broadcast %153 : vector<32x1xf32> to vector<32x128xf32>
    %155 = arith.addf %152, %154 : vector<32x128xf32>
    %cst_73 = arith.constant 5.000000e-01 : f32
    %156 = vector.broadcast %cst_73 : f32 to vector<32x128xf32>
    %157 = arith.mulf %156, %155 : vector<32x128xf32>
    %cst_74 = arith.constant 4.471500e-02 : f32
    %158 = vector.broadcast %cst_74 : f32 to vector<32x128xf32>
    %159 = arith.mulf %158, %155 : vector<32x128xf32>
    %160 = arith.mulf %159, %155 : vector<32x128xf32>
    %161 = arith.mulf %160, %155 : vector<32x128xf32>
    %162 = arith.addf %155, %161 : vector<32x128xf32>
    %cst_75 = arith.constant 0.797884583 : f32
    %163 = vector.broadcast %cst_75 : f32 to vector<32x128xf32>
    %164 = arith.mulf %163, %162 : vector<32x128xf32>
    %165 = math.tanh %164 : vector<32x128xf32>
    %cst_76 = arith.constant 1.000000e+00 : f32
    %166 = vector.broadcast %cst_76 : f32 to vector<32x128xf32>
    %167 = arith.addf %166, %165 : vector<32x128xf32>
    %168 = arith.mulf %157, %167 : vector<32x128xf32>
    %c0_77 = arith.constant 0 : index
    %c0_78 = arith.constant 0 : index
    %169 = vector.load %arg25[%c0_77, %c0_78] : memref<2x32xf32, #tpu.memory_space<vmem>>, vector<2x32xf32>
    %cst_79 = arith.constant dense<0.000000e+00> : vector<2x128xf32>
    %170 = tpu.matmul %169, %168, %cst_79 {dimension_numbers = #tpu.dot_dimension_numbers<[1], [0], [0], [1], [0, 0, 1, 1], [], []>} : vector<2x32xf32>, vector<32x128xf32>, vector<2x128xf32> -> vector<2x128xf32>
    %c0_80 = arith.constant 0 : index
    %c0_81 = arith.constant 0 : index
    %171 = vector.load %arg26[%c0_80, %c0_81] : memref<2x1xf32, #tpu.memory_space<vmem>>, vector<2x1xf32>
    %172 = vector.broadcast %171 : vector<2x1xf32> to vector<2x128xf32>
    %173 = arith.addf %170, %172 : vector<2x128xf32>
    %c0_82 = arith.constant 0 : index
    %c0_83 = arith.constant 0 : index
    %174 = vector.load %arg27[%c0_82, %c0_83] : memref<2x32xf32, #tpu.memory_space<vmem>>, vector<2x32xf32>
    %cst_84 = arith.constant dense<0.000000e+00> : vector<2x128xf32>
    %175 = tpu.matmul %174, %168, %cst_84 {dimension_numbers = #tpu.dot_dimension_numbers<[1], [0], [0], [1], [0, 0, 1, 1], [], []>} : vector<2x32xf32>, vector<32x128xf32>, vector<2x128xf32> -> vector<2x128xf32>
    %c0_85 = arith.constant 0 : index
    %c0_86 = arith.constant 0 : index
    %176 = vector.load %arg28[%c0_85, %c0_86] : memref<2x1xf32, #tpu.memory_space<vmem>>, vector<2x1xf32>
    %177 = vector.broadcast %176 : vector<2x1xf32> to vector<2x128xf32>
    %178 = arith.addf %175, %177 : vector<2x128xf32>
    %179 = math.exp %173 : vector<2x128xf32>
    %180 = arith.mulf %129, %179 : vector<2x128xf32>
    %181 = arith.addf %180, %178 : vector<2x128xf32>
    %cst_87 = arith.constant dense<0.000000e+00> : vector<128xf32>
    %182 = vector.multi_reduction <add>, %173, %cst_87 [0] : vector<2x128xf32> to vector<128xf32>
    %183 = vector.shape_cast %182 : vector<128xf32> to vector<1x128xf32>
    %184 = arith.subf %132, %183 : vector<1x128xf32>
    %185 = vector.extract_strided_slice %181 {offsets = [0, 0], sizes = [1, 128], strides = [1, 1]} : vector<2x128xf32> to vector<1x128xf32>
    %186 = vector.extract_strided_slice %181 {offsets = [1, 0], sizes = [1, 128], strides = [1, 1]} : vector<2x128xf32> to vector<1x128xf32>
    %c0_88 = arith.constant 0 : index
    %c0_89 = arith.constant 0 : index
    %187 = vector.load %arg31[%c0_88, %c0_89] : memref<32x1xf32, #tpu.memory_space<vmem>>, vector<32x1xf32>
    %c0_90 = arith.constant 0 : index
    %c0_91 = arith.constant 0 : index
    %188 = vector.load %arg29[%c0_90, %c0_91] : memref<32x1xf32, #tpu.memory_space<vmem>>, vector<32x1xf32>
    %189 = vector.broadcast %188 : vector<32x1xf32> to vector<32x128xf32>
    %190 = vector.broadcast %185 : vector<1x128xf32> to vector<32x128xf32>
    %191 = arith.mulf %189, %190 : vector<32x128xf32>
    %192 = vector.broadcast %187 : vector<32x1xf32> to vector<32x128xf32>
    %193 = arith.addf %192, %191 : vector<32x128xf32>
    %c0_92 = arith.constant 0 : index
    %c0_93 = arith.constant 0 : index
    %194 = vector.load %arg30[%c0_92, %c0_93] : memref<32x32xf32, #tpu.memory_space<vmem>>, vector<32x32xf32>
    %cst_94 = arith.constant dense<0.000000e+00> : vector<32x128xf32>
    %195 = tpu.matmul %194, %123, %cst_94 {dimension_numbers = #tpu.dot_dimension_numbers<[1], [0], [0], [1], [0, 0, 1, 1], [], []>} : vector<32x32xf32>, vector<32x128xf32>, vector<32x128xf32> -> vector<32x128xf32>
    %196 = arith.addf %193, %195 : vector<32x128xf32>
    %cst_95 = arith.constant 5.000000e-01 : f32
    %197 = vector.broadcast %cst_95 : f32 to vector<32x128xf32>
    %198 = arith.mulf %197, %196 : vector<32x128xf32>
    %cst_96 = arith.constant 4.471500e-02 : f32
    %199 = vector.broadcast %cst_96 : f32 to vector<32x128xf32>
    %200 = arith.mulf %199, %196 : vector<32x128xf32>
    %201 = arith.mulf %200, %196 : vector<32x128xf32>
    %202 = arith.mulf %201, %196 : vector<32x128xf32>
    %203 = arith.addf %196, %202 : vector<32x128xf32>
    %cst_97 = arith.constant 0.797884583 : f32
    %204 = vector.broadcast %cst_97 : f32 to vector<32x128xf32>
    %205 = arith.mulf %204, %203 : vector<32x128xf32>
    %206 = math.tanh %205 : vector<32x128xf32>
    %cst_98 = arith.constant 1.000000e+00 : f32
    %207 = vector.broadcast %cst_98 : f32 to vector<32x128xf32>
    %208 = arith.addf %207, %206 : vector<32x128xf32>
    %209 = arith.mulf %198, %208 : vector<32x128xf32>
    %c0_99 = arith.constant 0 : index
    %c0_100 = arith.constant 0 : index
    %210 = vector.load %arg32[%c0_99, %c0_100] : memref<32x32xf32, #tpu.memory_space<vmem>>, vector<32x32xf32>
    %cst_101 = arith.constant dense<0.000000e+00> : vector<32x128xf32>
    %211 = tpu.matmul %210, %209, %cst_101 {dimension_numbers = #tpu.dot_dimension_numbers<[1], [0], [0], [1], [0, 0, 1, 1], [], []>} : vector<32x32xf32>, vector<32x128xf32>, vector<32x128xf32> -> vector<32x128xf32>
    %c0_102 = arith.constant 0 : index
    %c0_103 = arith.constant 0 : index
    %212 = vector.load %arg33[%c0_102, %c0_103] : memref<32x1xf32, #tpu.memory_space<vmem>>, vector<32x1xf32>
    %213 = vector.broadcast %212 : vector<32x1xf32> to vector<32x128xf32>
    %214 = arith.addf %211, %213 : vector<32x128xf32>
    %cst_104 = arith.constant 5.000000e-01 : f32
    %215 = vector.broadcast %cst_104 : f32 to vector<32x128xf32>
    %216 = arith.mulf %215, %214 : vector<32x128xf32>
    %cst_105 = arith.constant 4.471500e-02 : f32
    %217 = vector.broadcast %cst_105 : f32 to vector<32x128xf32>
    %218 = arith.mulf %217, %214 : vector<32x128xf32>
    %219 = arith.mulf %218, %214 : vector<32x128xf32>
    %220 = arith.mulf %219, %214 : vector<32x128xf32>
    %221 = arith.addf %214, %220 : vector<32x128xf32>
    %cst_106 = arith.constant 0.797884583 : f32
    %222 = vector.broadcast %cst_106 : f32 to vector<32x128xf32>
    %223 = arith.mulf %222, %221 : vector<32x128xf32>
    %224 = math.tanh %223 : vector<32x128xf32>
    %cst_107 = arith.constant 1.000000e+00 : f32
    %225 = vector.broadcast %cst_107 : f32 to vector<32x128xf32>
    %226 = arith.addf %225, %224 : vector<32x128xf32>
    %227 = arith.mulf %216, %226 : vector<32x128xf32>
    %c0_108 = arith.constant 0 : index
    %c0_109 = arith.constant 0 : index
    %228 = vector.load %arg34[%c0_108, %c0_109] : memref<1x32xf32, #tpu.memory_space<vmem>>, vector<1x32xf32>
    %cst_110 = arith.constant dense<0.000000e+00> : vector<1x128xf32>
    %229 = tpu.matmul %228, %227, %cst_110 {dimension_numbers = #tpu.dot_dimension_numbers<[1], [0], [0], [1], [0, 0, 1, 1], [], []>} : vector<1x32xf32>, vector<32x128xf32>, vector<1x128xf32> -> vector<1x128xf32>
    %c0_111 = arith.constant 0 : index
    %c0_112 = arith.constant 0 : index
    %230 = vector.load %arg35[%c0_111, %c0_112] : memref<1x1xf32, #tpu.memory_space<vmem>>, vector<1x1xf32>
    %231 = vector.broadcast %230 : vector<1x1xf32> to vector<1x128xf32>
    %232 = arith.addf %229, %231 : vector<1x128xf32>
    %c0_113 = arith.constant 0 : index
    %c0_114 = arith.constant 0 : index
    %233 = vector.load %arg36[%c0_113, %c0_114] : memref<1x32xf32, #tpu.memory_space<vmem>>, vector<1x32xf32>
    %cst_115 = arith.constant dense<0.000000e+00> : vector<1x128xf32>
    %234 = tpu.matmul %233, %227, %cst_115 {dimension_numbers = #tpu.dot_dimension_numbers<[1], [0], [0], [1], [0, 0, 1, 1], [], []>} : vector<1x32xf32>, vector<32x128xf32>, vector<1x128xf32> -> vector<1x128xf32>
    %c0_116 = arith.constant 0 : index
    %c0_117 = arith.constant 0 : index
    %235 = vector.load %arg37[%c0_116, %c0_117] : memref<1x1xf32, #tpu.memory_space<vmem>>, vector<1x1xf32>
    %236 = vector.broadcast %235 : vector<1x1xf32> to vector<1x128xf32>
    %237 = arith.addf %234, %236 : vector<1x128xf32>
    %238 = math.exp %232 : vector<1x128xf32>
    %239 = arith.mulf %186, %238 : vector<1x128xf32>
    %240 = arith.addf %239, %237 : vector<1x128xf32>
    %cst_118 = arith.constant dense<0.000000e+00> : vector<128xf32>
    %241 = vector.multi_reduction <add>, %232, %cst_118 [0] : vector<1x128xf32> to vector<128xf32>
    %242 = vector.shape_cast %241 : vector<128xf32> to vector<1x128xf32>
    %243 = arith.subf %184, %242 : vector<1x128xf32>
    %244 = tpu.concatenate %185, %240 in 0 : vector<1x128xf32>, vector<1x128xf32> -> vector<2x128xf32>
    %c0_119 = arith.constant 0 : index
    %c0_120 = arith.constant 0 : index
    %245 = vector.load %arg38[%c0_119, %c0_120] : memref<2x1xf32, #tpu.memory_space<vmem>>, vector<2x1xf32>
    %246 = vector.broadcast %245 : vector<2x1xf32> to vector<2x128xf32>
    %247 = arith.mulf %244, %246 : vector<2x128xf32>
    %c0_121 = arith.constant 0 : index
    %c0_122 = arith.constant 0 : index
    %248 = vector.load %arg39[%c0_121, %c0_122] : memref<2x1xf32, #tpu.memory_space<vmem>>, vector<2x1xf32>
    %249 = vector.broadcast %248 : vector<2x1xf32> to vector<2x128xf32>
    %250 = arith.addf %247, %249 : vector<2x128xf32>
    %c3 = arith.constant 3 : index
    %251 = memref.load %arg3[%c3] : memref<4xf32, #tpu.memory_space<smem>>
    %252 = vector.broadcast %251 : f32 to vector<1x128xf32>
    %253 = arith.subf %243, %252 : vector<1x128xf32>
    %c0_123 = arith.constant 0 : index
    %c0_124 = arith.constant 0 : index
    %254 = vector.load %arg41[%c0_123, %c0_124] : memref<32x1xf32, #tpu.memory_space<vmem>>, vector<32x1xf32>
    %c0_125 = arith.constant 0 : index
    %c0_126 = arith.constant 0 : index
    %255 = vector.load %arg40[%c0_125, %c0_126] : memref<32x32xf32, #tpu.memory_space<vmem>>, vector<32x32xf32>
    %cst_127 = arith.constant dense<0.000000e+00> : vector<32x128xf32>
    %256 = tpu.matmul %255, %123, %cst_127 {dimension_numbers = #tpu.dot_dimension_numbers<[1], [0], [0], [1], [0, 0, 1, 1], [], []>} : vector<32x32xf32>, vector<32x128xf32>, vector<32x128xf32> -> vector<32x128xf32>
    %257 = vector.broadcast %254 : vector<32x1xf32> to vector<32x128xf32>
    %258 = arith.addf %257, %256 : vector<32x128xf32>
    %cst_128 = arith.constant 5.000000e-01 : f32
    %259 = vector.broadcast %cst_128 : f32 to vector<32x128xf32>
    %260 = arith.mulf %259, %258 : vector<32x128xf32>
    %cst_129 = arith.constant 4.471500e-02 : f32
    %261 = vector.broadcast %cst_129 : f32 to vector<32x128xf32>
    %262 = arith.mulf %261, %258 : vector<32x128xf32>
    %263 = arith.mulf %262, %258 : vector<32x128xf32>
    %264 = arith.mulf %263, %258 : vector<32x128xf32>
    %265 = arith.addf %258, %264 : vector<32x128xf32>
    %cst_130 = arith.constant 0.797884583 : f32
    %266 = vector.broadcast %cst_130 : f32 to vector<32x128xf32>
    %267 = arith.mulf %266, %265 : vector<32x128xf32>
    %268 = math.tanh %267 : vector<32x128xf32>
    %cst_131 = arith.constant 1.000000e+00 : f32
    %269 = vector.broadcast %cst_131 : f32 to vector<32x128xf32>
    %270 = arith.addf %269, %268 : vector<32x128xf32>
    %271 = arith.mulf %260, %270 : vector<32x128xf32>
    %c0_132 = arith.constant 0 : index
    %c0_133 = arith.constant 0 : index
    %272 = vector.load %arg42[%c0_132, %c0_133] : memref<32x32xf32, #tpu.memory_space<vmem>>, vector<32x32xf32>
    %cst_134 = arith.constant dense<0.000000e+00> : vector<32x128xf32>
    %273 = tpu.matmul %272, %271, %cst_134 {dimension_numbers = #tpu.dot_dimension_numbers<[1], [0], [0], [1], [0, 0, 1, 1], [], []>} : vector<32x32xf32>, vector<32x128xf32>, vector<32x128xf32> -> vector<32x128xf32>
    %c0_135 = arith.constant 0 : index
    %c0_136 = arith.constant 0 : index
    %274 = vector.load %arg43[%c0_135, %c0_136] : memref<32x1xf32, #tpu.memory_space<vmem>>, vector<32x1xf32>
    %275 = vector.broadcast %274 : vector<32x1xf32> to vector<32x128xf32>
    %276 = arith.addf %273, %275 : vector<32x128xf32>
    %cst_137 = arith.constant 5.000000e-01 : f32
    %277 = vector.broadcast %cst_137 : f32 to vector<32x128xf32>
    %278 = arith.mulf %277, %276 : vector<32x128xf32>
    %cst_138 = arith.constant 4.471500e-02 : f32
    %279 = vector.broadcast %cst_138 : f32 to vector<32x128xf32>
    %280 = arith.mulf %279, %276 : vector<32x128xf32>
    %281 = arith.mulf %280, %276 : vector<32x128xf32>
    %282 = arith.mulf %281, %276 : vector<32x128xf32>
    %283 = arith.addf %276, %282 : vector<32x128xf32>
    %cst_139 = arith.constant 0.797884583 : f32
    %284 = vector.broadcast %cst_139 : f32 to vector<32x128xf32>
    %285 = arith.mulf %284, %283 : vector<32x128xf32>
    %286 = math.tanh %285 : vector<32x128xf32>
    %cst_140 = arith.constant 1.000000e+00 : f32
    %287 = vector.broadcast %cst_140 : f32 to vector<32x128xf32>
    %288 = arith.addf %287, %286 : vector<32x128xf32>
    %289 = arith.mulf %278, %288 : vector<32x128xf32>
    %c0_141 = arith.constant 0 : index
    %c0_142 = arith.constant 0 : index
    %290 = vector.load %arg44[%c0_141, %c0_142] : memref<2x32xf32, #tpu.memory_space<vmem>>, vector<2x32xf32>
    %cst_143 = arith.constant dense<0.000000e+00> : vector<2x128xf32>
    %291 = tpu.matmul %290, %289, %cst_143 {dimension_numbers = #tpu.dot_dimension_numbers<[1], [0], [0], [1], [0, 0, 1, 1], [], []>} : vector<2x32xf32>, vector<32x128xf32>, vector<2x128xf32> -> vector<2x128xf32>
    %c0_144 = arith.constant 0 : index
    %c0_145 = arith.constant 0 : index
    %292 = vector.load %arg45[%c0_144, %c0_145] : memref<2x1xf32, #tpu.memory_space<vmem>>, vector<2x1xf32>
    %293 = vector.broadcast %292 : vector<2x1xf32> to vector<2x128xf32>
    %294 = arith.addf %291, %293 : vector<2x128xf32>
    %c0_146 = arith.constant 0 : index
    %c0_147 = arith.constant 0 : index
    %295 = vector.load %arg46[%c0_146, %c0_147] : memref<2x32xf32, #tpu.memory_space<vmem>>, vector<2x32xf32>
    %cst_148 = arith.constant dense<0.000000e+00> : vector<2x128xf32>
    %296 = tpu.matmul %295, %289, %cst_148 {dimension_numbers = #tpu.dot_dimension_numbers<[1], [0], [0], [1], [0, 0, 1, 1], [], []>} : vector<2x32xf32>, vector<32x128xf32>, vector<2x128xf32> -> vector<2x128xf32>
    %c0_149 = arith.constant 0 : index
    %c0_150 = arith.constant 0 : index
    %297 = vector.load %arg47[%c0_149, %c0_150] : memref<2x1xf32, #tpu.memory_space<vmem>>, vector<2x1xf32>
    %298 = vector.broadcast %297 : vector<2x1xf32> to vector<2x128xf32>
    %299 = arith.addf %296, %298 : vector<2x128xf32>
    %300 = math.exp %294 : vector<2x128xf32>
    %301 = arith.mulf %250, %300 : vector<2x128xf32>
    %302 = arith.addf %301, %299 : vector<2x128xf32>
    %cst_151 = arith.constant dense<0.000000e+00> : vector<128xf32>
    %303 = vector.multi_reduction <add>, %294, %cst_151 [0] : vector<2x128xf32> to vector<128xf32>
    %304 = vector.shape_cast %303 : vector<128xf32> to vector<1x128xf32>
    %305 = arith.subf %253, %304 : vector<1x128xf32>
    %c0_152 = arith.constant 0 : index
    %c0_153 = arith.constant 0 : index
    %306 = vector.load %arg48[%c0_152, %c0_153] : memref<2x128xf32, #tpu.memory_space<vmem>>, vector<2x128xf32>
    tpu.vector_store %arg48[%c0_152, %c0_153], %302 {strides = array<i32>} : memref<2x128xf32, #tpu.memory_space<vmem>>, vector<2x128xf32>,
    %c0_154 = arith.constant 0 : index
    %c0_155 = arith.constant 0 : index
    %307 = vector.load %arg49[%c0_154, %c0_155] : memref<1x128xf32, #tpu.memory_space<vmem>>, vector<1x128xf32>
    tpu.vector_store %arg49[%c0_154, %c0_155], %305 {strides = array<i32>} : memref<1x128xf32, #tpu.memory_space<vmem>>, vector<1x128xf32>,
    return
  }
  func.func @transform_0(%arg0: i32) -> (i32, i32) {
    %c0_i32 = arith.constant 0 : i32
    %c0_i32_0 = arith.constant 0 : i32
    return %c0_i32, %arg0 : i32, i32
  }
  func.func @transform_1(%arg0: i32) -> (i32, i32) {
    %c0_i32 = arith.constant 0 : i32
    %c0_i32_0 = arith.constant 0 : i32
    return %c0_i32, %arg0 : i32, i32
  }
  func.func @transform_2(%arg0: i32) -> i32 {
    %c0_i32 = arith.constant 0 : i32
    %c0_i32_0 = arith.constant 0 : i32
    return %c0_i32 : i32
  }
  func.func @transform_3(%arg0: i32) -> (i32, i32) {
    %c0_i32 = arith.constant 0 : i32
    %c0_i32_0 = arith.constant 0 : i32
    %c0_i32_1 = arith.constant 0 : i32
    return %c0_i32, %c0_i32_0 : i32, i32
  }
  func.func @transform_4(%arg0: i32) -> (i32, i32) {
    %c0_i32 = arith.constant 0 : i32
    %c0_i32_0 = arith.constant 0 : i32
    %c0_i32_1 = arith.constant 0 : i32
    return %c0_i32, %c0_i32_0 : i32, i32
  }
  func.func @transform_5(%arg0: i32) -> (i32, i32) {
    %c0_i32 = arith.constant 0 : i32
    %c0_i32_0 = arith.constant 0 : i32
    %c0_i32_1 = arith.constant 0 : i32
    return %c0_i32, %c0_i32_0 : i32, i32
  }
  func.func @transform_6(%arg0: i32) -> (i32, i32) {
    %c0_i32 = arith.constant 0 : i32
    %c0_i32_0 = arith.constant 0 : i32
    %c0_i32_1 = arith.constant 0 : i32
    return %c0_i32, %c0_i32_0 : i32, i32
  }
  func.func @transform_7(%arg0: i32) -> (i32, i32) {
    %c0_i32 = arith.constant 0 : i32
    %c0_i32_0 = arith.constant 0 : i32
    %c0_i32_1 = arith.constant 0 : i32
    return %c0_i32, %c0_i32_0 : i32, i32
  }
  func.func @transform_8(%arg0: i32) -> (i32, i32) {
    %c0_i32 = arith.constant 0 : i32
    %c0_i32_0 = arith.constant 0 : i32
    %c0_i32_1 = arith.constant 0 : i32
    return %c0_i32, %c0_i32_0 : i32, i32
  }
  func.func @transform_9(%arg0: i32) -> (i32, i32) {
    %c0_i32 = arith.constant 0 : i32
    %c0_i32_0 = arith.constant 0 : i32
    %c0_i32_1 = arith.constant 0 : i32
    return %c0_i32, %c0_i32_0 : i32, i32
  }
  func.func @transform_10(%arg0: i32) -> (i32, i32) {
    %c0_i32 = arith.constant 0 : i32
    %c0_i32_0 = arith.constant 0 : i32
    %c0_i32_1 = arith.constant 0 : i32
    return %c0_i32, %c0_i32_0 : i32, i32
  }
  func.func @transform_11(%arg0: i32) -> (i32, i32) {
    %c0_i32 = arith.constant 0 : i32
    %c0_i32_0 = arith.constant 0 : i32
    %c0_i32_1 = arith.constant 0 : i32
    return %c0_i32, %c0_i32_0 : i32, i32
  }
  func.func @transform_12(%arg0: i32) -> (i32, i32) {
    %c0_i32 = arith.constant 0 : i32
    %c0_i32_0 = arith.constant 0 : i32
    %c0_i32_1 = arith.constant 0 : i32
    return %c0_i32, %c0_i32_0 : i32, i32
  }
  func.func @transform_13(%arg0: i32) -> (i32, i32) {
    %c0_i32 = arith.constant 0 : i32
    %c0_i32_0 = arith.constant 0 : i32
    %c0_i32_1 = arith.constant 0 : i32
    return %c0_i32, %c0_i32_0 : i32, i32
  }
  func.func @transform_14(%arg0: i32) -> (i32, i32) {
    %c0_i32 = arith.constant 0 : i32
    %c0_i32_0 = arith.constant 0 : i32
    %c0_i32_1 = arith.constant 0 : i32
    return %c0_i32, %c0_i32_0 : i32, i32
  }
  func.func @transform_15(%arg0: i32) -> (i32, i32) {
    %c0_i32 = arith.constant 0 : i32
    %c0_i32_0 = arith.constant 0 : i32
    %c0_i32_1 = arith.constant 0 : i32
    return %c0_i32, %c0_i32_0 : i32, i32
  }
  func.func @transform_16(%arg0: i32) -> (i32, i32) {
    %c0_i32 = arith.constant 0 : i32
    %c0_i32_0 = arith.constant 0 : i32
    %c0_i32_1 = arith.constant 0 : i32
    return %c0_i32, %c0_i32_0 : i32, i32
  }
  func.func @transform_17(%arg0: i32) -> (i32, i32) {
    %c0_i32 = arith.constant 0 : i32
    %c0_i32_0 = arith.constant 0 : i32
    %c0_i32_1 = arith.constant 0 : i32
    return %c0_i32, %c0_i32_0 : i32, i32
  }
  func.func @transform_18(%arg0: i32) -> (i32, i32) {
    %c0_i32 = arith.constant 0 : i32
    %c0_i32_0 = arith.constant 0 : i32
    %c0_i32_1 = arith.constant 0 : i32
    return %c0_i32, %c0_i32_0 : i32, i32
  }
  func.func @transform_19(%arg0: i32) -> (i32, i32) {
    %c0_i32 = arith.constant 0 : i32
    %c0_i32_0 = arith.constant 0 : i32
    %c0_i32_1 = arith.constant 0 : i32
    return %c0_i32, %c0_i32_0 : i32, i32
  }
  func.func @transform_20(%arg0: i32) -> (i32, i32) {
    %c0_i32 = arith.constant 0 : i32
    %c0_i32_0 = arith.constant 0 : i32
    %c0_i32_1 = arith.constant 0 : i32
    return %c0_i32, %c0_i32_0 : i32, i32
  }
  func.func @transform_21(%arg0: i32) -> (i32, i32) {
    %c0_i32 = arith.constant 0 : i32
    %c0_i32_0 = arith.constant 0 : i32
    %c0_i32_1 = arith.constant 0 : i32
    return %c0_i32, %c0_i32_0 : i32, i32
  }
  func.func @transform_22(%arg0: i32) -> (i32, i32) {
    %c0_i32 = arith.constant 0 : i32
    %c0_i32_0 = arith.constant 0 : i32
    %c0_i32_1 = arith.constant 0 : i32
    return %c0_i32, %c0_i32_0 : i32, i32
  }
  func.func @transform_23(%arg0: i32) -> (i32, i32) {
    %c0_i32 = arith.constant 0 : i32
    %c0_i32_0 = arith.constant 0 : i32
    %c0_i32_1 = arith.constant 0 : i32
    return %c0_i32, %c0_i32_0 : i32, i32
  }
  func.func @transform_24(%arg0: i32) -> (i32, i32) {
    %c0_i32 = arith.constant 0 : i32
    %c0_i32_0 = arith.constant 0 : i32
    %c0_i32_1 = arith.constant 0 : i32
    return %c0_i32, %c0_i32_0 : i32, i32
  }
  func.func @transform_25(%arg0: i32) -> (i32, i32) {
    %c0_i32 = arith.constant 0 : i32
    %c0_i32_0 = arith.constant 0 : i32
    %c0_i32_1 = arith.constant 0 : i32
    return %c0_i32, %c0_i32_0 : i32, i32
  }
  func.func @transform_26(%arg0: i32) -> (i32, i32) {
    %c0_i32 = arith.constant 0 : i32
    %c0_i32_0 = arith.constant 0 : i32
    %c0_i32_1 = arith.constant 0 : i32
    return %c0_i32, %c0_i32_0 : i32, i32
  }
  func.func @transform_27(%arg0: i32) -> (i32, i32) {
    %c0_i32 = arith.constant 0 : i32
    %c0_i32_0 = arith.constant 0 : i32
    %c0_i32_1 = arith.constant 0 : i32
    return %c0_i32, %c0_i32_0 : i32, i32
  }
  func.func @transform_28(%arg0: i32) -> (i32, i32) {
    %c0_i32 = arith.constant 0 : i32
    %c0_i32_0 = arith.constant 0 : i32
    %c0_i32_1 = arith.constant 0 : i32
    return %c0_i32, %c0_i32_0 : i32, i32
  }
  func.func @transform_29(%arg0: i32) -> (i32, i32) {
    %c0_i32 = arith.constant 0 : i32
    %c0_i32_0 = arith.constant 0 : i32
    %c0_i32_1 = arith.constant 0 : i32
    return %c0_i32, %c0_i32_0 : i32, i32
  }
  func.func @transform_30(%arg0: i32) -> (i32, i32) {
    %c0_i32 = arith.constant 0 : i32
    %c0_i32_0 = arith.constant 0 : i32
    %c0_i32_1 = arith.constant 0 : i32
    return %c0_i32, %c0_i32_0 : i32, i32
  }
  func.func @transform_31(%arg0: i32) -> (i32, i32) {
    %c0_i32 = arith.constant 0 : i32
    %c0_i32_0 = arith.constant 0 : i32
    %c0_i32_1 = arith.constant 0 : i32
    return %c0_i32, %c0_i32_0 : i32, i32
  }
  func.func @transform_32(%arg0: i32) -> (i32, i32) {
    %c0_i32 = arith.constant 0 : i32
    %c0_i32_0 = arith.constant 0 : i32
    %c0_i32_1 = arith.constant 0 : i32
    return %c0_i32, %c0_i32_0 : i32, i32
  }
  func.func @transform_33(%arg0: i32) -> (i32, i32) {
    %c0_i32 = arith.constant 0 : i32
    %c0_i32_0 = arith.constant 0 : i32
    %c0_i32_1 = arith.constant 0 : i32
    return %c0_i32, %c0_i32_0 : i32, i32
  }
  func.func @transform_34(%arg0: i32) -> (i32, i32) {
    %c0_i32 = arith.constant 0 : i32
    %c0_i32_0 = arith.constant 0 : i32
    %c0_i32_1 = arith.constant 0 : i32
    return %c0_i32, %c0_i32_0 : i32, i32
  }
  func.func @transform_35(%arg0: i32) -> (i32, i32) {
    %c0_i32 = arith.constant 0 : i32
    %c0_i32_0 = arith.constant 0 : i32
    %c0_i32_1 = arith.constant 0 : i32
    return %c0_i32, %c0_i32_0 : i32, i32
  }
  func.func @transform_36(%arg0: i32) -> (i32, i32) {
    %c0_i32 = arith.constant 0 : i32
    %c0_i32_0 = arith.constant 0 : i32
    %c0_i32_1 = arith.constant 0 : i32
    return %c0_i32, %c0_i32_0 : i32, i32
  }
  func.func @transform_37(%arg0: i32) -> (i32, i32) {
    %c0_i32 = arith.constant 0 : i32
    %c0_i32_0 = arith.constant 0 : i32
    %c0_i32_1 = arith.constant 0 : i32
    return %c0_i32, %c0_i32_0 : i32, i32
  }
  func.func @transform_38(%arg0: i32) -> (i32, i32) {
    %c0_i32 = arith.constant 0 : i32
    %c0_i32_0 = arith.constant 0 : i32
    %c0_i32_1 = arith.constant 0 : i32
    return %c0_i32, %c0_i32_0 : i32, i32
  }
  func.func @transform_39(%arg0: i32) -> (i32, i32) {
    %c0_i32 = arith.constant 0 : i32
    %c0_i32_0 = arith.constant 0 : i32
    %c0_i32_1 = arith.constant 0 : i32
    return %c0_i32, %c0_i32_0 : i32, i32
  }
  func.func @transform_40(%arg0: i32) -> (i32, i32) {
    %c0_i32 = arith.constant 0 : i32
    %c0_i32_0 = arith.constant 0 : i32
    %c0_i32_1 = arith.constant 0 : i32
    return %c0_i32, %c0_i32_0 : i32, i32
  }
  func.func @transform_41(%arg0: i32) -> (i32, i32) {
    %c0_i32 = arith.constant 0 : i32
    %c0_i32_0 = arith.constant 0 : i32
    %c0_i32_1 = arith.constant 0 : i32
    return %c0_i32, %c0_i32_0 : i32, i32
  }
  func.func @transform_42(%arg0: i32) -> (i32, i32) {
    %c0_i32 = arith.constant 0 : i32
    %c0_i32_0 = arith.constant 0 : i32
    %c0_i32_1 = arith.constant 0 : i32
    return %c0_i32, %c0_i32_0 : i32, i32
  }
  func.func @transform_43(%arg0: i32) -> (i32, i32) {
    %c0_i32 = arith.constant 0 : i32
    %c0_i32_0 = arith.constant 0 : i32
    %c0_i32_1 = arith.constant 0 : i32
    return %c0_i32, %c0_i32_0 : i32, i32
  }
  func.func @transform_44(%arg0: i32) -> (i32, i32) {
    %c0_i32 = arith.constant 0 : i32
    %c0_i32_0 = arith.constant 0 : i32
    %c0_i32_1 = arith.constant 0 : i32
    return %c0_i32, %c0_i32_0 : i32, i32
  }
  func.func @transform_45(%arg0: i32) -> (i32, i32) {
    %c0_i32 = arith.constant 0 : i32
    %c0_i32_0 = arith.constant 0 : i32
    %c0_i32_1 = arith.constant 0 : i32
    return %c0_i32, %c0_i32_0 : i32, i32
  }
  func.func @transform_46(%arg0: i32) -> (i32, i32) {
    %c0_i32 = arith.constant 0 : i32
    %c0_i32_0 = arith.constant 0 : i32
    %c0_i32_1 = arith.constant 0 : i32
    return %c0_i32, %c0_i32_0 : i32, i32
  }
  func.func @transform_47(%arg0: i32) -> (i32, i32) {
    %c0_i32 = arith.constant 0 : i32
    %c0_i32_0 = arith.constant 0 : i32
    return %c0_i32, %arg0 : i32, i32
  }
  func.func @transform_48(%arg0: i32) -> (i32, i32) {
    %c0_i32 = arith.constant 0 : i32
    %c0_i32_0 = arith.constant 0 : i32
    return %c0_i32, %arg0 : i32, i32
  }
}

</mosaic_0001>

<bundles_post_ra>
// kernel: _lambda_.1
= control target key start
LH: loop header
LB: loop body
LE: loop exit
PB: predicated region body
PF: predicated region fallthrough
CT: control target
= control target key end

     0   :  { %s5908_s6 = smov 1   ;;  %s5909_s10 = smov 2   ;;  %s6921_s0 = inlined_call_operand.smem [shape: u32[49], index: -1, kind: input, shape index: {}] }
   0x1   :  { %s5992_s5 = sld [smem:[%s6921_s0]]   ;;  %s5910_s14 = smov 3  }
   0x2   :  { %s5997_s9 = sld [smem:[%s6921_s0 + %s5908_s6]]   ;;  %s5911_s18 = smov 4  }
   0x3   :  { %s6002_s13 = sld [smem:[%s6921_s0 + %s5909_s10]]   ;;  %s5912_s22 = smov 5  }
   0x4   :  { %s6007_s17 = sld [smem:[%s6921_s0 + %s5910_s14]]   ;;  %s5913_s26 = smov 6  }
   0x5   :  { %s6012_s21 = sld [smem:[%s6921_s0 + %s5911_s18]]   ;;  %s5914_s30 = smov 7  }
   0x6   :  { %s6017_s25 = sld [smem:[%s6921_s0 + %s5912_s22]]   ;;  %s5915_s4 = smov 8  }
   0x7   :  { %6971 = sst [smem:[#allocation53_spill]] %s5992_s5  ;;  %s5916_s10 = smov 9  }
   0x8   :  { %6972 = sst [smem:[#allocation54_spill]] %s5997_s9  ;;  %s5917_s15 = smov 10  }
   0x9   :  { %6973 = sst [smem:[#allocation55_spill]] %s6002_s13  ;;  %s5918_s20 = smov 11  }
   0xa   :  { %6974 = sst [smem:[#allocation56_spill]] %s6007_s17  ;;  %s5920_s1 = smov 14  }
   0xb   :  { %6975 = sst [smem:[#allocation57_spill]] %s6012_s21  ;;  %s5921_s7 = smov 15  }
   0xc   :  { %s6022_s29 = sld [smem:[%s6921_s0 + %s5913_s26]]   ;;  %s5919_s26 = smov 13  }
   0xd   :  { %s6027_s3 = sld [smem:[%s6921_s0 + %s5914_s30]]   ;;  %s5923_s22 = smov 17  }
   0xe   :  { %s6032_s8 = sld [smem:[%s6921_s0 + %s5915_s4]]   ;;  %s5924_s28 = smov 18  }
   0xf   :  { %s6037_s14 = sld [smem:[%s6921_s0 + %s5916_s10]]   ;;  %s5926_s16 = smov 20  }
  0x10   :  { %s4341_s19 = sld [smem:[%s6921_s0 + %s5917_s15]]   ;;  %s5922_s15 = smov 16  }
  0x11   :  { %s6045_s24 = sld [smem:[%s6921_s0 + %s5918_s20]]   ;;  %s5930_s9 = smov 24  }
  0x12   :  { %6976 = sst [smem:[#allocation58_spill]] %s6022_s29 }
  0x13   :  { %6977 = sst [smem:[#allocation59_spill]] %s6027_s3 }
  0x14   :  { %6978 = sst [smem:[#allocation60_spill]] %s6032_s8  ;;  %s5932_s8 = smov 26  }
  0x15   :  { %6979 = sst [smem:[#allocation61_spill]] %s6037_s14 }
  0x16   :  { %s6050_s30 = sld [smem:[%s6921_s0 + %s5919_s26]]   ;;  %v103_v0 = vstv %s4341_s19  ;;  %s5927_s19 = smov 21  }
  0x17   :  { %s6055_s6 = sld [smem:[%s6921_s0 + %s5920_s1]]   ;;  %104 = vst [vmem:[#allocation2] sm:$0x1] %v103_v0 }
  0x18   :  { %s6060_s12 = sld [smem:[%s6921_s0 + %s5921_s7]]   ;;  %s5925_s7 = smov 19  }
  0x19   :  { %s6065_s20 = sld [smem:[%s6921_s0 + %s5922_s15]]  }
  0x1a   :  { %s6070_s27 = sld [smem:[%s6921_s0 + %s5923_s22]]  }
  0x1b   :  { %s6075_s4 = sld [smem:[%s6921_s0 + %s5924_s28]]   ;;  %s5928_s28 = smov 22  }
  0x1c   :  { %s6080_s15 = sld [smem:[%s6921_s0 + %s5925_s7]]   ;;  %s5929_s7 = smov 23  }
  0x1d   :  { %6980 = sst [smem:[#allocation62_spill]] %s6055_s6 }
  0x1e   :  { %6981 = sst [smem:[#allocation63_spill]] %s6060_s12 }
  0x1f   :  { %6982 = sst [smem:[#allocation64_spill]] %s6065_s20  ;;  %s5955_s20 = smov 36  }
  0x20   :  { %s6085_s22 = sld [smem:[%s6921_s0 + %s5926_s16]]   ;;  %s5954_s16 = smov 34  }
  0x21   :  { %6983 = sst [smem:[#allocation65_spill]] %s6075_s4 }
  0x22   :  { %6984 = sst [smem:[#allocation66_spill]] %s6080_s15 }
  0x23   :  { %s6090_s1 = sld [smem:[%s6921_s0 + %s5927_s19]]   ;;  %s5931_s19 = smov 25  }
  0x24   :  { %s6095_s29 = sld [smem:[%s6921_s0 + %s5928_s28]]  }
  0x25   :  { %s6100_s5 = sld [smem:[%s6921_s0 + %s5929_s7]]   ;;  %s5933_s7 = smov 27  }
  0x26   :  { %6985 = sst [smem:[#allocation67_spill]] %s6085_s22 }
  0x27   :  { %s6105_s22 = sld [smem:[%s6921_s0 + %s5930_s9]]   ;;  %s5934_s9 = smov 28  }
  0x28   :  { %s6115_s4 = sld [smem:[%s6921_s0 + %s5932_s8]]   ;;  %s5936_s8 = smov 30  }
  0x29   :  { %6986 = sst [smem:[#allocation68_spill]] %s6090_s1 }
  0x2a   :  { %s6110_s1 = sld [smem:[%s6921_s0 + %s5931_s19]]   ;;  %s5935_s19 = smov 29  }
  0x2b   :  { %6987 = sst [smem:[#allocation69_spill]] %s6100_s5 }
  0x2c   :  { %s6120_s5 = sld [smem:[%s6921_s0 + %s5933_s7]]   ;;  %s5937_s7 = smov 31  }
  0x2d   :  { %6988 = sst [smem:[#allocation70_spill]] %s6105_s22 }
  0x2e   :  { %6990 = sst [smem:[#allocation72_spill]] %s6115_s4 }
  0x2f   :  { %s6125_s22 = sld [smem:[%s6921_s0 + %s5934_s9]]   ;;  %s5938_s9 = smov 32  }
  0x30   :  { %6989 = sst [smem:[#allocation71_spill]] %s6110_s1 }
  0x31   :  { %s6130_s1 = sld [smem:[%s6921_s0 + %s5935_s19]]   ;;  %s5939_s19 = smov 33  }
  0x32   :  { %6991 = sst [smem:[#allocation73_spill]] %s6120_s5 }
  0x33   :  { %s6135_s4 = sld [smem:[%s6921_s0 + %s5936_s8]]   ;;  %s5940_s8 = smov 35  }
  0x34   :  { %s6140_s5 = sld [smem:[%s6921_s0 + %s5937_s7]]   ;;  %s5941_s7 = smov 37  }
  0x35   :  { %6992 = sst [smem:[#allocation74_spill]] %s6125_s22 }
  0x36   :  { %s6145_s22 = sld [smem:[%s6921_s0 + %s5938_s9]]   ;;  %s5942_s9 = smov 38  }
  0x37   :  { %6993 = sst [smem:[#allocation75_spill]] %s6130_s1 }
  0x38   :  { %s6150_s1 = sld [smem:[%s6921_s0 + %s5939_s19]]   ;;  %s5943_s19 = smov 39  }
  0x39   :  { %6994 = sst [smem:[#allocation76_spill]] %s6135_s4 }
  0x3a   :  { %6995 = sst [smem:[#allocation77_spill]] %s6140_s5 }
  0x3b   :  { %s6155_s4 = sld [smem:[%s6921_s0 + %s5940_s8]]   ;;  %s5944_s8 = smov 40  }
  0x3c   :  { %6996 = sst [smem:[#allocation78_spill]] %s6145_s22 }
  0x3d   :  { %s6160_s5 = sld [smem:[%s6921_s0 + %s5941_s7]]   ;;  %s5945_s7 = smov 41  }
  0x3e   :  { %6997 = sst [smem:[#allocation79_spill]] %s6150_s1 }
  0x3f   :  { %s6165_s22 = sld [smem:[%s6921_s0 + %s5942_s9]]   ;;  %s5946_s9 = smov 42  }
  0x40   :  { %s6170_s1 = sld [smem:[%s6921_s0 + %s5943_s19]]   ;;  %s5947_s19 = smov 43  }
  0x41   :  { %6998 = sst [smem:[#allocation80_spill]] %s6155_s4 }
  0x42   :  { %s6175_s4 = sld [smem:[%s6921_s0 + %s5944_s8]]   ;;  %s5948_s8 = smov 44  }
  0x43   :  { %6999 = sst [smem:[#allocation81_spill]] %s6160_s5 }
  0x44   :  { %s6180_s5 = sld [smem:[%s6921_s0 + %s5945_s7]]   ;;  %s5949_s7 = smov 45  }
  0x45   :  { %7000 = sst [smem:[#allocation82_spill]] %s6165_s22 }
  0x46   :  { %7001 = sst [smem:[#allocation83_spill]] %s6170_s1 }
  0x47   :  { %s6185_s22 = sld [smem:[%s6921_s0 + %s5946_s9]]   ;;  %s5950_s9 = smov 46  }
  0x48   :  { %7002 = sst [smem:[#allocation84_spill]] %s6175_s4 }
  0x49   :  { %s6190_s1 = sld [smem:[%s6921_s0 + %s5947_s19]]   ;;  %s5951_s19 = smov 47  }
  0x4a   :  { %7003 = sst [smem:[#allocation85_spill]] %s6180_s5 }
  0x4b   :  { %s6195_s4 = sld [smem:[%s6921_s0 + %s5948_s8]]   ;;  %s5952_s8 = smov 48  }
  0x4c   :  { %s6200_s5 = sld [smem:[%s6921_s0 + %s5949_s7]]   ;;  %s5953_s7 = smov 12  }
  0x4d   :  { %7004 = sst [smem:[#allocation86_spill]] %s6185_s22 }
  0x4e   :  { %s6205_s22 = sld [smem:[%s6921_s0 + %s5950_s9]]  }
  0x4f   :  { %7005 = sst [smem:[#allocation87_spill]] %s6190_s1 }
  0x50   :  { %s6210_s1 = sld [smem:[%s6921_s0 + %s5951_s19]]  }
  0x51   :  { %7006 = sst [smem:[#allocation88_spill]] %s6195_s4 }
  0x52   :  { %7007 = sst [smem:[#allocation89_spill]] %s6200_s5 }
  0x53   :  { %s6215_s4 = sld [smem:[%s6921_s0 + %s5952_s8]]  }
  0x54   :  { %7008 = sst [smem:[#allocation90_spill]] %s6205_s22 }
  0x55   :  { %s4343_s5 = sld [smem:[%s6921_s0 + %s5953_s7]]  }
  0x56   :  { %s4365_s22 = sld [smem:[%s6921_s0 + %s5954_s16]]  }
  0x57   :  { %s4367_s26 = sld [smem:[%s6921_s0 + %s5955_s20]]  }
  0x5b   :  { %v105_v1 = vstv %s4343_s5 }
  0x5c   :  { %106 = vst [vmem:[#allocation3] sm:$0x1] %v105_v1  ;;  %v107_v2 = vstv %s4365_s22 }
  0x5d   :  { %108 = vst [vmem:[#allocation4] sm:$0x1] %v107_v2  ;;  %v109_v3 = vstv %s4367_s26 }
  0x5e   :  { %110 = vst [vmem:[#allocation5] sm:$0x1] %v109_v3 }
  0x5f   :  { %111 = vsyncpa [#allocation7], 0 }
  0x60   :  { %113 = vsyncpa [#allocation7 + $0x1], 0 }
  0x61   :  { %114 = vsyncpa [#allocation9], 0 }
  0x62   :  { %115 = vsyncpa [#allocation12], 0 }
  0x63   :  { %116 = vsyncpa [#allocation15], 0 }
  0x64   :  { %117 = vsyncpa [#allocation18], 0 }
  0x65   :  { %118 = vsyncpa [#allocation21], 0 }
  0x66   :  { %119 = vsyncpa [#allocation24], 0 }
  0x67   :  { %120 = vsyncpa [#allocation27], 0 }
  0x68   :  { %121 = vsyncpa [#allocation30], 0 }
  0x69   :  { %122 = vsyncpa [#allocation33], 0 }
  0x6a   :  { %123 = vsyncpa [#allocation36], 0 }
  0x6b   :  { %124 = vsyncpa [#allocation8], 0 }
  0x6c   :  { %126 = vsyncpa [#allocation8 + $0x1], 0 }
  0x6d   :  { %127 = vsyncpa [#allocation39], 0 }
  0x6e   :  { %129 = vsyncpa [#allocation39 + $0x1], 0  ;;  %s6226_s0 = smov 0   ;;  %s6228_s5 = smov 0  }
  0x6f   :  { %s6230_s20 = smov 0   ;;  %s6232_s22 = smov 0  }
  0x70 LB: > { %s7009_s21 = sld [smem:[#allocation57_spill]]  ;;  %s7010_s17 = sld [smem:[#allocation56_spill]]  ;;  %s5902_s20 = sphi %s6230_s20, %s7089_s20   ;;  %s5898_s5 = sphi %s6228_s5, %s7088_s5   ;;  %s5894_s0 = sphi %s6226_s0, %s7087_s0   ;;  %s5906_s22 = sphi %s6232_s22, %s7090_s22  }
  0x71   : > { %s7011_s15 = sld [smem:[#allocation66_spill]]  ;;  %s7012_s14 = sld [smem:[#allocation61_spill]] }
  0x72   : > { %s7013_s6 = sld [smem:[#allocation62_spill]]  ;;  %s7014_s3 = sld [smem:[#allocation59_spill]] }
  0x73   : > { %s7015_s12 = sld [smem:[#allocation63_spill]]  ;;  %s5956_s8 = smov [#allocation11]  }
  0x74   : > { %s1213_s28 = sshll.u32 %s5956_s8, 4  ;;  %s6247_s2 = sadd.s32 4294967295, %s5906_s22   ;;  %s1214_s28 = int_to_ptr.vmem [resolvable:$true] %s1213_s28 }
  0x75   : > { %p4382_p0 = scmp.ge.s32.totalorder %s5906_s22, 1  ;;  %p6939_p1 = scmp.eq.s32.totalorder %s6247_s2, 0 }
  0x76   : > { %p1189_p2 = scmp.lt.s32.totalorder %s5906_s22, 3  ;;  %s5957_s10 = smov [#allocation14]  }
  0x77   : > { %s1234_s11 = sshll.u32 %s5957_s10, 4  ;;  %s5958_s9 = smov [#allocation17]   ;;  %s6259_s11 = int_to_ptr.vmem [resolvable:$true] %s1234_s11 }
  0x78   : > { %p6252_p3 = pnand %p4382_p0, %p1189_p2  ;;  %s1267_s18 = sshll.u32 %s5958_s9, 4  ;;  %s6267_s18 = int_to_ptr.vmem [resolvable:$true] %s1267_s18 }
  0x79   : > { %s5247_s23 = scalar_lea.hbm %s7010_s17, 32 }
  0x7a   : > { %s7016_s7 = scalar_select %p6252_p3, 1, 0 }
  0x7b   : > { %p4964_p5 = pneg %p6252_p3  ;;  %p5248_p7 = scmp.ne.s32.totalorder %s7010_s17, %s5247_s23 }
  0x7c   : > { %p5254_p11 = scmp.lt.u32.totalorder %s5247_s23, %s7010_s17 }
  0x7d   : > { %p6263_p6 = pnand %p4964_p5, %p6939_p1 }
  0x7f   : > { %p6273_p8 = pneg %p6263_p6 }
  0x81   : > { %p5250_p9 = pnand %p6273_p8, %p5248_p7 }
  0x83   : > { %p5251_p10 = pneg %p5250_p9 }
  0x85   : > { %p5256_p12 = pnand %p5254_p11, %p5251_p10 }
  0x87   : > { %5259 = shalt.err (!%p5256_p12)
}
  0x88   : > { %s5260_s26 = scalar_lea.vmem %s1214_s28, 32  ;;  %p5268_p5 = scmp.lt.s32.totalorder %s1214_s28, %s1214_s28 }
  0x89   : > { %p5261_p13 = scmp.ne.s32.totalorder %s1214_s28, %s5260_s26  ;;  %p5269_p4 = scmp.lt.s32.totalorder %s5260_s26, %s5260_s26 }
  0x8b   : > { %p5263_p0 = pnand %p5261_p13, %p6273_p8  ;;  %p5270_p1 = por %p5269_p4, %p5268_p5 }
  0x8d   : > { %p5264_p2 = pneg %p5263_p0 }
  0x8f   : > { %p5271_p3 = pnand %p5270_p1, %p5264_p2 }
  0x91   : > { %5274 = shalt.err (!%p5271_p3)
}
  0x92   : > { %4970 = dma.hbm_to_vmem [thread:$0]  (!%p6263_p6), %s7010_s17, 32, %s1214_s28, [#allocation12]  }
  0x93   : > { %s5275_s8 = scalar_lea.hbm %s6017_s25, 512 }
  0x94   : > { %p5276_p7 = scmp.ne.s32.totalorder %s6017_s25, %s5275_s8  ;;  %p5282_p11 = scmp.lt.u32.totalorder %s5275_s8, %s6017_s25 }
  0x96   : > { %p5278_p9 = pnand %p5276_p7, %p6273_p8 }
  0x98   : > { %p5279_p10 = pneg %p5278_p9 }
  0x9a   : > { %p5284_p12 = pnand %p5282_p11, %p5279_p10 }
  0x9c   : > { %5287 = shalt.err (!%p5284_p12)
}
  0x9d   : > { %s5288_s10 = scalar_lea.vmem %s6259_s11, 512  ;;  %p5296_p13 = scmp.lt.s32.totalorder %s6259_s11, %s6259_s11 }
  0x9e   : > { %p5289_p1 = scmp.ne.s32.totalorder %s6259_s11, %s5288_s10  ;;  %p5297_p0 = scmp.lt.s32.totalorder %s5288_s10, %s5288_s10 }
  0xa0   : > { %p5291_p3 = pnand %p5289_p1, %p6273_p8  ;;  %p5298_p2 = por %p5297_p0, %p5296_p13 }
  0xa2   : > { %p5292_p4 = pneg %p5291_p3 }
  0xa4   : > { %p5299_p5 = pnand %p5298_p2, %p5292_p4 }
  0xa6   : > { %5302 = shalt.err (!%p5299_p5)
}
  0xa7   : > { %s6941_s28 = smov 128   ;;  %s6943_s9 = smov 8  }
  0xa8   : > { %4976 = dma.hbm_to_vmem [thread:$0]  (!%p6263_p6), %s6017_s25, 512, %s6259_s11, [#allocation15], %s6941_s28, %s6941_s28, %s6943_s9  }
  0xa9   : > { %s5303_s23 = scalar_lea.hbm %s7012_s14, 16 }
  0xaa   : > { %p5304_p7 = scmp.ne.s32.totalorder %s7012_s14, %s5303_s23  ;;  %p5310_p11 = scmp.lt.u32.totalorder %s5303_s23, %s7012_s14 }
  0xac   : > { %p5306_p9 = pnand %p5304_p7, %p6273_p8 }
  0xae   : > { %p5307_p10 = pneg %p5306_p9 }
  0xb0   : > { %p5312_p12 = pnand %p5310_p11, %p5307_p10 }
  0xb2   : > { %5315 = shalt.err (!%p5312_p12)
}
  0xb3   : > { %s5316_s26 = scalar_lea.vmem %s6267_s18, 16  ;;  %s5323_s8 = scalar_lea.vmem %s6267_s18, 32 }
  0xb4   : > { %p5317_p1 = scmp.ne.s32.totalorder %s6267_s18, %s5316_s26  ;;  %p5324_p13 = scmp.lt.s32.totalorder %s6267_s18, %s6267_s18 }
  0xb5   : > { %p5325_p0 = scmp.lt.s32.totalorder %s5323_s8, %s5316_s26 }
  0xb6   : > { %p5319_p3 = pnand %p5317_p1, %p6273_p8 }
  0xb7   : > { %p5326_p2 = por %p5325_p0, %p5324_p13 }
  0xb8   : > { %p5320_p4 = pneg %p5319_p3 }
  0xba   : > { %p5327_p5 = pnand %p5326_p2, %p5320_p4 }
  0xbc   : > { %5330 = shalt.err (!%p5327_p5)
}
  0xbd   : > { %4982 = dma.hbm_to_vmem [thread:$0]  (!%p6263_p6), %s7012_s14, 16, %s6267_s18, [#allocation18]  }
  0xbe   : > { %s5961_s11 = smov [#allocation20]   ;;  %s5962_s23 = smov [#allocation23]  }
  0xbf   : > { %s1295_s10 = sshll.u32 %s5961_s11, 4  ;;  %s1317_s28 = sshll.u32 %s5962_s23, 4  ;;  %s1296_s10 = int_to_ptr.vmem [resolvable:$true] %s1295_s10  ;;  %s1318_s28 = int_to_ptr.vmem [resolvable:$true] %s1317_s28 }
  0xc0   : > { %s5331_s9 = scalar_lea.hbm %s6050_s30, 32 }
  0xc1   : > { %p5332_p7 = scmp.ne.s32.totalorder %s6050_s30, %s5331_s9  ;;  %p5338_p11 = scmp.lt.u32.totalorder %s5331_s9, %s6050_s30 }
  0xc3   : > { %p5334_p9 = pnand %p5332_p7, %p6273_p8 }
  0xc5   : > { %p5335_p10 = pneg %p5334_p9 }
  0xc7   : > { %p5340_p12 = pnand %p5338_p11, %p5335_p10 }
  0xc9   : > { %5343 = shalt.err (!%p5340_p12)
}
  0xca   : > { %s5344_s26 = scalar_lea.vmem %s1296_s10, 32  ;;  %p5352_p13 = scmp.lt.s32.totalorder %s1296_s10, %s1296_s10 }
  0xcb   : > { %p5345_p1 = scmp.ne.s32.totalorder %s1296_s10, %s5344_s26  ;;  %p5353_p0 = scmp.lt.s32.totalorder %s5344_s26, %s5344_s26 }
  0xcd   : > { %p5347_p3 = pnand %p5345_p1, %p6273_p8  ;;  %p5354_p2 = por %p5353_p0, %p5352_p13 }
  0xcf   : > { %p5348_p4 = pneg %p5347_p3 }
  0xd1   : > { %p5355_p5 = pnand %p5354_p2, %p5348_p4 }
  0xd3   : > { %5358 = shalt.err (!%p5355_p5)
}
  0xd4   : > { %4988 = dma.hbm_to_vmem [thread:$0]  (!%p6263_p6), %s6050_s30, 32, %s1296_s10, [#allocation21]  }
  0xd5   : > { %s5359_s18 = scalar_lea.hbm %s7015_s12, 64 }
  0xd6   : > { %p5360_p7 = scmp.ne.s32.totalorder %s7015_s12, %s5359_s18  ;;  %p5366_p11 = scmp.lt.u32.totalorder %s5359_s18, %s7015_s12 }
  0xd8   : > { %p5362_p9 = pnand %p5360_p7, %p6273_p8 }
  0xda   : > { %p5363_p10 = pneg %p5362_p9 }
  0xdc   : > { %p5368_p12 = pnand %p5366_p11, %p5363_p10 }
  0xde   : > { %5371 = shalt.err (!%p5368_p12)
}
  0xdf   : > { %s5372_s9 = scalar_lea.vmem %s1318_s28, 64  ;;  %p5380_p13 = scmp.lt.s32.totalorder %s1318_s28, %s1318_s28 }
  0xe0   : > { %p5373_p1 = scmp.ne.s32.totalorder %s1318_s28, %s5372_s9  ;;  %p5381_p0 = scmp.lt.s32.totalorder %s5372_s9, %s5372_s9 }
  0xe2   : > { %p5375_p3 = pnand %p5373_p1, %p6273_p8  ;;  %p5382_p2 = por %p5381_p0, %p5380_p13 }
  0xe4   : > { %p5376_p4 = pneg %p5375_p3 }
  0xe6   : > { %p5383_p5 = pnand %p5382_p2, %p5376_p4 }
  0xe8   : > { %5386 = shalt.err (!%p5383_p5)
}
  0xe9   : > { %4994 = dma.hbm_to_vmem [thread:$0]  (!%p6263_p6), %s7015_s12, 64, %s1318_s28, [#allocation24]  }
  0xea   : > { %s5963_s8 = smov [#allocation26]   ;;  %s5964_s10 = smov [#allocation29]  }
  0xeb   : > { %s1338_s11 = sshll.u32 %s5963_s8, 4  ;;  %s1363_s23 = sshll.u32 %s5964_s10, 4  ;;  %s1339_s11 = int_to_ptr.vmem [resolvable:$true] %s1338_s11  ;;  %s1364_s23 = int_to_ptr.vmem [resolvable:$true] %s1363_s23 }
  0xec   : > { %s5387_s26 = scalar_lea.hbm %s6070_s27, 512 }
  0xed   : > { %p5388_p7 = scmp.ne.s32.totalorder %s6070_s27, %s5387_s26  ;;  %p5394_p11 = scmp.lt.u32.totalorder %s5387_s26, %s6070_s27 }
  0xef   : > { %p5390_p9 = pnand %p5388_p7, %p6273_p8 }
  0xf1   : > { %p5391_p10 = pneg %p5390_p9 }
  0xf3   : > { %p5396_p12 = pnand %p5394_p11, %p5391_p10 }
  0xf5   : > { %5399 = shalt.err (!%p5396_p12)
}
  0xf6   : > { %s5400_s18 = scalar_lea.vmem %s1339_s11, 512  ;;  %p5408_p13 = scmp.lt.s32.totalorder %s1339_s11, %s1339_s11 }
  0xf7   : > { %p5401_p1 = scmp.ne.s32.totalorder %s1339_s11, %s5400_s18  ;;  %p5409_p0 = scmp.lt.s32.totalorder %s5400_s18, %s5400_s18 }
  0xf9   : > { %p5403_p3 = pnand %p5401_p1, %p6273_p8  ;;  %p5410_p2 = por %p5409_p0, %p5408_p13 }
  0xfb   : > { %p5404_p4 = pneg %p5403_p3 }
  0xfd   : > { %p5411_p5 = pnand %p5410_p2, %p5404_p4 }
  0xff   : > { %5414 = shalt.err (!%p5411_p5)
}
 0x100   : > { %s7019_s28 = smov 8   ;;  %s7020_s9 = smov 128  }
 0x101   : > { %5000 = dma.hbm_to_vmem [thread:$0]  (!%p6263_p6), %s6070_s27, 512, %s1339_s11, [#allocation27], %s7020_s9, %s7020_s9, %s7019_s28  }
 0x102   : > { %s5415_s8 = scalar_lea.hbm %s7011_s15, 32 }
 0x103   : > { %p5416_p7 = scmp.ne.s32.totalorder %s7011_s15, %s5415_s8  ;;  %p5422_p11 = scmp.lt.u32.totalorder %s5415_s8, %s7011_s15 }
 0x105   : > { %p5418_p9 = pnand %p5416_p7, %p6273_p8 }
 0x107   : > { %p5419_p10 = pneg %p5418_p9 }
 0x109   : > { %p5424_p12 = pnand %p5422_p11, %p5419_p10 }
 0x10b   : > { %5427 = shalt.err (!%p5424_p12)
}
 0x10c   : > { %s5428_s10 = scalar_lea.vmem %s1364_s23, 32  ;;  %p5436_p13 = scmp.lt.s32.totalorder %s1364_s23, %s1364_s23 }
 0x10d   : > { %p5429_p1 = scmp.ne.s32.totalorder %s1364_s23, %s5428_s10  ;;  %p5437_p0 = scmp.lt.s32.totalorder %s5428_s10, %s5428_s10 }
 0x10f   : > { %p5431_p3 = pnand %p5429_p1, %p6273_p8  ;;  %p5438_p2 = por %p5437_p0, %p5436_p13 }
 0x111   : > { %p5432_p4 = pneg %p5431_p3 }
 0x113   : > { %p5439_p5 = pnand %p5438_p2, %p5432_p4 }
 0x115   : > { %5442 = shalt.err (!%p5439_p5)
}
 0x116   : > { %s7021_s13 = sld [smem:[#allocation55_spill]]  ;;  %s5965_s11 = smov [#allocation32]  }
 0x117   : > { %5006 = dma.hbm_to_vmem [thread:$0]  (!%p6263_p6), %s7011_s15, 32, %s1364_s23, [#allocation30]  }
 0x118   : > { %s1389_s26 = sshll.u32 %s5965_s11, 4  ;;  %s5443_s8 = scalar_lea.hbm %s6095_s29, 512  ;;  %s1390_s26 = int_to_ptr.vmem [resolvable:$true] %s1389_s26 }
 0x119   : > { %p5444_p7 = scmp.ne.s32.totalorder %s6095_s29, %s5443_s8  ;;  %p5450_p11 = scmp.lt.u32.totalorder %s5443_s8, %s6095_s29 }
 0x11b   : > { %p5446_p9 = pnand %p5444_p7, %p6273_p8 }
 0x11c   : > { %s1202_s18 = sshll.u32 %s7021_s13, 4  ;;  %s1203_s18 = int_to_ptr.vmem [resolvable:$true] %s1202_s18 }
 0x11d   : > { %p5447_p10 = pneg %p5446_p9 }
 0x11f   : > { %p5452_p12 = pnand %p5450_p11, %p5447_p10 }
 0x121   : > { %5455 = shalt.err (!%p5452_p12)
}
 0x122   : > { %s5456_s10 = scalar_lea.vmem %s1390_s26, 512  ;;  %p5464_p13 = scmp.lt.s32.totalorder %s1390_s26, %s1390_s26 }
 0x123   : > { %p5457_p1 = scmp.ne.s32.totalorder %s1390_s26, %s5456_s10  ;;  %p5465_p0 = scmp.lt.s32.totalorder %s5456_s10, %s5456_s10 }
 0x125   : > { %p5459_p3 = pnand %p5457_p1, %p6273_p8  ;;  %p5466_p2 = por %p5465_p0, %p5464_p13 }
 0x127   : > { %p5460_p4 = pneg %p5459_p3 }
 0x129   : > { %p5467_p5 = pnand %p5466_p2, %p5460_p4 }
 0x12b   : > { %5470 = shalt.err (!%p5467_p5)
}
 0x12c   : > { %5012 = dma.hbm_to_vmem [thread:$0]  (!%p6263_p6), %s6095_s29, 512, %s1390_s26, [#allocation33], %s7020_s9, %s7020_s9, %s7019_s28  }
 0x12d   : > { %s5471_s23 = scalar_lea.vmem %s1203_s18, 16  ;;  %p5479_p11 = scmp.lt.s32.totalorder %s1203_s18, %s1203_s18 }
 0x12e   : > { %p5472_p7 = scmp.ne.s32.totalorder %s1203_s18, %s5471_s23  ;;  %p5480_p12 = scmp.lt.s32.totalorder %s5471_s23, %s5471_s23 }
 0x130   : > { %p5474_p9 = pnand %p5472_p7, %p6273_p8  ;;  %p5481_p1 = por %p5480_p12, %p5479_p11 }
 0x132   : > { %p5475_p10 = pneg %p5474_p9 }
 0x134   : > { %p5482_p3 = pnand %p5481_p1, %p5475_p10 }
 0x136   : > { %5485 = shalt.err (!%p5482_p3)
}
 0x137   : > { %s5966_s11 = smov [#allocation10]   ;;  %s5967_s8 = smov [#allocation13]  }
 0x138   : > { %4967 = dma.vmem_to_smem (!%p6263_p6), %s1203_s18, 16, %s5966_s11, [#allocation9]  }
 0x139   : > { %s1224_s26 = sshll.u32 %s5967_s8, 4  ;;  %s5968_s10 = smov [#allocation16]   ;;  %s1225_s26 = int_to_ptr.vmem [resolvable:$true] %s1224_s26 }
 0x13a   : > { %s1250_s12 = sshll.u32 %s5968_s10, 4  ;;  %s5486_s13 = scalar_lea.hbm %s7009_s21, 32  ;;  %s1251_s12 = int_to_ptr.vmem [resolvable:$true] %s1250_s12 }
 0x13b   : > { %p5487_p4 = scmp.ne.s32.totalorder %s7009_s21, %s5486_s13  ;;  %p5493_p2 = scmp.lt.u32.totalorder %s5486_s13, %s7009_s21 }
 0x13d   : > { %p5489_p13 = pnand %p5487_p4, %p6273_p8 }
 0x13f   : > { %p5490_p0 = pneg %p5489_p13 }
 0x141   : > { %p5495_p5 = pnand %p5493_p2, %p5490_p0 }
 0x143   : > { %5498 = shalt.err (!%p5495_p5)
}
 0x144   : > { %s5499_s23 = scalar_lea.vmem %s1225_s26, 32  ;;  %p5507_p11 = scmp.lt.s32.totalorder %s1225_s26, %s1225_s26 }
 0x145   : > { %p5500_p7 = scmp.ne.s32.totalorder %s1225_s26, %s5499_s23  ;;  %p5508_p12 = scmp.lt.s32.totalorder %s5499_s23, %s5499_s23 }
 0x147   : > { %p5502_p9 = pnand %p5500_p7, %p6273_p8  ;;  %p5509_p1 = por %p5508_p12, %p5507_p11 }
 0x149   : > { %p5503_p10 = pneg %p5502_p9 }
 0x14b   : > { %p5510_p3 = pnand %p5509_p1, %p5503_p10 }
 0x14d   : > { %5513 = shalt.err (!%p5510_p3)
}
 0x14e   : > { %4973 = dma.hbm_to_vmem [thread:$0]  (!%p6263_p6), %s7009_s21, 32, %s1225_s26, [#allocation12]  }
 0x14f   : > { %s5514_s13 = scalar_lea.hbm %s7014_s3, 512 }
 0x150   : > { %p5515_p4 = scmp.ne.s32.totalorder %s7014_s3, %s5514_s13  ;;  %p5521_p2 = scmp.lt.u32.totalorder %s5514_s13, %s7014_s3 }
 0x152   : > { %p5517_p13 = pnand %p5515_p4, %p6273_p8 }
 0x154   : > { %p5518_p0 = pneg %p5517_p13 }
 0x156   : > { %p5523_p5 = pnand %p5521_p2, %p5518_p0 }
 0x158   : > { %5526 = shalt.err (!%p5523_p5)
}
 0x159   : > { %s5527_s18 = scalar_lea.vmem %s1251_s12, 512  ;;  %p5535_p11 = scmp.lt.s32.totalorder %s1251_s12, %s1251_s12 }
 0x15a   : > { %p5528_p7 = scmp.ne.s32.totalorder %s1251_s12, %s5527_s18  ;;  %p5536_p12 = scmp.lt.s32.totalorder %s5527_s18, %s5527_s18 }
 0x15c   : > { %p5530_p9 = pnand %p5528_p7, %p6273_p8  ;;  %p5537_p1 = por %p5536_p12, %p5535_p11 }
 0x15e   : > { %p5531_p10 = pneg %p5530_p9 }
 0x160   : > { %p5538_p3 = pnand %p5537_p1, %p5531_p10 }
 0x162   : > { %5541 = shalt.err (!%p5538_p3)
}
 0x163   : > { %4979 = dma.hbm_to_vmem [thread:$0]  (!%p6263_p6), %s7014_s3, 512, %s1251_s12, [#allocation15], %s7020_s9, %s7020_s9, %s7019_s28  }
 0x164   : > { %s5969_s11 = smov [#allocation19]   ;;  %s5970_s26 = smov [#allocation22]  }
 0x165   : > { %s1281_s8 = sshll.u32 %s5969_s11, 4  ;;  %s1306_s10 = sshll.u32 %s5970_s26, 4  ;;  %s1282_s8 = int_to_ptr.vmem [resolvable:$true] %s1281_s8  ;;  %s1307_s10 = int_to_ptr.vmem [resolvable:$true] %s1306_s10 }
 0x166   : > { %s5542_s23 = scalar_lea.hbm %s6045_s24, 16 }
 0x167   : > { %p5543_p4 = scmp.ne.s32.totalorder %s6045_s24, %s5542_s23  ;;  %p5549_p2 = scmp.lt.u32.totalorder %s5542_s23, %s6045_s24 }
 0x169   : > { %p5545_p13 = pnand %p5543_p4, %p6273_p8 }
 0x16b   : > { %p5546_p0 = pneg %p5545_p13 }
 0x16d   : > { %p5551_p5 = pnand %p5549_p2, %p5546_p0 }
 0x16f   : > { %5554 = shalt.err (!%p5551_p5)
}
 0x170   : > { %s5555_s13 = scalar_lea.vmem %s1282_s8, 16  ;;  %s5562_s12 = scalar_lea.vmem %s1282_s8, 32 }
 0x171   : > { %p5556_p7 = scmp.ne.s32.totalorder %s1282_s8, %s5555_s13  ;;  %p5563_p11 = scmp.lt.s32.totalorder %s1282_s8, %s1282_s8 }
 0x172   : > { %p5564_p12 = scmp.lt.s32.totalorder %s5562_s12, %s5555_s13 }
 0x173   : > { %p5558_p9 = pnand %p5556_p7, %p6273_p8 }
 0x174   : > { %p5565_p1 = por %p5564_p12, %p5563_p11 }
 0x175   : > { %p5559_p10 = pneg %p5558_p9 }
 0x177   : > { %p5566_p3 = pnand %p5565_p1, %p5559_p10 }
 0x179   : > { %5569 = shalt.err (!%p5566_p3)
}
 0x17a   : > { %4985 = dma.hbm_to_vmem [thread:$0]  (!%p6263_p6), %s6045_s24, 16, %s1282_s8, [#allocation18]  }
 0x17b   : > { %s5570_s18 = scalar_lea.hbm %s7013_s6, 32 }
 0x17c   : > { %p5571_p4 = scmp.ne.s32.totalorder %s7013_s6, %s5570_s18  ;;  %p5577_p2 = scmp.lt.u32.totalorder %s5570_s18, %s7013_s6 }
 0x17e   : > { %p5573_p13 = pnand %p5571_p4, %p6273_p8 }
 0x180   : > { %p5574_p0 = pneg %p5573_p13 }
 0x182   : > { %p5579_p5 = pnand %p5577_p2, %p5574_p0 }
 0x184   : > { %5582 = shalt.err (!%p5579_p5)
}
 0x185   : > { %s5583_s11 = scalar_lea.vmem %s1307_s10, 32  ;;  %p5591_p11 = scmp.lt.s32.totalorder %s1307_s10, %s1307_s10 }
 0x186   : > { %p5584_p7 = scmp.ne.s32.totalorder %s1307_s10, %s5583_s11  ;;  %p5592_p12 = scmp.lt.s32.totalorder %s5583_s11, %s5583_s11 }
 0x188   : > { %p5586_p9 = pnand %p5584_p7, %p6273_p8  ;;  %p5593_p1 = por %p5592_p12, %p5591_p11 }
 0x18a   : > { %p5587_p10 = pneg %p5586_p9 }
 0x18c   : > { %p5594_p3 = pnand %p5593_p1, %p5587_p10 }
 0x18e   : > { %5597 = shalt.err (!%p5594_p3)
}
 0x18f   : > { %s7022_s8 = sld [smem:[#allocation64_spill]]  ;;  %s5971_s26 = smov [#allocation25]  }
 0x190   : > { %4991 = dma.hbm_to_vmem [thread:$0]  (!%p6263_p6), %s7013_s6, 32, %s1307_s10, [#allocation21]  }
 0x191   : > { %s1328_s23 = sshll.u32 %s5971_s26, 4  ;;  %s5972_s13 = smov [#allocation28]   ;;  %s1329_s23 = int_to_ptr.vmem [resolvable:$true] %s1328_s23 }
 0x192   : > { %s1352_s12 = sshll.u32 %s5972_s13, 4  ;;  %s1353_s12 = int_to_ptr.vmem [resolvable:$true] %s1352_s12 }
 0x195   : > { %s5598_s18 = scalar_lea.hbm %s7022_s8, 64 }
 0x196   : > { %p5599_p4 = scmp.ne.s32.totalorder %s7022_s8, %s5598_s18  ;;  %p5605_p2 = scmp.lt.u32.totalorder %s5598_s18, %s7022_s8 }
 0x198   : > { %p5601_p13 = pnand %p5599_p4, %p6273_p8 }
 0x19a   : > { %p5602_p0 = pneg %p5601_p13 }
 0x19c   : > { %p5607_p5 = pnand %p5605_p2, %p5602_p0 }
 0x19e   : > { %5610 = shalt.err (!%p5607_p5)
}
 0x19f   : > { %s5611_s11 = scalar_lea.vmem %s1329_s23, 64  ;;  %p5619_p11 = scmp.lt.s32.totalorder %s1329_s23, %s1329_s23 }
 0x1a0   : > { %p5612_p7 = scmp.ne.s32.totalorder %s1329_s23, %s5611_s11  ;;  %p5620_p12 = scmp.lt.s32.totalorder %s5611_s11, %s5611_s11 }
 0x1a2   : > { %p5614_p9 = pnand %p5612_p7, %p6273_p8  ;;  %p5621_p1 = por %p5620_p12, %p5619_p11 }
 0x1a4   : > { %p5615_p10 = pneg %p5614_p9 }
 0x1a6   : > { %p5622_p3 = pnand %p5621_p1, %p5615_p10 }
 0x1a8   : > { %5625 = shalt.err (!%p5622_p3)
}
 0x1a9   : > { %s7023_s10 = sld [smem:[#allocation65_spill]] }
 0x1aa   : > { %4997 = dma.hbm_to_vmem [thread:$0]  (!%p6263_p6), %s7022_s8, 64, %s1329_s23, [#allocation24]  }
 0x1af   : > { %s5626_s26 = scalar_lea.hbm %s7023_s10, 32 }
 0x1b0   : > { %p5627_p4 = scmp.ne.s32.totalorder %s7023_s10, %s5626_s26  ;;  %p5633_p2 = scmp.lt.u32.totalorder %s5626_s26, %s7023_s10 }
 0x1b2   : > { %p5629_p13 = pnand %p5627_p4, %p6273_p8 }
 0x1b4   : > { %p5630_p0 = pneg %p5629_p13 }
 0x1b6   : > { %p5635_p5 = pnand %p5633_p2, %p5630_p0 }
 0x1b8   : > { %5638 = shalt.err (!%p5635_p5)
}
 0x1b9   : > { %s5639_s13 = scalar_lea.vmem %s1353_s12, 32  ;;  %p5647_p11 = scmp.lt.s32.totalorder %s1353_s12, %s1353_s12 }
 0x1ba   : > { %p5640_p7 = scmp.ne.s32.totalorder %s1353_s12, %s5639_s13  ;;  %p5648_p12 = scmp.lt.s32.totalorder %s5639_s13, %s5639_s13 }
 0x1bc   : > { %p5642_p9 = pnand %p5640_p7, %p6273_p8  ;;  %p5649_p1 = por %p5648_p12, %p5647_p11 }
 0x1be   : > { %p5643_p10 = pneg %p5642_p9 }
 0x1c0   : > { %p5650_p3 = pnand %p5649_p1, %p5643_p10 }
 0x1c2   : > { %5653 = shalt.err (!%p5650_p3)
}
 0x1c3   : > { %s7024_s23 = sld [smem:[#allocation67_spill]]  ;;  %s5973_s18 = smov [#allocation31]  }
 0x1c4   : > { %5003 = dma.hbm_to_vmem [thread:$0]  (!%p6263_p6), %s7023_s10, 32, %s1353_s12, [#allocation27]  }
 0x1c5   : > { %s1373_s11 = sshll.u32 %s5973_s18, 4  ;;  %s5974_s26 = smov [#allocation34]   ;;  %s1374_s11 = int_to_ptr.vmem [resolvable:$true] %s1373_s11 }
 0x1c6   : > { %s1417_s3 = sshll.u32 %s5974_s26, 4  ;;  %s1418_s3 = int_to_ptr.vmem [resolvable:$true] %s1417_s3 }
 0x1c9   : > { %s5654_s6 = scalar_lea.hbm %s7024_s23, 512 }
 0x1ca   : > { %p5655_p4 = scmp.ne.s32.totalorder %s7024_s23, %s5654_s6  ;;  %p5661_p2 = scmp.lt.u32.totalorder %s5654_s6, %s7024_s23 }
 0x1cc   : > { %p5657_p13 = pnand %p5655_p4, %p6273_p8 }
 0x1ce   : > { %p5658_p0 = pneg %p5657_p13 }
 0x1d0   : > { %p5663_p5 = pnand %p5661_p2, %p5658_p0 }
 0x1d2   : > { %5666 = shalt.err (!%p5663_p5)
}
 0x1d3   : > { %s5667_s13 = scalar_lea.vmem %s1374_s11, 512  ;;  %p5675_p11 = scmp.lt.s32.totalorder %s1374_s11, %s1374_s11 }
 0x1d4   : > { %p5668_p7 = scmp.ne.s32.totalorder %s1374_s11, %s5667_s13  ;;  %p5676_p12 = scmp.lt.s32.totalorder %s5667_s13, %s5667_s13 }
 0x1d6   : > { %p5670_p9 = pnand %p5668_p7, %p6273_p8  ;;  %p5677_p1 = por %p5676_p12, %p5675_p11 }
 0x1d8   : > { %p5671_p10 = pneg %p5670_p9 }
 0x1da   : > { %p5678_p3 = pnand %p5677_p1, %p5671_p10 }
 0x1dc   : > { %5681 = shalt.err (!%p5678_p3)
}
 0x1dd   : > { %s7025_s6 = sld [smem:[#allocation74_spill]] }
 0x1de   : > { %5009 = dma.hbm_to_vmem [thread:$0]  (!%p6263_p6), %s7024_s23, 512, %s1374_s11, [#allocation30], %s7020_s9, %s7020_s9, %s7019_s28  }
 0x1e3   : > { %s5682_s12 = scalar_lea.hbm %s7025_s6, 512 }
 0x1e4   : > { %p5683_p4 = scmp.ne.s32.totalorder %s7025_s6, %s5682_s12  ;;  %p5689_p2 = scmp.lt.u32.totalorder %s5682_s12, %s7025_s6 }
 0x1e6   : > { %p5685_p13 = pnand %p5683_p4, %p6273_p8 }
 0x1e8   : > { %p5686_p0 = pneg %p5685_p13 }
 0x1ea   : > { %p5691_p5 = pnand %p5689_p2, %p5686_p0 }
 0x1ec   : > { %5694 = shalt.err (!%p5691_p5)
}
 0x1ed   : > { %s5695_s18 = scalar_lea.vmem %s1418_s3, 512  ;;  %p5703_p11 = scmp.lt.s32.totalorder %s1418_s3, %s1418_s3 }
 0x1ee   : > { %p5696_p7 = scmp.ne.s32.totalorder %s1418_s3, %s5695_s18  ;;  %p5704_p12 = scmp.lt.s32.totalorder %s5695_s18, %s5695_s18 }
 0x1f0   : > { %p5698_p9 = pnand %p5696_p7, %p6273_p8  ;;  %p5705_p1 = por %p5704_p12, %p5703_p11 }
 0x1f2   : > { %p5699_p10 = pneg %p5698_p9 }
 0x1f4   : > { %p5706_p3 = pnand %p5705_p1, %p5699_p10 }
 0x1f6   : > { %5709 = shalt.err (!%p5706_p3)
}
 0x1f7   : > { %s7026_s11 = sld [smem:[#allocation75_spill]]  ;;  %s5975_s26 = smov [#allocation35]  }
 0x1f8   : > { %5015 = dma.hbm_to_vmem [thread:$0]  (!%p6263_p6), %s7025_s6, 512, %s1418_s3, [#allocation33], %s7020_s9, %s7020_s9, %s7019_s28  }
 0x1f9   : > { %s1430_s13 = sshll.u32 %s5975_s26, 4  ;;  %s1431_s13 = int_to_ptr.vmem [resolvable:$true] %s1430_s13 }
 0x1fd   : > { %s5710_s12 = scalar_lea.hbm %s7026_s11, 512 }
 0x1fe   : > { %p5711_p4 = scmp.ne.s32.totalorder %s7026_s11, %s5710_s12  ;;  %p5717_p2 = scmp.lt.u32.totalorder %s5710_s12, %s7026_s11 }
 0x200   : > { %p5713_p13 = pnand %p5711_p4, %p6273_p8 }
 0x202   : > { %p5714_p0 = pneg %p5713_p13 }
 0x204   : > { %p5719_p5 = pnand %p5717_p2, %p5714_p0 }
 0x206   : > { %5722 = shalt.err (!%p5719_p5)
}
 0x207   : > { %s5723_s18 = scalar_lea.vmem %s1431_s13, 512  ;;  %p5731_p11 = scmp.lt.s32.totalorder %s1431_s13, %s1431_s13 }
 0x208   : > { %p5724_p7 = scmp.ne.s32.totalorder %s1431_s13, %s5723_s18  ;;  %p5732_p12 = scmp.lt.s32.totalorder %s5723_s18, %s5723_s18 }
 0x20a   : > { %p5726_p9 = pnand %p5724_p7, %p6273_p8  ;;  %p5733_p1 = por %p5732_p12, %p5731_p11 }
 0x20c   : > { %p5727_p10 = pneg %p5726_p9 }
 0x20e   : > { %p5734_p3 = pnand %p5733_p1, %p5727_p10 }
 0x210   : > { %5737 = shalt.err (!%p5734_p3)
}
 0x211   : > { %5018 = dma.hbm_to_vmem [thread:$0]  (!%p6263_p6), %s7026_s11, 512, %s1431_s13, [#allocation36], %s7020_s9, %s7020_s9, %s7019_s28  }
 0x212   : > { %s4381_s3 = sadd.s32 4294967294, %s5906_s22   ;;  %s6484_s16 = sadd.s32 1, %s5906_s22  }
 0x213   : > { %s139_s19 = ssub.s32 %s5906_s22, %s6484_s16  ;;  %s142_s26 = sadd.s32 1, %s5902_s20 }
 0x214   : > { %s7027_s12 = sld [smem:[#allocation53_spill]]  ;;  %p140_p8 = scmp.eq.s32.totalorder %s139_s19, 0 }
 0x215   : > { %p149_p4 = scmp.ne.s32.totalorder %s5902_s20, %s5898_s5  ;;  %p150_p13 = scmp.eq.s32.totalorder %s5906_s22, 0 }
 0x216   : > { %p155_p0 = scmp.ne.s32.totalorder %s5898_s5, %s5894_s0  ;;  %p7029_p5 = scmp.eq.s32.totalorder %s6247_s2, 0 }
 0x217   : > { %s6495_s18 = scalar_select %p140_p8, %s5902_s20, %s142_s26  }
 0x218   : > { %p6497_p2 = por %p150_p13, %p149_p4  ;;  %p6503_p6 = por %p7029_p5, %p155_p0 }
 0x219   : > { %p1150_p7 = scmp.eq.s32.totalorder %s6247_s2, 1  ;;  %p1156_p9 = scmp.eq.s32.totalorder %s4381_s3, 1 }
 0x21a   : > { %s7030_s28 = scalar_select %p6503_p6, 1, 0 }
 0x21b   : > { %p5048_p10 = scmp.lt.s32.totalorder %s5906_s22, 2  ;;  %s1495_s9 = sand.u32 1, %s5902_s20  }
 0x21c   : > { %p6510_p11 = por %p1150_p7, %p149_p4  ;;  %p6514_p12 = por %p1156_p9, %p155_p0 }
 0x21d   : > { %s4402_s26 = sshll.u32 %s1495_s9, 1  ;;  %s4403_s8 = sshll.u32 %s5906_s22, 5 }
 0x21e   : > { %s7031_s13 = scalar_select %p6510_p11, 1, 0 }
 0x21f   : > { %s7032_s19 = scalar_select %p6514_p12, 1, 0 }
 0x220   : > { %s6520_s10 = scalar_lea.hbm %s7027_s12, %s4403_s8  ;;  %s1499_s3 = scalar_lea.vmem [#allocation6], %s4402_s26 }
 0x221   : > { %s1506_s11 = sshll.u32 %s1499_s3, 4  ;;  %p6526_p1 = pnand %p5048_p10, %p6497_p2  ;;  %s6522_s11 = int_to_ptr.vmem [resolvable:$true] %s1506_s11 }
 0x222   : > { %s1496_s15 = scalar_lea.sflag [#allocation7], %s1495_s9  ;;  %s5738_s17 = scalar_lea.hbm %s6520_s10, 32 }
 0x223   : > { %p5739_p3 = scmp.ne.s32.totalorder %s6520_s10, %s5738_s17  ;;  %p5740_p8 = pneg %p6526_p1 }
 0x224   : > { %s5743_s8 = scalar_lea.hbm %s7027_s12, 64  ;;  %p5744_p0 = scmp.lt.u32.totalorder %s6520_s10, %s7027_s12 }
 0x225   : > { %p5741_p4 = pnand %p5740_p8, %p5739_p3  ;;  %p5745_p5 = scmp.lt.u32.totalorder %s5743_s8, %s5738_s17 }
 0x226   : > { %p5747_p9 = scmp.lt.u32.totalorder %s5738_s17, %s6520_s10 }
 0x227   : > { %p5742_p13 = pneg %p5741_p4  ;;  %p5746_p7 = por %p5745_p5, %p5744_p0 }
 0x229   : > { %p5748_p2 = por %p5747_p9, %p5746_p7 }
 0x22b   : > { %p5749_p10 = pnand %p5748_p2, %p5742_p13 }
 0x22d   : > { %5752 = shalt.err (!%p5749_p10)
}
 0x22e   : > { %s5753_s6 = scalar_lea.vmem %s6522_s11, 32  ;;  %s5976_s9 = smov [#allocation6]  }
 0x22f   : > { %p5754_p12 = scmp.ne.s32.totalorder %s6522_s11, %s5753_s6  ;;  %s5758_s26 = sshll.u32 %s5976_s9, 4  ;;  %s5759_s26 = int_to_ptr.vmem [resolvable:$false] %s5758_s26 }
 0x230   : > { %s5760_s3 = scalar_lea.vmem %s5759_s26, 64  ;;  %p5761_p3 = scmp.lt.s32.totalorder %s6522_s11, %s5759_s26 }
 0x231   : > { %p5756_p11 = pnand %p5754_p12, %p5740_p8  ;;  %p5762_p4 = scmp.lt.s32.totalorder %s5760_s3, %s5753_s6 }
 0x233   : > { %p5757_p6 = pneg %p5756_p11  ;;  %p5763_p0 = por %p5762_p4, %p5761_p3 }
 0x235   : > { %p5764_p5 = pnand %p5763_p0, %p5757_p6 }
 0x237   : > { %5767 = shalt.err (!%p5764_p5)
}
 0x238   : > { %5022 = dma.hbm_to_vmem [thread:$0]  (!%p6526_p1), %s6520_s10, 32, %s6522_s11, %s1496_s15  }
 0x239   : > { %p7034_p13 = scmp.ne.s32.totalorder %s7016_s7, 0 }
 0x23a   : > { %s6554_s17 = sand.u32 (!%p7034_p13), 1, %s5898_s5   ;;  %p7035_p6 = scmp.ne.s32.totalorder (!%p7034_p13), %s7030_s28, 0 }
 0x23b   : > { %1521 = sbr.rel (%p7034_p13) target bundleno = 3549 (0xddd), region = 208  ;;  %s6957_s8 = sshll.u32 (!%p7034_p13), %s6554_s17, 1 }
 0x23c   : > { %s1524_s6 = scalar_lea.sflag (!%p7034_p13), [#allocation7], %s6554_s17  ;;  %s6560_s9 = scalar_lea.vmem (!%p7034_p13), [#allocation6], %s6957_s8 }
 0x242   : > { %5841 = dma.done.wait (%p7035_p6), %s1524_s6, 32  }
 0x243   : > { %5843 = vsyncadd (%p7035_p6), %s1524_s6, 4294967264  ;;  %p7036_p11 = scmp.eq.s32.totalorder %s6247_s2, 0 }
 0x245   : > { %5845 = dma.done.wait (%p7036_p11), [#allocation9], 16   ;;  %p7037_p12 = pmov %p7036_p11 }
 0x246   : > { %p7038_p1 = pmov %p7036_p11 }
 0x247   : > { %5847 = vsyncadd (%p7037_p12), [#allocation9], 4294967280 }
 0x248   : > { %5849 = dma.done.wait (%p7038_p1), [#allocation12], 64   ;;  %p7039_p8 = pmov %p7038_p1 }
 0x249   : > { %p7040_p7 = pmov %p7038_p1 }
 0x24a   : > { %5851 = vsyncadd (%p7039_p8), [#allocation12], 4294967232 }
 0x24b   : > { %5853 = dma.done.wait (%p7040_p7), [#allocation15], 1024   ;;  %p7041_p9 = pmov %p7038_p1 }
 0x24c   : > { %p7042_p2 = pmov %p7038_p1 }
 0x24d   : > { %5855 = vsyncadd (%p7041_p9), [#allocation15], 4294966272 }
 0x24e   : > { %5857 = dma.done.wait (%p7042_p2), [#allocation18], 32   ;;  %p7043_p10 = pmov %p7038_p1 }
 0x24f   : > { %p7044_p3 = pmov %p7038_p1 }
 0x250   : > { %5859 = vsyncadd (%p7043_p10), [#allocation18], 4294967264 }
 0x251   : > { %5861 = dma.done.wait (%p7044_p3), [#allocation21], 64   ;;  %p7045_p4 = pmov %p7038_p1 }
 0x252   : > { %p7046_p0 = pmov %p7038_p1 }
 0x253   : > { %5863 = vsyncadd (%p7045_p4), [#allocation21], 4294967232 }
 0x254   : > { %5865 = dma.done.wait (%p7046_p0), [#allocation24], 128   ;;  %p7047_p5 = pmov %p7046_p0 }
 0x255   : > { %p7048_p13 = pmov %p7046_p0 }
 0x256   : > { %5867 = vsyncadd (%p7047_p5), [#allocation24], 4294967168 }
 0x257   : > { %5869 = dma.done.wait (%p7048_p13), [#allocation27], 544   ;;  %p7049_p6 = pmov %p7046_p0 }
 0x258   : > { %p7050_p11 = pmov %p7046_p0 }
 0x259   : > { %5871 = vsyncadd (%p7049_p6), [#allocation27], 4294966752 }
 0x25a   : > { %5873 = dma.done.wait (%p7050_p11), [#allocation30], 544   ;;  %p7051_p12 = pmov %p7046_p0 }
 0x25b   : > { %p7052_p1 = pmov %p7046_p0 }
 0x25c   : > { %5875 = vsyncadd (%p7051_p12), [#allocation30], 4294966752 }
 0x25d   : > { %5877 = dma.done.wait (%p7052_p1), [#allocation33], 1024   ;;  %p7053_p8 = pmov %p7046_p0 }
 0x25e   : > { %p7054_p7 = pmov %p7046_p0 }
 0x25f   : > { %5879 = vsyncadd (%p7053_p8), [#allocation33], 4294966272 }
 0x260   : > { %5881 = dma.done.wait (%p7054_p7), [#allocation36], 512   ;;  %p7055_p9 = pmov %p7046_p0 }
 0x262   : > { %5883 = vsyncadd (%p7055_p9), [#allocation36], 4294966784 }
 0x263   : > { %1604 = sfence }
 0x264   : > { %v1746_v4 = vld [vmem:[#allocation14] sm:$0xff]  ;;  %s7056_s14 = sld [smem:[#allocation58_spill]]  ;;  %v1725_v5 = vld [vmem:[#allocation11] sm:$0x3]  ;;  %v5977_v6 = vmov 0   ;;  %v1747_v7 = vld [vmem:[#allocation14 + $0x8] sm:$0xff]  ;;  %v1770_v63 = vlaneseq }
 0x265   : > { %5174 = vset.pattern.permute.xlu1 %v5977_v6  ;;  %5173 = vset.pattern.permute.xlu0 %v5977_v6  ;;  %s7057_s15 = sld [smem:[#allocation60_spill]]  ;;  %v1732_v8 = vld [vmem:[#allocation13] sm:$0x3]  ;;  %v1748_v12 = vld [vmem:[#allocation14 + $0x10] sm:$0xff]  ;;  %s7059_s10 = sld [smem:[#allocation69_spill]]  ;;  %v1838_v31 = vld [vmem:[#allocation16] sm:$0xff] }
 0x266   : > { %1752 = vperm.xlu1 %5174, %v1746_v4   ;;  %1728 = vperm.xlu0 %5173, %v1725_v5   ;;  %v1749_v11 = vld [vmem:[#allocation14 + $0x18] sm:$0xff]  ;;  %s7058_s7 = sld [smem:[#allocation68_spill]]  ;;  %v2085_v19 = vld [vmem:[#allocation3] sm:$0x1]  ;;  %v2001_v20 = vld [vmem:[#allocation2] sm:$0x1] }
 0x267   : > { %v2189_v21 = vld [vmem:[#allocation22] sm:$0x3]  ;;  %v2182_v22 = vld [vmem:[#allocation20] sm:$0x3]  ;;  %v2200_v24 = vld [vmem:[#allocation25] sm:$0xf] }
 0x268   : > { %s7060_s11 = sld [smem:[#allocation71_spill]]  ;;  %s7061_s28 = sld [smem:[#allocation73_spill]]  ;;  %vm1866_vm0 = vcmask 261120   ;;  %v2453_v34 = vld [vmem:[#allocation29] sm:$0x3]  ;;  %v2965_v36 = vld [vmem:[#allocation34] sm:$0xff] }
 0x269   : > { %s7062_s26 = sld [smem:[#allocation76_spill]]  ;;  %4591 = vmatprep.mubr.msk.f32.mxu0 %vm1866_vm0, %v1838_v31  ;;  %v2446_v35 = vld [vmem:[#allocation28] sm:$0x3]  ;;  %s7063_s3 = sld [smem:[#allocation78_spill]]  ;;  %v2966_v39 = vld [vmem:[#allocation34 + $0x8] sm:$0xff]  ;;  %v2967_v40 = vld [vmem:[#allocation34 + $0x10] sm:$0xff] }
 0x26a   : > { %1757 = vperm.xlu1 %5174, %v1747_v7   ;;  %1735 = vperm.xlu0 %5173, %v1732_v8   ;;  %v1743_v9 = vld [vmem:[%s7056_s14 + $0x8] sm:$0xff]  ;;  %v1742_v10 = vld [vmem:[%s7056_s14] sm:$0xff]  ;;  %v1745_v13 = vld [vmem:[%s7056_s14 + $0x18] sm:$0xff]  ;;  %s7064_s6 = sld [smem:[#allocation84_spill]]  ;;  %s7067_s8 = sld [smem:[#allocation82_spill]]  ;;  %v1771_v0 = vshrl.u32 %v1770_v63, 7 }
 0x26b   : > { %v1744_v14 = vld [vmem:[%s7056_s14 + $0x10] sm:$0xff]  ;;  %v1843_v15 = vld [vmem:[%s7057_s15 + $0x8] sm:$0xff]  ;;  %v1842_v16 = vld [vmem:[%s7057_s15] sm:$0xff]  ;;  %vm6960_vm1 = vmmov 0   ;;  %vm2180_vm2 = vcmask 1040384   ;;  %vm2205_vm3 = vcmask 1041408  }
 0x26c   : > { %v1845_v17 = vld [vmem:[%s7057_s15 + $0x18] sm:$0xff]  ;;  %v1844_v18 = vld [vmem:[%s7057_s15 + $0x10] sm:$0xff]  ;;  %v2463_v23 = vld [vmem:[%s7058_s7] sm:$0xff]  ;;  %v6648_v5 = vsub.s32 0, %v1771_v0  ;;  %vm2201_vm4 = vcmask 15360   ;;  %vm2341_vm5 = vcmask 31744  }
 0x26d   : > { %v2465_v25 = vld [vmem:[%s7058_s7 + $0x10] sm:$0xff]  ;;  %v2464_v26 = vld [vmem:[%s7058_s7 + $0x8] sm:$0xff]  ;;  %v2632_v27 = vld [vmem:[%s7059_s10] sm:$0xff]  ;;  %vm2295_vm6 = vcmask 1043456   ;;  %vm5981_vm8 = vmmov 1   ;;  %p1720_p2 = scmp.lt.s32.totalorder %s6247_s2, 1 }
 0x26e   : > { %1785 = vperm.xlu1 %5174, %v1743_v9   ;;  %1780 = vperm.xlu0 %5173, %v1742_v10   ;;  %v2466_v28 = vld [vmem:[%s7058_s7 + $0x18] sm:$0xff]  ;;  %v2634_v29 = vld [vmem:[%s7059_s10 + $0x10] sm:$0xff]  ;;  %v2633_v30 = vld [vmem:[%s7059_s10 + $0x8] sm:$0xff]  ;;  %s7068_s7 = sld [smem:[#allocation81_spill]]  ;;  %p7084_p3 = scmp.ne.s32.totalorder %s7031_s13, 0 }
 0x26f   : > { %v2790_v32 = vld [vmem:[%s7060_s11] sm:$0x3]  ;;  %v2635_v33 = vld [vmem:[%s7059_s10 + $0x18] sm:$0xff]  ;;  %v2962_v41 = vld [vmem:[%s7062_s26 + $0x8] sm:$0xff]  ;;  %s7065_s11 = sld [smem:[#allocation86_spill]]  ;;  %s7069_s10 = sld [smem:[#allocation90_spill]] }
 0x270   : > { %v2870_v37 = vld [vmem:[%s7061_s28] sm:$0x3]  ;;  %v2963_v42 = vld [vmem:[%s7062_s26 + $0x10] sm:$0xff]  ;;  %v2968_v43 = vld [vmem:[#allocation34 + $0x18] sm:$0xff]  ;;  %s7066_s28 = sld [smem:[#allocation88_spill]]  ;;  %s5982_s15 = smov [#allocation38]  }
 0x271   : > { %v2961_v38 = vld [vmem:[%s7062_s26] sm:$0xff]  ;;  %v2964_v45 = vld [vmem:[%s7062_s26 + $0x18] sm:$0xff]  ;;  %v3168_v46 = vld [vmem:[%s7063_s3 + $0x10] sm:$0xff] }
 0x272   : > { %1767 = vperm.xlu1 %5174, %v1749_v11   ;;  %1762 = vperm.xlu0 %5173, %v1748_v12   ;;  %v3166_v44 = vld [vmem:[%s7063_s3] sm:$0xff]  ;;  %v3167_v47 = vld [vmem:[%s7063_s3 + $0x8] sm:$0xff]  ;;  %v3169_v49 = vld [vmem:[%s7063_s3 + $0x18] sm:$0xff]  ;;  %s4431_s3 = sld [smem:[#allocation10 + $0x1]] }
 0x273   : > { %v3521_v48 = vld [vmem:[%s7064_s6] sm:$0xff]  ;;  %v3523_v50 = vld [vmem:[%s7064_s6 + $0x10] sm:$0xff]  ;;  %v3522_v51 = vld [vmem:[%s7064_s6 + $0x8] sm:$0xff] }
 0x274   : > { %v3524_v53 = vld [vmem:[%s7064_s6 + $0x18] sm:$0xff]  ;;  %v3324_v56 = vld [vmem:[#allocation4] sm:$0x1]  ;;  %v3408_v58 = vld [vmem:[#allocation5] sm:$0x1]  ;;  %s4443_s6 = sld [smem:[#allocation10 + $0x2]] }
 0x275   : > { %v3690_v52 = vld [vmem:[%s7065_s11] sm:$0xff]  ;;  %v3692_v54 = vld [vmem:[%s7065_s11 + $0x10] sm:$0xff]  ;;  %v3691_v55 = vld [vmem:[%s7065_s11 + $0x8] sm:$0xff] }
 0x276   : > { %1795 = vperm.xlu1 %5174, %v1745_v13   ;;  %1790 = vperm.xlu0 %5173, %v1744_v14   ;;  %v3693_v57 = vld [vmem:[%s7065_s11 + $0x18] sm:$0xff]  ;;  %v3848_v59 = vld [vmem:[%s7066_s28] sm:$0x3]  ;;  %v1723_v3 = vld [vmem:[%s6560_s9] sm:$0x3]  ;;  %s7074_s9 = sld [smem:[#allocation72_spill]] }
 0x277   : > { %v3511_v60 = vld [vmem:[%s7067_s8] sm:$0x3]  ;;  %v1839_v63 = vld [vmem:[#allocation16 + $0x8] sm:$0xff]  ;;  %s7073_s8 = sld [smem:[#allocation70_spill]]  ;;  %s1739_s28 = sld [smem:[#allocation10]] }
 0x278   : > { %v3504_v61 = vld [vmem:[%s7068_s7] sm:$0x3]  ;;  %s7075_s7 = sld [smem:[#allocation77_spill]] }
 0x279   : > { %v3928_v62 = vld [vmem:[%s7069_s10] sm:$0x3]  ;;  %s7076_s10 = sld [smem:[#allocation54_spill]] }
 0x27a   : > { %1853 = vperm.xlu1 %5174, %v1843_v15   ;;  %1848 = vperm.xlu0 %5173, %v1842_v16   ;;  %v1840_v0 = vld [vmem:[#allocation16 + $0x10] sm:$0xff] }
 0x27e   : > { %1863 = vperm.xlu1 %5174, %v1845_v17   ;;  %1858 = vperm.xlu0 %5173, %v1844_v18  }
 0x282   : > { %2088 = vperm.xlu1 %5174, %v2085_v19   ;;  %2004 = vperm.xlu0 %5173, %v2001_v20  }
 0x286   : > { %2192 = vperm.xlu1 %5174, %v2189_v21   ;;  %2185 = vperm.xlu0 %5173, %v2182_v22  }
 0x28a   : > { %2570 = vperm.xlu1 %5174, %v2463_v23   ;;  %2289 = vperm.xlu0 %5173, %v2200_v24  }
 0x28e   : > { %2580 = vperm.xlu1 %5174, %v2465_v25   ;;  %2575 = vperm.xlu0 %5173, %v2464_v26  }
 0x292   : > { %2638 = vperm.xlu1 %5174, %v2632_v27   ;;  %2585 = vperm.xlu0 %5173, %v2466_v28  }
 0x296   : > { %2648 = vperm.xlu1 %5174, %v2634_v29   ;;  %2643 = vperm.xlu0 %5173, %v2633_v30  }
 0x29a   : > { %2793 = vperm.xlu1 %5174, %v2790_v32   ;;  %2653 = vperm.xlu0 %5173, %v2635_v33  }
 0x29e   : > { %2456 = vperm.xlu1 %5174, %v2453_v34   ;;  %2449 = vperm.xlu0 %5173, %v2446_v35  }
 0x2a2   : > { %2971 = vperm.xlu1 %5174, %v2965_v36   ;;  %2873 = vperm.xlu0 %5173, %v2870_v37  }
 0x2a6   : > { %2999 = vperm.xlu1 %5174, %v2961_v38   ;;  %2976 = vperm.xlu0 %5173, %v2966_v39  }
 0x2aa   : > { %2981 = vperm.xlu1 %5174, %v2967_v40   ;;  %3004 = vperm.xlu0 %5173, %v2962_v41  }
 0x2ae   : > { %3009 = vperm.xlu1 %5174, %v2963_v42   ;;  %2986 = vperm.xlu0 %5173, %v2968_v43  }
 0x2b2   : > { %3172 = vperm.xlu1 %5174, %v3166_v44   ;;  %3014 = vperm.xlu0 %5173, %v2964_v45  }
 0x2b6   : > { %3182 = vperm.xlu1 %5174, %v3168_v46   ;;  %3177 = vperm.xlu0 %5173, %v3167_v47  }
 0x2ba   : > { %3628 = vperm.xlu1 %5174, %v3521_v48   ;;  %3187 = vperm.xlu0 %5173, %v3169_v49  }
 0x2be   : > { %3638 = vperm.xlu1 %5174, %v3523_v50   ;;  %3633 = vperm.xlu0 %5173, %v3522_v51  }
 0x2c2   : > { %3696 = vperm.xlu1 %5174, %v3690_v52   ;;  %3643 = vperm.xlu0 %5173, %v3524_v53  }
 0x2c6   : > { %3706 = vperm.xlu1 %5174, %v3692_v54   ;;  %3701 = vperm.xlu0 %5173, %v3691_v55  }
 0x2ca   : > { %3327 = vperm.xlu1 %5174, %v3324_v56   ;;  %3711 = vperm.xlu0 %5173, %v3693_v57  }
 0x2ce   : > { %3411 = vperm.xlu1 %5174, %v3408_v58   ;;  %3851 = vperm.xlu0 %5173, %v3848_v59  }
 0x2d2   : > { %3514 = vperm.xlu1 %5174, %v3511_v60   ;;  %3507 = vperm.xlu0 %5173, %v3504_v61  }
 0x2d6   : > { %3931 = vperm.xlu0 %5173, %v3928_v62  }
 0x2e5   : > { %v1753_v1 = vpop.permute.xlu1 %1752  ;;  %v1729_v2 = vpop.permute.xlu0 %1728 }
 0x2e6   : > { %v1731_v4 = vmul.f32 %v1729_v2, %v1723_v3  ;;  %v5978_v2 = vmov 0.0|0.0   ;;  %v5980_v3 = vmov 0.0  }
 0x2e7   : > { %4790 = vmatprep.subr.bf16.mxu1 %v5978_v2  ;;  %4605 = vmatprep.mubr.msk.f32.mxu1 %vm6960_vm1, %v5980_v3 }
 0x2e9   : > { %v1758_v7 = vpop.permute.xlu1 %1757  ;;  %v1736_v8 = vpop.permute.xlu0 %1735 }
 0x2ea   : > { %v6650_v9 = vadd.f32 %v1736_v8, %v1731_v4 }
 0x2ec   : > { %v1773_v10 = vrot.slane %v6650_v9, %v6648_v5 }
 0x2ed   : > { %v1786_v11 = vpop.permute.xlu1 %1785  ;;  %v1781_v12 = vpop.permute.xlu0 %1780 }
 0x2ee   : > { %v1775_v13 = vmul.f32 %v1773_v10, %v1758_v7  ;;  %v1774_v14 = vmul.f32 %v1773_v10, %v1753_v1  ;;  %v1841_v1 = vld [vmem:[#allocation16 + $0x18] sm:$0xff] }
 0x2f0   : > { %v1799_v15 = vadd.f32 %v1786_v11, %v1775_v13  ;;  %v1798_v16 = vadd.f32 %v1781_v12, %v1774_v14 }
 0x2f1   : > { %v1768_v17 = vpop.permute.xlu1 %1767  ;;  %v1763_v18 = vpop.permute.xlu0 %1762 }
 0x2f2   : > { %v1807_v19 = vmul.f32 0.044715, %v1799_v15  ;;  %v1806_v20 = vmul.f32 0.044715, %v1798_v16  ;;  %v1777_v23 = vmul.f32 %v1773_v10, %v1768_v17  ;;  %v1776_v24 = vmul.f32 %v1773_v10, %v1763_v18 }
 0x2f3   : > { %v1802_v47 = vmul.f32 0.5, %v1798_v16  ;;  %v1803_v49 = vmul.f32 0.5, %v1799_v15 }
 0x2f4   : > { %v1811_v21 = vmul.f32 %v1807_v19, %v1799_v15  ;;  %v1810_v22 = vmul.f32 %v1806_v20, %v1798_v16 }
 0x2f5   : > { %v1796_v25 = vpop.permute.xlu1 %1795  ;;  %v1791_v26 = vpop.permute.xlu0 %1790 }
 0x2f6   : > { %v1801_v27 = vadd.f32 %v1796_v25, %v1777_v23  ;;  %v1800_v28 = vadd.f32 %v1791_v26, %v1776_v24  ;;  %v1814_v29 = vmul.f32 %v1810_v22, %v1798_v16  ;;  %v1815_v30 = vmul.f32 %v1811_v21, %v1799_v15 }
 0x2f8   : > { %v1809_v31 = vmul.f32 0.044715, %v1801_v27  ;;  %v1808_v32 = vmul.f32 0.044715, %v1800_v28  ;;  %v1818_v33 = vadd.f32 %v1814_v29, %v1798_v16  ;;  %v1819_v34 = vadd.f32 %v1815_v30, %v1799_v15 }
 0x2f9   : > { %v1804_v56 = vmul.f32 0.5, %v1800_v28  ;;  %v1805_v58 = vmul.f32 0.5, %v1801_v27  ;;  %v1854_v4 = vpop.permute.xlu1 %1853  ;;  %v1849_v7 = vpop.permute.xlu0 %1848 }
 0x2fa   : > { %v1813_v35 = vmul.f32 %v1809_v31, %v1801_v27  ;;  %v1812_v36 = vmul.f32 %v1808_v32, %v1800_v28  ;;  %v1822_v37 = vmul.f32 0.7978846, %v1818_v33  ;;  %v1823_v38 = vmul.f32 0.7978846, %v1819_v34 }
 0x2fc   : > { %v1817_v39 = vmul.f32 %v1813_v35, %v1801_v27  ;;  %v1816_v40 = vmul.f32 %v1812_v36, %v1800_v28  ;;  %5175 = vtanh.f32 %v1822_v37 }
 0x2fd   : > { %5177 = vtanh.f32 %v1823_v38  ;;  %v1864_v14 = vpop.permute.xlu1 %1863  ;;  %v1859_v17 = vpop.permute.xlu0 %1858 }
 0x2fe   : > { %v1820_v41 = vadd.f32 %v1816_v40, %v1800_v28  ;;  %v1821_v42 = vadd.f32 %v1817_v39, %v1801_v27 }
 0x300   : > { %v1824_v43 = vmul.f32 0.7978846, %v1820_v41  ;;  %v1825_v44 = vmul.f32 0.7978846, %v1821_v42 }
 0x302   : > { %5179 = vtanh.f32 %v1824_v43 }
 0x303   : > { %5181 = vtanh.f32 %v1825_v44 }
 0x306   : > { %v5176_v45 = vpop.eup %5175 }
 0x307   : > { %v5178_v46 = vpop.eup %5177  ;;  %v1830_v48 = vadd.f32 1.0, %v5176_v45 }
 0x308   : > { %v1831_v50 = vadd.f32 1.0, %v5178_v46 }
 0x309   : > { %v1834_v51 = vmul.f32 %v1830_v48, %v1802_v47 }
 0x30a   : > { %v1835_v52 = vmul.f32 %v1831_v50, %v1803_v49 }
 0x30c   : > { %v5180_v53 = vpop.eup %5179  ;;  %v4782_v54 = vpack.c.bf16 %v1835_v52, %v1834_v51 }
 0x30d   : > { %v5182_v55 = vpop.eup %5181  ;;  %v1832_v57 = vadd.f32 1.0, %v5180_v53 }
 0x30e   : > { %4783 = vmatprep.subr.bf16.mxu0 %v4782_v54  ;;  %v1833_v59 = vadd.f32 1.0, %v5182_v55 }
 0x30f   : > { %4785 = vmatpush3.bf16.msra.mxu0 %v4782_v54  ;;  %v1836_v60 = vmul.f32 %v1832_v57, %v1804_v56  ;;  %v2000_v57 = vld [vmem:[#allocation17] sm:$0x1] }
 0x310   : > { %v1837_v61 = vmul.f32 %v1833_v59, %v1805_v58  ;;  %v2084_v58 = vld [vmem:[#allocation19] sm:$0x1]  ;;  %v2005_v59 = vpop.permute.xlu0 %2004 }
 0x312   : > { %v4786_v62 = vpack.c.bf16 %v1837_v61, %v1836_v60  ;;  %v2010_v60 = vrot.slane %v2005_v59, %v6648_v5  ;;  %v2338_v59 = vld [vmem:[#allocation26 + $0x8] sm:$0xff] }
 0x314   : > { %4787 = vmatprep.subr.bf16.mxu0 %v4786_v62 }
 0x315   : > { %4789 = vmatpush3.bf16.msra.mxu0 %v4786_v62 }
 0x316   : > { %4796 = vmatprep.subr.bf16.mxu0 %v5978_v2 }
 0x318   : > { %4592 = vmatmul.mubr.msk.f32.vlgmr.msra.gmra.mrb[0].mxu0 %vm1866_vm0, %v1839_v63 }
 0x319   : > { %4594 = vmatprep.mubr.msk.f32.mxu0 %vm1866_vm0, %v1840_v0 }
 0x31c   : > { %4595 = vmatmul.mubr.msk.f32.gmra.mrb[2].mxu0 %vm1866_vm0, %v1841_v1 }
 0x31d   : > { %4616 = vmatprep.mubr.msk.f32.mxu0 %vm6960_vm1, %v5980_v3 }
 0x3eb   : > { %v4593_v8 = vpop.f32.mrb[0].mxu0 }
 0x3ec   : > { %v1951_v10 = vadd.f32 %v4593_v8, %v1854_v4  ;;  %v1945_v11 = vpop.f32.mrb[1].mxu0 }
 0x3ed   : > { %v1946_v12 = vadd.f32 %v1945_v11, %v1849_v7  ;;  %v2089_v7 = vpop.permute.xlu1 %2088 }
 0x3ee   : > { %v1969_v13 = vmul.f32 0.044715, %v1951_v10  ;;  %v1965_v41 = vmul.f32 0.5, %v1951_v10  ;;  %v2094_v8 = vrot.slane %v2089_v7, %v6648_v5 }
 0x3ef   : > { %v1968_v15 = vmul.f32 0.044715, %v1946_v12  ;;  %v4596_v16 = vpop.f32.mrb[2].mxu0  ;;  %v1964_v43 = vmul.f32 0.5, %v1946_v12 }
 0x3f0   : > { %v1973_v18 = vmul.f32 %v1969_v13, %v1951_v10  ;;  %v1961_v19 = vadd.f32 %v4596_v16, %v1864_v14  ;;  %v1955_v20 = vpop.f32.mrb[3].mxu0  ;;  %v2186_v16 = vpop.permute.xlu0 %2185 }
 0x3f1   : > { %v1972_v21 = vmul.f32 %v1968_v15, %v1946_v12  ;;  %v1956_v22 = vadd.f32 %v1955_v20, %v1859_v17 }
 0x3f2   : > { %v1971_v23 = vmul.f32 0.044715, %v1961_v19  ;;  %v1977_v24 = vmul.f32 %v1973_v18, %v1951_v10  ;;  %v1967_v49 = vmul.f32 0.5, %v1961_v19 }
 0x3f3   : > { %v1970_v25 = vmul.f32 0.044715, %v1956_v22  ;;  %v1976_v26 = vmul.f32 %v1972_v21, %v1946_v12  ;;  %v1966_v52 = vmul.f32 0.5, %v1956_v22  ;;  %v2199_v21 = vld [vmem:[#allocation23] sm:$0xf] }
 0x3f4   : > { %v1975_v27 = vmul.f32 %v1971_v23, %v1961_v19  ;;  %v1981_v28 = vadd.f32 %v1977_v24, %v1951_v10 }
 0x3f5   : > { %v1974_v29 = vmul.f32 %v1970_v25, %v1956_v22  ;;  %v1980_v30 = vadd.f32 %v1976_v26, %v1946_v12 }
 0x3f6   : > { %v1979_v31 = vmul.f32 %v1975_v27, %v1961_v19  ;;  %v1985_v32 = vmul.f32 0.7978846, %v1981_v28 }
 0x3f7   : > { %v1978_v33 = vmul.f32 %v1974_v29, %v1956_v22  ;;  %v1984_v34 = vmul.f32 0.7978846, %v1980_v30  ;;  %v2290_v30 = vpop.permute.xlu0 %2289 }
 0x3f8   : > { %5183 = vtanh.f32 %v1985_v32  ;;  %v1983_v35 = vadd.f32 %v1979_v31, %v1961_v19  ;;  %v2193_v19 = vpop.permute.xlu1 %2192 }
 0x3f9   : > { %5185 = vtanh.f32 %v1984_v34  ;;  %v1982_v36 = vadd.f32 %v1978_v33, %v1956_v22  ;;  %v2337_v22 = vld [vmem:[#allocation26] sm:$0xff] }
 0x3fa   : > { %v1987_v37 = vmul.f32 0.7978846, %v1983_v35 }
 0x3fb   : > { %v1986_v38 = vmul.f32 0.7978846, %v1982_v36 }
 0x3fc   : > { %5187 = vtanh.f32 %v1987_v37 }
 0x3fd   : > { %5189 = vtanh.f32 %v1986_v38 }
 0x402   : > { %v5184_v39 = vpop.eup %5183 }
 0x403   : > { %v5186_v40 = vpop.eup %5185  ;;  %v1993_v42 = vadd.f32 1.0, %v5184_v39 }
 0x404   : > { %v1992_v44 = vadd.f32 1.0, %v5186_v40 }
 0x405   : > { %v1997_v45 = vmul.f32 %v1993_v42, %v1965_v41 }
 0x406   : > { %v5188_v46 = vpop.eup %5187  ;;  %v1996_v47 = vmul.f32 %v1992_v44, %v1964_v43 }
 0x407   : > { %v5190_v48 = vpop.eup %5189  ;;  %v1995_v50 = vadd.f32 1.0, %v5188_v46 }
 0x408   : > { %v4791_v51 = vpack.c.bf16 %v1997_v45, %v1996_v47  ;;  %v1994_v53 = vadd.f32 1.0, %v5190_v48 }
 0x409   : > { %v1999_v54 = vmul.f32 %v1995_v50, %v1967_v49 }
 0x40a   : > { %4792 = vmatpush3.bf16.msra.mxu1 %v4791_v51  ;;  %4798 = vmatpush3.bf16.msra.mxu0 %v4791_v51  ;;  %v1998_v55 = vmul.f32 %v1994_v53, %v1966_v52 }
 0x40b   : > { %4793 = vmatprep.subr.bf16.mxu1 %v5978_v2  ;;  %4799 = vmatprep.subr.bf16.mxu0 %v5978_v2 }
 0x40c   : > { %v4794_v56 = vpack.c.bf16 %v1999_v54, %v1998_v55 }
 0x40e   : > { %4795 = vmatpush3.bf16.msra.mxu1 %v4794_v56  ;;  %4801 = vmatpush3.bf16.msra.mxu0 %v4794_v56 }
 0x40f   : > { %4619 = vmatprep.subr.mxu1 %v5980_v3 }
 0x411   : > { %4606 = vmatmul.mubr.msk.f32.vlgmr.msra.gmra.mrb[0].mxu1 %vm1866_vm0, %v2000_v57  ;;  %4617 = vmatmul.mubr.msk.f32.vlgmr.msra.gmra.mrb[4].mxu0 %vm1866_vm0, %v2084_v58 }
 0x412   : > { %4621 = vmatprep.mubr.msk.f32.mxu1 %vm6960_vm1, %v5980_v3 }
 0x4e4   : > { %v2080_v61 = vpop.f32.mrb[0].mxu1  ;;  %v2164_v62 = vpop.f32.mrb[4].mxu0 }
 0x4e5   : > { %v6671_v63 = vadd.f32 %v2080_v61, %v2010_v60  ;;  %v4607_v0 = vpop.f32.mrb[1].mxu1  ;;  %v4618_v1 = vpop.f32.mrb[5].mxu0  ;;  %v2165_v10 = vadd.f32 %v2164_v62, %v2094_v8  ;;  %v2339_v60 = vld [vmem:[#allocation26 + $0x10] sm:$0xff]  ;;  %v2340_v61 = vld [vmem:[#allocation26 + $0x18] sm:$0xff]  ;;  %v2467_v62 = vld [vmem:[#allocation31] sm:$0xff] }
 0x4e6   : > { %4640 = vmatprep.mubr.msk.f32.mxu0 %vm1866_vm0, %v2467_v62 }
 0x4e7   : > { %v2168_v4 = vmul.f32 1.442695, %v6671_v63  ;;  %v2175_v14 = vrot.slane %v2165_v10, 7 }
 0x4e9   : > { %5191 = vpow2.f32 %v2168_v4 }
 0x4f3   : > { %v5192_v11 = vpop.eup %5191 }
 0x4f4   : > { %v2171_v12 = vrot.slane %v5192_v11, 7 }
 0x4f6   : > { %v2173_v13 = vmul.f32 %v2171_v12, %v6650_v9 }
 0x4f8   : > { %v2177_v15 = vadd.f32 %v2175_v14, %v2173_v13 }
 0x4fa   : > { %v2181_v17 = vsel %vm2180_vm2, %v6650_v9, %v2177_v15  ;;  %v2468_v15 = vld [vmem:[#allocation31 + $0x8] sm:$0xff] }
 0x4fb   : > { %v2188_v18 = vmul.f32 %v2186_v16, %v2181_v17  ;;  %v2469_v16 = vld [vmem:[#allocation31 + $0x10] sm:$0xff]  ;;  %v2470_v17 = vld [vmem:[#allocation31 + $0x18] sm:$0xff] }
 0x4fd   : > { %v6678_v20 = vadd.f32 %v2193_v19, %v2188_v18  ;;  %v2628_v18 = vld [vmem:[#allocation32] sm:$0xff]  ;;  %v2576_v19 = vpop.permute.xlu0 %2575 }
 0x4ff   : > { %4620 = vmatpush3.msk.msra.mxu1 %vm2205_vm3, %v6678_v20  ;;  %v2279_v23 = vmul.f32 %v6678_v20, %v6678_v20 }
 0x500   : > { %4622 = vmatmul.mubr.msk.f32.vlgmr.msra.gmra.mrb[2].mxu1 %vm2201_vm4, %v2199_v21  ;;  %v2571_v21 = vpop.permute.xlu1 %2570 }
 0x501   : > { %4626 = vmatprep.mubr.msk.f32.mxu1 %vm2341_vm5, %v2337_v22  ;;  %v2280_v9 = vsel %vm2205_vm3, %v2279_v23, 0.0 }
 0x502   : > { %v2281_v24 = vrot.slane %v2280_v9, 4 }
 0x504   : > { %v2282_v25 = vadd.f32 %v2281_v24, %v2280_v9 }
 0x506   : > { %v2283_v26 = vrot.slane %v2282_v25, 2 }
 0x508   : > { %v2284_v27 = vadd.f32 %v2283_v26, %v2282_v25  ;;  %v2586_v26 = vpop.permute.xlu0 %2585 }
 0x50a   : > { %v2285_v28 = vrot.slane %v2284_v27, 1 }
 0x50c   : > { %v2286_v29 = vadd.f32 %v2285_v28, %v2284_v27 }
 0x50e   : > { %v2292_v32 = vadd.f32 %v2290_v30, %v2286_v29  ;;  %v2581_v29 = vpop.permute.xlu1 %2580 }
 0x5d3   : > { %v2275_v31 = vpop.f32.mrb[2].mxu1 }
 0x5d4   : > { %v2293_v33 = vmul.f32 2.0, %v2275_v31  ;;  %v4623_v34 = vpop.f32.mrb[3].mxu1 }
 0x5d6   : > { %v2294_v35 = vsub.f32 %v2292_v32, %v2293_v33 }
 0x5d8   : > { %v2296_v36 = vsel %vm2295_vm6, %v2294_v35, inf }
 0x5d9   : > { %v2297_v37 = vrot.slane %v2296_v36, 4 }
 0x5db   : > { %v2298_v38 = vmin.f32 %v2296_v36, %v2297_v37 }
 0x5dd   : > { %v2299_v39 = vrot.slane %v2298_v38, 2 }
 0x5df   : > { %v2300_v40 = vmin.f32 %v2298_v38, %v2299_v39 }
 0x5e1   : > { %v2301_v41 = vrot.slane %v2300_v40, 1 }
 0x5e3   : > { %v2302_v42 = vmin.f32 %v2300_v40, %v2301_v41 }
 0x5e5   : > { %vm6687_vm7 = vcmp.le.f32.partialorder %v2294_v35, %v2302_v42 }
 0x5e6   : > { %v2304_v44 = vsel %vm6687_vm7, 1, %v5977_v6  ;;  %vm2306_vm9 = vmxor %vm6687_vm7, %vm5981_vm8  ;;  %v4434_v54 = vsel %vm6687_vm7, 1.0, %v5980_v3 }
 0x5e7   : > { %v2307_v45 = vsel %vm2306_vm9, 1, %v5977_v6  ;;  %v2313_v46 = vrot.slane %v2304_v44, 1  ;;  %v2323_v47 = vrot.slane %v2304_v44, 2 }
 0x5e8   : > { %v2308_v48 = vrot.slane %v2307_v45, 7 }
 0x5e9   : > { %vm2314_vm10 = vcmp.ne.s32.totalorder %v2313_v46, 0  ;;  %vm2324_vm13 = vcmp.ne.s32.totalorder %v2323_v47, 0 }
 0x5ea   : > { %vm2309_vm11 = vcmp.ne.s32.totalorder %v2308_v48, 0  ;;  %vm2315_vm12 = vmor %vm6687_vm7, %vm2314_vm10 }
 0x5eb   : > { %vm2310_vm14 = vmand %vm6687_vm7, %vm2309_vm11 }
 0x5ec   : > { %vm2316_vm15 = vmxor %vm2315_vm12, %vm5981_vm8  ;;  %v4435_v51 = vsel %vm2310_vm14, 1.0, %v5980_v3 }
 0x5ed   : > { %v2317_v49 = vsel %vm2316_vm15, 1, %v5977_v6  ;;  %vm2325_vm4 = vmor %vm2315_vm12, %vm2324_vm13  ;;  %v2333_v56 = vsel %vm2180_vm2, %v4434_v54, %v4435_v51  ;;  %vm2335_vm12 = vcmask 1042432  }
 0x5ee   : > { %v2318_v50 = vrot.slane %v2317_v49, 6  ;;  %vm2326_vm9 = vmxor %vm2325_vm4, %vm5981_vm8 }
 0x5ef   : > { %v2327_v52 = vsel %vm2326_vm9, 1, %v5977_v6 }
 0x5f0   : > { %vm2319_vm1 = vcmp.ne.s32.totalorder %v2318_v50, 0  ;;  %v2328_v53 = vrot.slane %v2327_v52, 5 }
 0x5f1   : > { %vm2320_vm10 = vmand %vm6687_vm7, %vm2319_vm1  ;;  %vm7072_vm1 = vmmov 0  }
 0x5f2   : > { %v4436_v55 = vsel %vm2320_vm10, 1.0, %v5980_v3  ;;  %vm2329_vm11 = vcmp.ne.s32.totalorder %v2328_v53, 0 }
 0x5f3   : > { %vm2330_vm8 = vmand %vm6687_vm7, %vm2329_vm11  ;;  %v2334_v6 = vsel %vm2205_vm3, %v2333_v56, %v4436_v55 }
 0x5f4   : > { %v4437_v57 = vsel %vm2330_vm8, 1.0, %v5980_v3 }
 0x5f5   : > { %v2336_v58 = vsel %vm2335_vm12, %v2334_v6, %v4437_v57 }
 0x5f6   : > { %4624 = vmatprep.subr.msk.mxu1 %vm2295_vm6, %v2336_v58 }
 0x5f7   : > { %4625 = vmatpush3.msk.msra.mxu1 %vm2295_vm6, %v2336_v58 }
 0x5f8   : > { %4627 = vmatmul.mubr.msk.f32.vlgmr.msra.gmra.mrb[4].mxu1 %vm2341_vm5, %v2338_v59 }
 0x5f9   : > { %4629 = vmatprep.mubr.msk.f32.mxu1 %vm2341_vm5, %v2339_v60 }
 0x5fc   : > { %4630 = vmatmul.mubr.msk.f32.gmra.mrb[6].mxu1 %vm2341_vm5, %v2340_v61 }
 0x5fd   : > { %4654 = vmatprep.mubr.msk.f32.mxu1 %vm1866_vm0, %v2628_v18 }
 0x6cb   : > { %v4628_v0 = vpop.f32.mrb[4].mxu1 }
 0x6cc   : > { %v2443_v1 = vmul.f32 0.17677669, %v4628_v0  ;;  %v2423_v4 = vpop.f32.mrb[5].mxu1 }
 0x6cd   : > { %v2442_v7 = vmul.f32 0.17677669, %v2423_v4 }
 0x6cf   : > { %v6724_v8 = vpack.c.bf16 %v2443_v1, %v2442_v7  ;;  %v4631_v10 = vpop.f32.mrb[6].mxu1 }
 0x6d0   : > { %v2445_v11 = vmul.f32 0.17677669, %v4631_v10  ;;  %v2433_v12 = vpop.f32.mrb[7].mxu1 }
 0x6d1   : > { %v2444_v13 = vmul.f32 0.17677669, %v2433_v12  ;;  %4803 = vmatprep.subr.bf16.mxu0 %v6724_v8  ;;  %v2630_v12 = vld [vmem:[#allocation32 + $0x10] sm:$0xff] }
 0x6d2   : > { %4805 = vmatpush3.bf16.msra.mxu0 %v6724_v8 }
 0x6d3   : > { %v6728_v14 = vpack.c.bf16 %v2445_v11, %v2444_v13  ;;  %v2629_v11 = vld [vmem:[#allocation32 + $0x8] sm:$0xff]  ;;  %v2631_v13 = vld [vmem:[#allocation32 + $0x18] sm:$0xff] }
 0x6d5   : > { %4807 = vmatprep.subr.bf16.mxu0 %v6728_v14 }
 0x6d6   : > { %4809 = vmatpush3.bf16.msra.mxu0 %v6728_v14 }
 0x6d7   : > { %4818 = vmatprep.subr.bf16.mxu0 %v5978_v2 }
 0x6d9   : > { %4641 = vmatmul.mubr.msk.f32.vlgmr.msra.gmra.mrb[6].mxu0 %vm1866_vm0, %v2468_v15  ;;  %v2644_v15 = vpop.permute.xlu0 %2643 }
 0x6da   : > { %4643 = vmatprep.mubr.msk.f32.mxu0 %vm1866_vm0, %v2469_v16  ;;  %v2639_v16 = vpop.permute.xlu1 %2638 }
 0x6dd   : > { %4644 = vmatmul.mubr.msk.f32.gmra.mrb[8].mxu0 %vm1866_vm0, %v2470_v17 }
 0x6de   : > { %4668 = vmatprep.mubr.msk.f32.mxu0 %vm7072_vm1, %v5980_v3 }
 0x7ac   : > { %v4642_v22 = vpop.f32.mrb[6].mxu0 }
 0x7ad   : > { %v2589_v23 = vadd.f32 %v4642_v22, %v2576_v19  ;;  %v2549_v9 = vpop.f32.mrb[7].mxu0 }
 0x7ae   : > { %v2588_v24 = vadd.f32 %v2571_v21, %v2549_v9 }
 0x7af   : > { %v2597_v25 = vmul.f32 0.044715, %v2589_v23  ;;  %v2593_v53 = vmul.f32 0.5, %v2589_v23 }
 0x7b0   : > { %v2596_v27 = vmul.f32 0.044715, %v2588_v24  ;;  %v4645_v28 = vpop.f32.mrb[8].mxu0  ;;  %v2592_v55 = vmul.f32 0.5, %v2588_v24 }
 0x7b1   : > { %v2601_v30 = vmul.f32 %v2597_v25, %v2589_v23  ;;  %v2591_v31 = vadd.f32 %v4645_v28, %v2586_v26  ;;  %v2559_v32 = vpop.f32.mrb[9].mxu0  ;;  %v2649_v25 = vpop.permute.xlu1 %2648 }
 0x7b2   : > { %v2600_v33 = vmul.f32 %v2596_v27, %v2588_v24  ;;  %v2590_v34 = vadd.f32 %v2581_v29, %v2559_v32 }
 0x7b3   : > { %v2605_v35 = vmul.f32 %v2601_v30, %v2589_v23  ;;  %v2599_v36 = vmul.f32 0.044715, %v2591_v31  ;;  %v2595_v60 = vmul.f32 0.5, %v2591_v31 }
 0x7b4   : > { %v2604_v37 = vmul.f32 %v2600_v33, %v2588_v24  ;;  %v2598_v38 = vmul.f32 0.044715, %v2590_v34  ;;  %v2594_v0 = vmul.f32 0.5, %v2590_v34 }
 0x7b5   : > { %v2603_v39 = vmul.f32 %v2599_v36, %v2591_v31  ;;  %v2609_v40 = vadd.f32 %v2605_v35, %v2589_v23  ;;  %v2654_v23 = vpop.permute.xlu0 %2653 }
 0x7b6   : > { %v2602_v41 = vmul.f32 %v2598_v38, %v2590_v34  ;;  %v2608_v42 = vadd.f32 %v2604_v37, %v2588_v24 }
 0x7b7   : > { %v2607_v43 = vmul.f32 %v2603_v39, %v2591_v31  ;;  %v2613_v44 = vmul.f32 0.7978846, %v2609_v40 }
 0x7b8   : > { %v2606_v45 = vmul.f32 %v2602_v41, %v2590_v34  ;;  %v2612_v46 = vmul.f32 0.7978846, %v2608_v42 }
 0x7b9   : > { %5193 = vtanh.f32 %v2613_v44  ;;  %v2611_v47 = vadd.f32 %v2607_v43, %v2591_v31 }
 0x7ba   : > { %5195 = vtanh.f32 %v2612_v46  ;;  %v2610_v48 = vadd.f32 %v2606_v45, %v2590_v34 }
 0x7bb   : > { %v2615_v49 = vmul.f32 0.7978846, %v2611_v47 }
 0x7bc   : > { %v2614_v50 = vmul.f32 0.7978846, %v2610_v48 }
 0x7bd   : > { %5197 = vtanh.f32 %v2615_v49 }
 0x7be   : > { %5199 = vtanh.f32 %v2614_v50 }
 0x7c3   : > { %v5194_v51 = vpop.eup %5193 }
 0x7c4   : > { %v5196_v52 = vpop.eup %5195  ;;  %v2621_v54 = vadd.f32 1.0, %v5194_v51 }
 0x7c5   : > { %v2620_v56 = vadd.f32 1.0, %v5196_v52 }
 0x7c6   : > { %v2625_v6 = vmul.f32 %v2621_v54, %v2593_v53 }
 0x7c7   : > { %v5198_v57 = vpop.eup %5197  ;;  %v2624_v58 = vmul.f32 %v2620_v56, %v2592_v55 }
 0x7c8   : > { %v5200_v59 = vpop.eup %5199  ;;  %v2623_v61 = vadd.f32 1.0, %v5198_v57 }
 0x7c9   : > { %v4810_v62 = vpack.c.bf16 %v2625_v6, %v2624_v58  ;;  %v2622_v1 = vadd.f32 1.0, %v5200_v59 }
 0x7ca   : > { %v2627_v4 = vmul.f32 %v2623_v61, %v2595_v60 }
 0x7cb   : > { %4811 = vmatprep.subr.bf16.mxu1 %v4810_v62  ;;  %v2626_v7 = vmul.f32 %v2622_v1, %v2594_v0  ;;  %v2789_v1 = vld [vmem:[%s7073_s8] sm:$0x3]  ;;  %s1721_s8 = scalar_select %p1720_p2, %s6247_s2, 1 }
 0x7cc   : > { %4813 = vmatpush3.bf16.msra.mxu1 %v4810_v62 }
 0x7cd   : > { %v4814_v10 = vpack.c.bf16 %v2627_v4, %v2626_v7  ;;  %v2869_v4 = vld [vmem:[%s7074_s9] sm:$0x3]  ;;  %s1722_s9 = scalar_lea.vmem %s7076_s10, %s1721_s8  ;;  %s7079_s10 = sld [smem:[#allocation83_spill]] }
 0x7ce   : > { %v3021_v7 = vld [vmem:[#allocation35] sm:$0xff]  ;;  %s7081_s8 = sld [smem:[#allocation87_spill]] }
 0x7cf   : > { %4815 = vmatprep.subr.bf16.mxu1 %v4814_v10 }
 0x7d0   : > { %4817 = vmatpush3.bf16.msra.mxu1 %v4814_v10  ;;  %v3022_v10 = vld [vmem:[#allocation35 + $0x8] sm:$0xff] }
 0x7d1   : > { %4824 = vmatprep.subr.bf16.mxu1 %v5978_v2 }
 0x7d3   : > { %4655 = vmatmul.mubr.msk.f32.vlgmr.msra.gmra.mrb[8].mxu1 %vm1866_vm0, %v2629_v11  ;;  %v3023_v11 = vld [vmem:[#allocation35 + $0x10] sm:$0xff] }
 0x7d4   : > { %4657 = vmatprep.mubr.msk.f32.mxu1 %vm1866_vm0, %v2630_v12  ;;  %v3024_v12 = vld [vmem:[#allocation35 + $0x18] sm:$0xff] }
 0x7d7   : > { %4658 = vmatmul.mubr.msk.f32.gmra.mrb[10].mxu1 %vm1866_vm0, %v2631_v13  ;;  %v3162_v13 = vld [vmem:[%s7075_s7] sm:$0xff] }
 0x7d8   : > { %4679 = vmatprep.mubr.msk.f32.mxu1 %vm7072_vm1, %v5980_v3 }
 0x8a6   : > { %v4656_v17 = vpop.f32.mrb[8].mxu1 }
 0x8a7   : > { %v2740_v18 = vadd.f32 %v4656_v17, %v2644_v15  ;;  %v2734_v19 = vpop.f32.mrb[9].mxu1  ;;  %v2794_v15 = vpop.permute.xlu1 %2793 }
 0x8a8   : > { %v2735_v21 = vadd.f32 %v2734_v19, %v2639_v16  ;;  %v2450_v16 = vpop.permute.xlu0 %2449  ;;  %v1724_v19 = vld [vmem:[%s1722_s9] sm:$0x1]  ;;  %s7082_s9 = sld [smem:[#allocation89_spill]] }
 0x8a9   : > { %v2758_v22 = vmul.f32 0.044715, %v2740_v18  ;;  %v2754_v49 = vmul.f32 0.5, %v2740_v18 }
 0x8aa   : > { %v2757_v9 = vmul.f32 0.044715, %v2735_v21  ;;  %v4659_v24 = vpop.f32.mrb[10].mxu1  ;;  %v2753_v51 = vmul.f32 0.5, %v2735_v21 }
 0x8ab   : > { %v2762_v26 = vmul.f32 %v2758_v22, %v2740_v18  ;;  %v2750_v27 = vadd.f32 %v4659_v24, %v2654_v23  ;;  %v2744_v28 = vpop.f32.mrb[11].mxu1  ;;  %v2457_v17 = vpop.permute.xlu1 %2456 }
 0x8ac   : > { %v2761_v29 = vmul.f32 %v2757_v9, %v2735_v21  ;;  %v2745_v30 = vadd.f32 %v2744_v28, %v2649_v25 }
 0x8ad   : > { %v2766_v31 = vmul.f32 %v2762_v26, %v2740_v18  ;;  %v2760_v32 = vmul.f32 0.044715, %v2750_v27  ;;  %v2756_v6 = vmul.f32 0.5, %v2750_v27 }
 0x8ae   : > { %v2765_v33 = vmul.f32 %v2761_v29, %v2735_v21  ;;  %v2759_v34 = vmul.f32 0.044715, %v2745_v30  ;;  %v2755_v59 = vmul.f32 0.5, %v2745_v30 }
 0x8af   : > { %v2770_v35 = vadd.f32 %v2766_v31, %v2740_v18  ;;  %v2764_v36 = vmul.f32 %v2760_v32, %v2750_v27  ;;  %v2874_v18 = vpop.permute.xlu0 %2873 }
 0x8b0   : > { %v2769_v37 = vadd.f32 %v2765_v33, %v2735_v21  ;;  %v2763_v38 = vmul.f32 %v2759_v34, %v2745_v30  ;;  %v1740_v21 = vstv %s1739_s28  ;;  %v2197_v34 = vstv %s4431_s3  ;;  %s7077_s3 = sld [smem:[#allocation79_spill]]  ;;  %s7080_s28 = sld [smem:[#allocation85_spill]] }
 0x8b1   : > { %v2774_v39 = vmul.f32 0.7978846, %v2770_v35  ;;  %v2768_v40 = vmul.f32 %v2764_v36, %v2750_v27  ;;  %v1741_v26 = vsub.f32 %v1724_v19, %v1740_v21 }
 0x8b2   : > { %v2773_v41 = vmul.f32 0.7978846, %v2769_v37  ;;  %v2767_v42 = vmul.f32 %v2763_v38, %v2745_v30 }
 0x8b3   : > { %5201 = vtanh.f32 %v2774_v39  ;;  %v2772_v43 = vadd.f32 %v2768_v40, %v2750_v27  ;;  %v2977_v31 = vpop.permute.xlu0 %2976  ;;  %v2179_v32 = vsub.f32 %v1741_v26, %v6671_v63  ;;  %v2452_v40 = vmul.f32 %v2450_v16, %v6678_v20 }
 0x8b4   : > { %5203 = vtanh.f32 %v2773_v41  ;;  %v2771_v44 = vadd.f32 %v2767_v42, %v2745_v30  ;;  %v2972_v30 = vpop.permute.xlu1 %2971 }
 0x8b5   : > { %v2776_v45 = vmul.f32 0.7978846, %v2772_v43  ;;  %v2198_v38 = vsub.f32 %v2179_v32, %v2197_v34  ;;  %v2461_v43 = vstv %s4443_s6  ;;  %s7078_s6 = sld [smem:[#allocation80_spill]] }
 0x8b6   : > { %v2775_v46 = vmul.f32 0.7978846, %v2771_v44 }
 0x8b7   : > { %5205 = vtanh.f32 %v2776_v45  ;;  %v3005_v42 = vpop.permute.xlu0 %3004 }
 0x8b8   : > { %5207 = vtanh.f32 %v2775_v46  ;;  %v3000_v41 = vpop.permute.xlu1 %2999 }
 0x8bd   : > { %v5202_v47 = vpop.eup %5201 }
 0x8be   : > { %v5204_v48 = vpop.eup %5203  ;;  %v2782_v50 = vadd.f32 1.0, %v5202_v47  ;;  %v2459_v47 = vadd.f32 %v2457_v17, %v2452_v40 }
 0x8bf   : > { %v2781_v52 = vadd.f32 1.0, %v5204_v48  ;;  %v6770_v48 = vsub.f32 %v2198_v38, %v2461_v43 }
 0x8c0   : > { %v2786_v53 = vmul.f32 %v2782_v50, %v2754_v49 }
 0x8c1   : > { %v5206_v54 = vpop.eup %5205  ;;  %v2785_v55 = vmul.f32 %v2781_v52, %v2753_v51 }
 0x8c2   : > { %v5208_v56 = vpop.eup %5207  ;;  %v2784_v57 = vadd.f32 1.0, %v5206_v54  ;;  %v2987_v54 = vpop.permute.xlu0 %2986 }
 0x8c3   : > { %v4819_v58 = vpack.c.bf16 %v2786_v53, %v2785_v55  ;;  %v2783_v60 = vadd.f32 1.0, %v5208_v56  ;;  %v2982_v53 = vpop.permute.xlu1 %2981 }
 0x8c4   : > { %v2788_v61 = vmul.f32 %v2784_v57, %v2756_v6 }
 0x8c5   : > { %4820 = vmatpush3.bf16.msra.mxu0 %v4819_v58  ;;  %4826 = vmatpush3.bf16.msra.mxu1 %v4819_v58  ;;  %v2787_v62 = vmul.f32 %v2783_v60, %v2755_v59 }
 0x8c6   : > { %4821 = vmatprep.subr.bf16.mxu0 %v5978_v2  ;;  %4827 = vmatprep.subr.bf16.mxu1 %v5978_v2  ;;  %v3015_v60 = vpop.permute.xlu0 %3014 }
 0x8c7   : > { %v4822_v0 = vpack.c.bf16 %v2788_v61, %v2787_v62  ;;  %v3010_v59 = vpop.permute.xlu1 %3009 }
 0x8c9   : > { %4823 = vmatpush3.bf16.msra.mxu0 %v4822_v0  ;;  %4829 = vmatpush3.bf16.msra.mxu1 %v4822_v0 }
 0x8ca   : > { %4831 = vmatprep.subr.bf16.mxu0 %v6724_v8 }
 0x8cc   : > { %4669 = vmatmul.mubr.msk.f32.vlgmr.msra.gmra.mrb[10].mxu0 %vm1866_vm0, %v2789_v1  ;;  %4680 = vmatmul.mubr.msk.f32.vlgmr.msra.gmra.mrb[12].mxu1 %vm1866_vm0, %v2869_v4 }
 0x8cd   : > { %4833 = vmatpush3.bf16.msra.mxu0 %v6724_v8  ;;  %4690 = vmatprep.mubr.msk.f32.mxu0 %vm1866_vm0, %v3021_v7 }
 0x8ce   : > { %4835 = vmatprep.subr.bf16.mxu0 %v6728_v14  ;;  %4704 = vmatprep.mubr.msk.f32.mxu1 %vm1866_vm0, %v3162_v13 }
 0x8d1   : > { %4837 = vmatpush3.bf16.msra.mxu0 %v6728_v14 }
 0x8d2   : > { %4846 = vmatprep.subr.bf16.mxu0 %v5978_v2 }
 0x8d4   : > { %4691 = vmatmul.mubr.msk.f32.vlgmr.msra.gmra.mrb[12].mxu0 %vm1866_vm0, %v3022_v10 }
 0x8d5   : > { %4693 = vmatprep.mubr.msk.f32.mxu0 %vm1866_vm0, %v3023_v11 }
 0x8d8   : > { %4694 = vmatmul.mubr.msk.f32.gmra.mrb[14].mxu0 %vm1866_vm0, %v3024_v12 }
 0x8d9   : > { %4718 = vmatprep.mubr.msk.f32.mxu0 %vm7072_vm1, %v5980_v3 }
 0x99f   : > { %v2865_v22 = vpop.f32.mrb[10].mxu0  ;;  %v2945_v23 = vpop.f32.mrb[12].mxu1 }
 0x9a0   : > { %v2866_v9 = vadd.f32 %v2865_v22, %v2794_v15  ;;  %v4670_v24 = vpop.f32.mrb[11].mxu0  ;;  %v4681_v25 = vpop.f32.mrb[13].mxu1  ;;  %v2946_v50 = vadd.f32 %v2945_v23, %v2874_v18 }
 0x9a2   : > { %v2949_v27 = vmul.f32 1.442695, %v2866_v9  ;;  %v2953_v28 = vsel %vm2205_vm3, %v2866_v9, 0.0 }
 0x9a3   : > { %v2954_v29 = vrot.slane %v2953_v28, 4 }
 0x9a4   : > { %5209 = vpow2.f32 %v2949_v27 }
 0x9a5   : > { %v2955_v33 = vadd.f32 %v2954_v29, %v2953_v28 }
 0x9a7   : > { %v2956_v35 = vrot.slane %v2955_v33, 2  ;;  %v4692_v36 = vpop.f32.mrb[12].mxu0 }
 0x9a8   : > { %v3103_v37 = vpop.f32.mrb[13].mxu0 }
 0x9a9   : > { %v2957_v39 = vadd.f32 %v2956_v35, %v2955_v33 }
 0x9ab   : > { %v2958_v44 = vrot.slane %v2957_v39, 1  ;;  %v4695_v45 = vpop.f32.mrb[14].mxu0 }
 0x9ac   : > { %v3113_v46 = vpop.f32.mrb[15].mxu0 }
 0x9ad   : > { %v6772_v49 = vadd.f32 %v2958_v44, %v2957_v39 }
 0x9ae   : > { %v5210_v63 = vpop.eup %5209 }
 0x9af   : > { %v2951_v51 = vmul.f32 %v5210_v63, %v2459_v47  ;;  %v2960_v52 = vsub.f32 %v6770_v48, %v6772_v49 }
 0x9b1   : > { %v6776_v20 = vadd.f32 %v2951_v51, %v2946_v50 }
 0x9b3   : > { %v2992_v55 = vrot.slane %v6776_v20, %v6648_v5 }
 0x9b5   : > { %v2994_v56 = vmul.f32 %v2992_v55, %v2977_v31  ;;  %v2993_v6 = vmul.f32 %v2992_v55, %v2972_v30  ;;  %v2996_v57 = vmul.f32 %v2992_v55, %v2987_v54  ;;  %v2995_v58 = vmul.f32 %v2992_v55, %v2982_v53  ;;  %v3163_v53 = vld [vmem:[%s7075_s7 + $0x8] sm:$0xff]  ;;  %v3164_v54 = vld [vmem:[%s7075_s7 + $0x10] sm:$0xff]  ;;  %v3165_v55 = vld [vmem:[%s7075_s7 + $0x18] sm:$0xff]  ;;  %s4476_s7 = sshll.u32 %s6247_s2, 5 }
 0x9b7   : > { %v3018_v61 = vadd.f32 %v3005_v42, %v2994_v56  ;;  %v3017_v62 = vadd.f32 %v3000_v41, %v2993_v6  ;;  %v3020_v0 = vadd.f32 %v3015_v60, %v2996_v57  ;;  %v3019_v1 = vadd.f32 %v3010_v59, %v2995_v58  ;;  %v3178_v56 = vpop.permute.xlu0 %3177  ;;  %v3173_v6 = vpop.permute.xlu1 %3172 }
 0x9b9   : > { %v3123_v4 = vadd.f32 %v4692_v36, %v3018_v61  ;;  %v3122_v7 = vadd.f32 %v3103_v37, %v3017_v62  ;;  %v3125_v10 = vadd.f32 %v4695_v45, %v3020_v0  ;;  %v3124_v11 = vadd.f32 %v3113_v46, %v3019_v1 }
 0x9bb   : > { %v3131_v12 = vmul.f32 0.044715, %v3123_v4  ;;  %v3130_v13 = vmul.f32 0.044715, %v3122_v7  ;;  %v3133_v15 = vmul.f32 0.044715, %v3125_v10  ;;  %v3188_v62 = vpop.permute.xlu0 %3187 }
 0x9bc   : > { %v3132_v16 = vmul.f32 0.044715, %v3124_v11  ;;  %v3126_v35 = vmul.f32 0.5, %v3122_v7  ;;  %v3127_v38 = vmul.f32 0.5, %v3123_v4  ;;  %v3128_v42 = vmul.f32 0.5, %v3124_v11 }
 0x9bd   : > { %v3135_v17 = vmul.f32 %v3131_v12, %v3123_v4  ;;  %v3134_v18 = vmul.f32 %v3130_v13, %v3122_v7  ;;  %v3137_v19 = vmul.f32 %v3133_v15, %v3125_v10  ;;  %v3129_v45 = vmul.f32 0.5, %v3125_v10 }
 0x9be   : > { %v3136_v21 = vmul.f32 %v3132_v16, %v3124_v11 }
 0x9bf   : > { %v3139_v22 = vmul.f32 %v3135_v17, %v3123_v4  ;;  %v3138_v23 = vmul.f32 %v3134_v18, %v3122_v7  ;;  %v3141_v9 = vmul.f32 %v3137_v19, %v3125_v10 }
 0x9c0   : > { %v3140_v24 = vmul.f32 %v3136_v21, %v3124_v11 }
 0x9c1   : > { %v3142_v25 = vadd.f32 %v3138_v23, %v3122_v7  ;;  %v3143_v26 = vadd.f32 %v3139_v22, %v3123_v4  ;;  %v3145_v27 = vadd.f32 %v3141_v9, %v3125_v10  ;;  %v3183_v4 = vpop.permute.xlu1 %3182 }
 0x9c2   : > { %v3144_v28 = vadd.f32 %v3140_v24, %v3124_v11 }
 0x9c3   : > { %v3146_v29 = vmul.f32 0.7978846, %v3142_v25  ;;  %v3147_v30 = vmul.f32 0.7978846, %v3143_v26  ;;  %v3149_v32 = vmul.f32 0.7978846, %v3145_v27 }
 0x9c4   : > { %v3148_v31 = vmul.f32 0.7978846, %v3144_v28 }
 0x9c5   : > { %5211 = vtanh.f32 %v3146_v29 }
 0x9c6   : > { %5213 = vtanh.f32 %v3147_v30 }
 0x9c7   : > { %5215 = vtanh.f32 %v3148_v31 }
 0x9c8   : > { %5217 = vtanh.f32 %v3149_v32 }
 0x9cf   : > { %v5212_v33 = vpop.eup %5211 }
 0x9d0   : > { %v5214_v34 = vpop.eup %5213  ;;  %v3154_v36 = vadd.f32 1.0, %v5212_v33 }
 0x9d1   : > { %v5216_v37 = vpop.eup %5215  ;;  %v3155_v39 = vadd.f32 1.0, %v5214_v34 }
 0x9d2   : > { %v5218_v40 = vpop.eup %5217  ;;  %v3158_v41 = vmul.f32 %v3154_v36, %v3126_v35  ;;  %v3156_v43 = vadd.f32 1.0, %v5216_v37 }
 0x9d3   : > { %v3159_v44 = vmul.f32 %v3155_v39, %v3127_v38  ;;  %v3157_v46 = vadd.f32 1.0, %v5218_v40 }
 0x9d4   : > { %v3160_v47 = vmul.f32 %v3156_v43, %v3128_v42 }
 0x9d5   : > { %v4838_v63 = vpack.c.bf16 %v3159_v44, %v3158_v41  ;;  %v3161_v50 = vmul.f32 %v3157_v46, %v3129_v45 }
 0x9d7   : > { %4839 = vmatprep.subr.bf16.mxu1 %v4838_v63  ;;  %v4842_v51 = vpack.c.bf16 %v3161_v50, %v3160_v47  ;;  %v3323_v50 = vld [vmem:[%s7077_s3] sm:$0x1]  ;;  %s4464_s3 = sld [smem:[#allocation10 + $0x3]] }
 0x9d8   : > { %4841 = vmatpush3.bf16.msra.mxu1 %v4838_v63 }
 0x9d9   : > { %4843 = vmatprep.subr.bf16.mxu1 %v4842_v51 }
 0x9dc   : > { %4845 = vmatpush3.bf16.msra.mxu1 %v4842_v51  ;;  %v3407_v51 = vld [vmem:[%s7078_s6] sm:$0x1]  ;;  %s4477_s6 = sshll.u32 %s6247_s2, 4  ;;  %s6862_s2 = scalar_lea.hbm %s6210_s1, %s4476_s7 }
 0x9dd   : > { %4852 = vmatprep.subr.bf16.mxu1 %v5978_v2  ;;  %s6857_s12 = scalar_lea.hbm %s6215_s4, %s4477_s6  ;;  %s5772_s6 = sshll.u32 %s5982_s15, 4  ;;  %s5773_s6 = int_to_ptr.vmem [resolvable:$false] %s5772_s6 }
 0x9de   : > { %s5774_s21 = scalar_lea.vmem %s5773_s6, 32 }
 0x9df   : > { %4705 = vmatmul.mubr.msk.f32.vlgmr.msra.gmra.mrb[14].mxu1 %vm1866_vm0, %v3163_v53  ;;  %v3525_v53 = vld [vmem:[%s7079_s10] sm:$0xff] }
 0x9e0   : > { %4707 = vmatprep.mubr.msk.f32.mxu1 %vm1866_vm0, %v3164_v54  ;;  %v3526_v54 = vld [vmem:[%s7079_s10 + $0x8] sm:$0xff] }
 0x9e3   : > { %4708 = vmatmul.mubr.msk.f32.gmra.mrb[16].mxu1 %vm1866_vm0, %v3165_v55  ;;  %v3527_v55 = vld [vmem:[%s7079_s10 + $0x10] sm:$0xff] }
 0x9e4   : > { %4729 = vmatprep.mubr.msk.f32.mxu1 %vm7072_vm1, %v5980_v3 }
 0xab2   : > { %v4706_v57 = vpop.f32.mrb[14].mxu1 }
 0xab3   : > { %v3274_v58 = vadd.f32 %v4706_v57, %v3178_v56  ;;  %v3268_v59 = vpop.f32.mrb[15].mxu1  ;;  %v3528_v56 = vld [vmem:[%s7079_s10 + $0x18] sm:$0xff]  ;;  %s7083_s10 = sshll.u32 %s6554_s17, 1 }
 0xab4   : > { %v3269_v60 = vadd.f32 %v3268_v59, %v3173_v6  ;;  %v3629_v6 = vpop.permute.xlu1 %3628  ;;  %s6853_s11 = scalar_lea.vmem [#allocation37], %s7083_s10  ;;  %s4027_s10 = scalar_lea.sflag [#allocation39], %s6554_s17 }
 0xab5   : > { %v3292_v61 = vmul.f32 0.044715, %v3274_v58  ;;  %v3288_v33 = vmul.f32 0.5, %v3274_v58 }
 0xab6   : > { %v3291_v0 = vmul.f32 0.044715, %v3269_v60  ;;  %v4709_v1 = vpop.f32.mrb[16].mxu1  ;;  %v3287_v35 = vmul.f32 0.5, %v3269_v60 }
 0xab7   : > { %v3296_v7 = vmul.f32 %v3292_v61, %v3274_v58  ;;  %v3284_v10 = vadd.f32 %v4709_v1, %v3188_v62  ;;  %v3278_v11 = vpop.f32.mrb[17].mxu1 }
 0xab8   : > { %v3295_v12 = vmul.f32 %v3291_v0, %v3269_v60  ;;  %v3279_v13 = vadd.f32 %v3278_v11, %v3183_v4  ;;  %v3639_v57 = vpop.permute.xlu1 %3638  ;;  %v3634_v11 = vpop.permute.xlu0 %3633 }
 0xab9   : > { %v3300_v15 = vmul.f32 %v3296_v7, %v3274_v58  ;;  %v3294_v16 = vmul.f32 0.044715, %v3284_v10  ;;  %v3290_v41 = vmul.f32 0.5, %v3284_v10 }
 0xaba   : > { %v3299_v17 = vmul.f32 %v3295_v12, %v3269_v60  ;;  %v3293_v18 = vmul.f32 0.044715, %v3279_v13  ;;  %v3289_v44 = vmul.f32 0.5, %v3279_v13 }
 0xabb   : > { %v3304_v19 = vadd.f32 %v3300_v15, %v3274_v58  ;;  %v3298_v21 = vmul.f32 %v3294_v16, %v3284_v10 }
 0xabc   : > { %v3303_v22 = vadd.f32 %v3299_v17, %v3269_v60  ;;  %v3297_v23 = vmul.f32 %v3293_v18, %v3279_v13 }
 0xabd   : > { %v3308_v9 = vmul.f32 0.7978846, %v3304_v19  ;;  %v3302_v24 = vmul.f32 %v3298_v21, %v3284_v10  ;;  %v3644_v19 = vpop.permute.xlu0 %3643 }
 0xabe   : > { %v3307_v25 = vmul.f32 0.7978846, %v3303_v22  ;;  %v3301_v26 = vmul.f32 %v3297_v23, %v3279_v13 }
 0xabf   : > { %5219 = vtanh.f32 %v3308_v9  ;;  %v3306_v27 = vadd.f32 %v3302_v24, %v3284_v10 }
 0xac0   : > { %5221 = vtanh.f32 %v3307_v25  ;;  %v3305_v28 = vadd.f32 %v3301_v26, %v3279_v13 }
 0xac1   : > { %v3310_v29 = vmul.f32 0.7978846, %v3306_v27 }
 0xac2   : > { %v3309_v30 = vmul.f32 0.7978846, %v3305_v28 }
 0xac3   : > { %5223 = vtanh.f32 %v3310_v29 }
 0xac4   : > { %5225 = vtanh.f32 %v3309_v30 }
 0xac9   : > { %v5220_v31 = vpop.eup %5219 }
 0xaca   : > { %v5222_v32 = vpop.eup %5221  ;;  %v3316_v34 = vadd.f32 1.0, %v5220_v31 }
 0xacb   : > { %v3315_v36 = vadd.f32 1.0, %v5222_v32 }
 0xacc   : > { %v3320_v37 = vmul.f32 %v3316_v34, %v3288_v33 }
 0xacd   : > { %v5224_v38 = vpop.eup %5223  ;;  %v3319_v39 = vmul.f32 %v3315_v36, %v3287_v35 }
 0xace   : > { %v5226_v40 = vpop.eup %5225  ;;  %v3318_v42 = vadd.f32 1.0, %v5224_v38 }
 0xacf   : > { %v4847_v43 = vpack.c.bf16 %v3320_v37, %v3319_v39  ;;  %v3317_v45 = vadd.f32 1.0, %v5226_v40 }
 0xad0   : > { %v3322_v46 = vmul.f32 %v3318_v42, %v3290_v41 }
 0xad1   : > { %4848 = vmatpush3.bf16.msra.mxu0 %v4847_v43  ;;  %4854 = vmatpush3.bf16.msra.mxu1 %v4847_v43  ;;  %v3321_v47 = vmul.f32 %v3317_v45, %v3289_v44 }
 0xad2   : > { %4849 = vmatprep.subr.bf16.mxu0 %v5978_v2  ;;  %4855 = vmatprep.subr.bf16.mxu1 %v5978_v2 }
 0xad3   : > { %v4850_v63 = vpack.c.bf16 %v3322_v46, %v3321_v47 }
 0xad5   : > { %4851 = vmatpush3.bf16.msra.mxu0 %v4850_v63  ;;  %4857 = vmatpush3.bf16.msra.mxu1 %v4850_v63 }
 0xad6   : > { %4859 = vmatprep.subr.bf16.mxu0 %v6724_v8 }
 0xad8   : > { %4719 = vmatmul.mubr.msk.f32.vlgmr.msra.gmra.mrb[16].mxu0 %vm1866_vm0, %v3323_v50  ;;  %4730 = vmatmul.mubr.msk.f32.vlgmr.msra.gmra.mrb[18].mxu1 %vm1866_vm0, %v3407_v51 }
 0xad9   : > { %4861 = vmatpush3.bf16.msra.mxu0 %v6724_v8  ;;  %4740 = vmatprep.mubr.msk.f32.mxu0 %vm1866_vm0, %v3525_v53  ;;  %v3686_v8 = vld [vmem:[%s7080_s28] sm:$0xff] }
 0xada   : > { %4863 = vmatprep.subr.bf16.mxu0 %v6728_v14  ;;  %4754 = vmatprep.mubr.msk.f32.mxu1 %vm1866_vm0, %v3686_v8 }
 0xadd   : > { %4865 = vmatpush3.bf16.msra.mxu0 %v6728_v14  ;;  %v6812_v14 = vpop.permute.xlu1 %3696 }
 0xade   : > { %4874 = vmatprep.subr.bf16.mxu0 %v5978_v2 }
 0xae0   : > { %4741 = vmatmul.mubr.msk.f32.vlgmr.msra.gmra.mrb[18].mxu0 %vm1866_vm0, %v3526_v54 }
 0xae1   : > { %4743 = vmatprep.mubr.msk.f32.mxu0 %vm1866_vm0, %v3527_v55  ;;  %v6814_v58 = vpop.permute.xlu1 %3706 }
 0xae4   : > { %4744 = vmatmul.mubr.msk.f32.gmra.mrb[20].mxu0 %vm1866_vm0, %v3528_v56 }
 0xae5   : > { %4768 = vmatprep.mubr.msk.f32.mxu0 %vm7072_vm1, %v5980_v3  ;;  %v3328_v59 = vpop.permute.xlu1 %3327 }
 0xae6   : > { %v3333_v60 = vrot.slane %v3328_v59, %v6648_v5 }
 0xae9   : > { %v3412_v13 = vpop.permute.xlu1 %3411 }
 0xaea   : > { %v3417_v21 = vrot.slane %v3412_v13, %v6648_v5 }
 0xbab   : > { %v3403_v61 = vpop.f32.mrb[16].mxu0  ;;  %v3487_v62 = vpop.f32.mrb[18].mxu1 }
 0xbac   : > { %v3404_v0 = vadd.f32 %v3403_v61, %v3333_v60  ;;  %v4720_v1 = vpop.f32.mrb[17].mxu0  ;;  %v4731_v4 = vpop.f32.mrb[19].mxu1  ;;  %v3488_v26 = vadd.f32 %v3487_v62, %v3417_v21 }
 0xbad   : > { %v3687_v4 = vld [vmem:[%s7080_s28 + $0x8] sm:$0xff] }
 0xbae   : > { %v3491_v7 = vmul.f32 1.442695, %v3404_v0  ;;  %v6820_v10 = vsub.f32 %v2960_v52, %v3404_v0  ;;  %v3498_v35 = vrot.slane %v3488_v26, 7 }
 0xbb0   : > { %5227 = vpow2.f32 %v3491_v7  ;;  %v3688_v7 = vld [vmem:[%s7080_s28 + $0x10] sm:$0xff] }
 0xbb3   : > { %v4742_v12 = vpop.f32.mrb[18].mxu0 }
 0xbb4   : > { %v3647_v15 = vadd.f32 %v4742_v12, %v3634_v11  ;;  %v3607_v16 = vpop.f32.mrb[19].mxu0  ;;  %v3689_v11 = vld [vmem:[%s7080_s28 + $0x18] sm:$0xff]  ;;  %v3702_v12 = vpop.permute.xlu0 %3701 }
 0xbb5   : > { %v3646_v17 = vadd.f32 %v3629_v6, %v3607_v16 }
 0xbb6   : > { %v3655_v18 = vmul.f32 0.044715, %v3647_v15  ;;  %v3651_v63 = vmul.f32 0.5, %v3647_v15 }
 0xbb7   : > { %v3654_v22 = vmul.f32 0.044715, %v3646_v17  ;;  %v4745_v23 = vpop.f32.mrb[20].mxu0  ;;  %v3650_v51 = vmul.f32 0.5, %v3646_v17 }
 0xbb8   : > { %v3659_v9 = vmul.f32 %v3655_v18, %v3647_v15  ;;  %v3649_v24 = vadd.f32 %v4745_v23, %v3644_v19  ;;  %v3617_v25 = vpop.f32.mrb[21].mxu0  ;;  %v3712_v19 = vpop.permute.xlu0 %3711 }
 0xbb9   : > { %v3658_v48 = vmul.f32 %v3654_v22, %v3646_v17  ;;  %v3648_v49 = vadd.f32 %v3639_v57, %v3617_v25 }
 0xbba   : > { %v5228_v52 = vpop.eup %5227  ;;  %v3663_v27 = vmul.f32 %v3659_v9, %v3647_v15  ;;  %v3657_v28 = vmul.f32 0.044715, %v3649_v24  ;;  %v3653_v6 = vmul.f32 0.5, %v3649_v24 }
 0xbbb   : > { %v3494_v29 = vrot.slane %v5228_v52, 7  ;;  %v3662_v30 = vmul.f32 %v3658_v48, %v3646_v17  ;;  %v3656_v31 = vmul.f32 0.044715, %v3648_v49  ;;  %v3652_v60 = vmul.f32 0.5, %v3648_v49 }
 0xbbc   : > { %v3661_v32 = vmul.f32 %v3657_v28, %v3649_v24  ;;  %v3667_v33 = vadd.f32 %v3663_v27, %v3647_v15 }
 0xbbd   : > { %v3496_v34 = vmul.f32 %v3494_v29, %v6776_v20  ;;  %v3660_v5 = vmul.f32 %v3656_v31, %v3648_v49  ;;  %v3666_v36 = vadd.f32 %v3662_v30, %v3646_v17 }
 0xbbe   : > { %v3665_v37 = vmul.f32 %v3661_v32, %v3649_v24  ;;  %v3671_v38 = vmul.f32 0.7978846, %v3667_v33 }
 0xbbf   : > { %v6824_v39 = vadd.f32 %v3498_v35, %v3496_v34  ;;  %v3664_v40 = vmul.f32 %v3660_v5, %v3648_v49  ;;  %v3670_v41 = vmul.f32 0.7978846, %v3666_v36 }
 0xbc0   : > { %5229 = vtanh.f32 %v3671_v38  ;;  %v3669_v42 = vadd.f32 %v3665_v37, %v3649_v24 }
 0xbc1   : > { %5231 = vtanh.f32 %v3670_v41  ;;  %v3668_v43 = vadd.f32 %v3664_v40, %v3648_v49 }
 0xbc2   : > { %v3673_v44 = vmul.f32 0.7978846, %v3669_v42 }
 0xbc3   : > { %v3672_v45 = vmul.f32 0.7978846, %v3668_v43 }
 0xbc4   : > { %5233 = vtanh.f32 %v3673_v44 }
 0xbc5   : > { %5235 = vtanh.f32 %v3672_v45 }
 0xbca   : > { %v5230_v46 = vpop.eup %5229 }
 0xbcb   : > { %v5232_v47 = vpop.eup %5231  ;;  %v3679_v50 = vadd.f32 1.0, %v5230_v46 }
 0xbcc   : > { %v3678_v53 = vadd.f32 1.0, %v5232_v47 }
 0xbcd   : > { %v3683_v54 = vmul.f32 %v3679_v50, %v3651_v63 }
 0xbce   : > { %v5234_v55 = vpop.eup %5233  ;;  %v3682_v56 = vmul.f32 %v3678_v53, %v3650_v51 }
 0xbcf   : > { %v5236_v8 = vpop.eup %5235  ;;  %v3681_v57 = vadd.f32 1.0, %v5234_v55 }
 0xbd0   : > { %v4866_v59 = vpack.c.bf16 %v3683_v54, %v3682_v56  ;;  %v3680_v61 = vadd.f32 1.0, %v5236_v8  ;;  %v3847_v8 = vld [vmem:[%s7081_s8] sm:$0x3]  ;;  %s1719_s8 = scalar_lea.vmem [#allocation38], %s6554_s17 }
 0xbd1   : > { %v3685_v62 = vmul.f32 %v3681_v57, %v3653_v6  ;;  %v3927_v6 = vld [vmem:[%s7082_s9] sm:$0x3]  ;;  %v3852_v57 = vpop.permute.xlu0 %3851  ;;  %s4052_s9 = sshll.u32 %s1719_s8, 4  ;;  %s6859_s9 = int_to_ptr.vmem [resolvable:$true] %s4052_s9 }
 0xbd2   : > { %4867 = vmatprep.subr.bf16.mxu1 %v4866_v59  ;;  %v3684_v0 = vmul.f32 %v3680_v61, %v3652_v60  ;;  %s5768_s14 = scalar_lea.vmem %s6859_s9, 16  ;;  %p5775_p5 = scmp.lt.s32.totalorder %s6859_s9, %s5773_s6 }
 0xbd3   : > { %4869 = vmatpush3.bf16.msra.mxu1 %v4866_v59  ;;  %p5769_p10 = scmp.ne.s32.totalorder %s6859_s9, %s5768_s14  ;;  %p5776_p13 = scmp.lt.s32.totalorder %s5774_s21, %s5768_s14 }
 0xbd4   : > { %v4870_v1 = vpack.c.bf16 %v3685_v62, %v3684_v0 }
 0xbd5   : > { %p5770_p4 = pnand %p5769_p10, %p7084_p3  ;;  %p5777_p6 = por %p5776_p13, %p5775_p5 }
 0xbd6   : > { %4871 = vmatprep.subr.bf16.mxu1 %v4870_v1 }
 0xbd7   : > { %4873 = vmatpush3.bf16.msra.mxu1 %v4870_v1  ;;  %p5771_p0 = pneg %p5770_p4 }
 0xbd8   : > { %4880 = vmatprep.subr.bf16.mxu1 %v5978_v2 }
 0xbd9   : > { %p5778_p11 = pnand %p5777_p6, %p5771_p0 }
 0xbda   : > { %4755 = vmatmul.mubr.msk.f32.vlgmr.msra.gmra.mrb[20].mxu1 %vm1866_vm0, %v3687_v4 }
 0xbdb   : > { %4757 = vmatprep.mubr.msk.f32.mxu1 %vm1866_vm0, %v3688_v7 }
 0xbde   : > { %4758 = vmatmul.mubr.msk.f32.gmra.mrb[22].mxu1 %vm1866_vm0, %v3689_v11  ;;  %v3503_v11 = vsel %vm2180_vm2, %v6776_v20, %v6824_v39 }
 0xbdf   : > { %4779 = vmatprep.mubr.msk.f32.mxu1 %vm7072_vm1, %v5980_v3 }
 0xcad   : > { %v4756_v13 = vpop.f32.mrb[20].mxu1 }
 0xcae   : > { %v3798_v15 = vadd.f32 %v4756_v13, %v3702_v12  ;;  %v3792_v16 = vpop.f32.mrb[21].mxu1  ;;  %v3508_v13 = vpop.permute.xlu0 %3507 }
 0xcaf   : > { %v3793_v17 = vadd.f32 %v3792_v16, %v6812_v14  ;;  %v3510_v16 = vmul.f32 %v3508_v13, %v3503_v11 }
 0xcb0   : > { %v3816_v18 = vmul.f32 0.044715, %v3798_v15  ;;  %v3812_v38 = vmul.f32 0.5, %v3798_v15 }
 0xcb1   : > { %v3815_v21 = vmul.f32 0.044715, %v3793_v17  ;;  %v4759_v22 = vpop.f32.mrb[22].mxu1  ;;  %v3811_v41 = vmul.f32 0.5, %v3793_v17 }
 0xcb2   : > { %v3820_v23 = vmul.f32 %v3816_v18, %v3798_v15  ;;  %v3808_v9 = vadd.f32 %v4759_v22, %v3712_v19  ;;  %v3802_v24 = vpop.f32.mrb[23].mxu1  ;;  %v3515_v19 = vpop.permute.xlu1 %3514 }
 0xcb3   : > { %v3819_v25 = vmul.f32 %v3815_v21, %v3793_v17  ;;  %v3803_v26 = vadd.f32 %v3802_v24, %v6814_v58  ;;  %v3517_v22 = vadd.f32 %v3515_v19, %v3510_v16  ;;  %v3932_v39 = vpop.permute.xlu0 %3931 }
 0xcb4   : > { %v3824_v48 = vmul.f32 %v3820_v23, %v3798_v15  ;;  %v3818_v49 = vmul.f32 0.044715, %v3808_v9  ;;  %v3814_v47 = vmul.f32 0.5, %v3808_v9 }
 0xcb5   : > { %v3823_v52 = vmul.f32 %v3819_v25, %v3793_v17  ;;  %v3817_v3 = vmul.f32 0.044715, %v3803_v26  ;;  %v3813_v51 = vmul.f32 0.5, %v3803_v26 }
 0xcb6   : > { %v3828_v27 = vadd.f32 %v3824_v48, %v3798_v15  ;;  %v3822_v28 = vmul.f32 %v3818_v49, %v3808_v9 }
 0xcb7   : > { %v3827_v29 = vadd.f32 %v3823_v52, %v3793_v17  ;;  %v3821_v30 = vmul.f32 %v3817_v3, %v3803_v26  ;;  %v3519_v17 = vstv %s4464_s3  ;;  %s4039_s3 = sshll.u32 %s6853_s11, 4  ;;  %s6864_s3 = int_to_ptr.vmem [resolvable:$true] %s4039_s3 }
 0xcb8   : > { %v3832_v31 = vmul.f32 0.7978846, %v3828_v27  ;;  %v3826_v14 = vmul.f32 %v3822_v28, %v3808_v9  ;;  %v3520_v21 = vsub.f32 %v6820_v10, %v3519_v17 }
 0xcb9   : > { %v3831_v32 = vmul.f32 0.7978846, %v3827_v29  ;;  %v3825_v33 = vmul.f32 %v3821_v30, %v3803_v26 }
 0xcba   : > { %5237 = vtanh.f32 %v3832_v31  ;;  %v3830_v34 = vadd.f32 %v3826_v14, %v3808_v9 }
 0xcbb   : > { %5239 = vtanh.f32 %v3831_v32  ;;  %v3829_v35 = vadd.f32 %v3825_v33, %v3803_v26 }
 0xcbc   : > { %v3834_v5 = vmul.f32 0.7978846, %v3830_v34 }
 0xcbd   : > { %v3833_v36 = vmul.f32 0.7978846, %v3829_v35 }
 0xcbe   : > { %5241 = vtanh.f32 %v3834_v5 }
 0xcbf   : > { %5243 = vtanh.f32 %v3833_v36 }
 0xcc4   : > { %v5238_v58 = vpop.eup %5237 }
 0xcc5   : > { %v5240_v37 = vpop.eup %5239  ;;  %v3840_v40 = vadd.f32 1.0, %v5238_v58 }
 0xcc6   : > { %v3839_v42 = vadd.f32 1.0, %v5240_v37 }
 0xcc7   : > { %v3844_v43 = vmul.f32 %v3840_v40, %v3812_v38 }
 0xcc8   : > { %v5242_v44 = vpop.eup %5241  ;;  %v3843_v45 = vmul.f32 %v3839_v42, %v3811_v41 }
 0xcc9   : > { %v5244_v46 = vpop.eup %5243  ;;  %v3842_v63 = vadd.f32 1.0, %v5242_v44 }
 0xcca   : > { %v4875_v50 = vpack.c.bf16 %v3844_v43, %v3843_v45  ;;  %v3841_v53 = vadd.f32 1.0, %v5244_v46 }
 0xccb   : > { %v3846_v54 = vmul.f32 %v3842_v63, %v3814_v47 }
 0xccc   : > { %4876 = vmatpush3.bf16.msra.mxu0 %v4875_v50  ;;  %4882 = vmatpush3.bf16.msra.mxu1 %v4875_v50  ;;  %v3845_v55 = vmul.f32 %v3841_v53, %v3813_v51 }
 0xccd   : > { %4877 = vmatprep.subr.bf16.mxu0 %v5978_v2  ;;  %4883 = vmatprep.subr.bf16.mxu1 %v5978_v2 }
 0xcce   : > { %v4878_v56 = vpack.c.bf16 %v3846_v54, %v3845_v55 }
 0xcd0   : > { %4879 = vmatpush3.bf16.msra.mxu0 %v4878_v56  ;;  %4885 = vmatpush3.bf16.msra.mxu1 %v4878_v56 }
 0xcd3   : > { %4769 = vmatmul.mubr.msk.f32.vlgmr.msra.gmra.mrb[22].mxu0 %vm1866_vm0, %v3847_v8  ;;  %4780 = vmatmul.mubr.msk.f32.vlgmr.msra.gmra.mrb[24].mxu1 %vm1866_vm0, %v3927_v6 }
 0xda6   : > { %v3923_v59 = vpop.f32.mrb[22].mxu0  ;;  %v4003_v60 = vpop.f32.mrb[24].mxu1 }
 0xda7   : > { %v3924_v61 = vadd.f32 %v3923_v59, %v3852_v57  ;;  %v4770_v62 = vpop.f32.mrb[23].mxu0  ;;  %v4781_v0 = vpop.f32.mrb[25].mxu1  ;;  %v4004_v9 = vadd.f32 %v4003_v60, %v3932_v39 }
 0xda9   : > { %v4007_v1 = vmul.f32 1.442695, %v3924_v61  ;;  %v4011_v2 = vsel %vm2205_vm3, %v3924_v61, 0.0 }
 0xdaa   : > { %v4012_v4 = vrot.slane %v4011_v2, 4 }
 0xdab   : > { %5245 = vpow2.f32 %v4007_v1 }
 0xdac   : > { %v4013_v7 = vadd.f32 %v4012_v4, %v4011_v2 }
 0xdae   : > { %v4014_v12 = vrot.slane %v4013_v7, 2 }
 0xdb0   : > { %v4015_v15 = vadd.f32 %v4014_v12, %v4013_v7 }
 0xdb2   : > { %v4016_v18 = vrot.slane %v4015_v15, 1 }
 0xdb4   : > { %v4017_v23 = vadd.f32 %v4016_v18, %v4015_v15 }
 0xdb5   : > { %v5246_v20 = vpop.eup %5245 }
 0xdb6   : > { %v4009_v24 = vmul.f32 %v5246_v20, %v3517_v22  ;;  %v4018_v25 = vsub.f32 %v3520_v21, %v4017_v23 }
 0xdb8   : > { %v4010_v10 = vadd.f32 %v4009_v24, %v4004_v9  ;;  %4020 = vst [vmem:[%s1719_s8] sm:$0x1] %v4018_v25 }
 0xdb9   : > { %5781 = shalt.err (!%p5778_p11)
}
 0xdba   : > { %s5782_s7 = scalar_lea.hbm %s6857_s12, 16  ;;  %s5786_s15 = scalar_lea.hbm %s6215_s4, 32 }
 0xdbb   : > { %p5783_p12 = scmp.ne.s32.totalorder %s6857_s12, %s5782_s7  ;;  %p5787_p7 = scmp.lt.u32.totalorder %s6857_s12, %s6215_s4 }
 0xdbc   : > { %p5788_p9 = scmp.lt.u32.totalorder %s5786_s15, %s5782_s7  ;;  %p5790_p10 = scmp.lt.u32.totalorder %s5782_s7, %s6857_s12 }
 0xdbd   : > { %p5784_p1 = pnand %p5783_p12, %p7084_p3 }
 0xdbe   : > { %p5789_p2 = por %p5788_p9, %p5787_p7 }
 0xdbf   : > { %p5785_p8 = pneg %p5784_p1 }
 0xdc0   : > { %p5791_p4 = por %p5790_p10, %p5789_p2 }
 0xdc2   : > { %p5792_p0 = pnand %p5791_p4, %p5785_p8 }
 0xdc4   : > { %5795 = shalt.err (!%p5792_p0)
}
 0xdc5   : > { %4961 = dma.vmem_to_hbm [thread:$0]  (%p7084_p3), %s6859_s9, 16, %s6857_s12, %s4027_s10   ;;  %4019 = vst [vmem:[%s6853_s11] sm:$0x3] %v4010_v10 }
 0xdc6   : > { %s4022_s21 = scalar_lea.sflag [#allocation8], %s6554_s17  ;;  %s5796_s14 = scalar_lea.vmem %s6864_s3, 32 }
 0xdc7   : > { %p5797_p5 = scmp.ne.s32.totalorder %s6864_s3, %s5796_s14  ;;  %s5983_s8 = smov [#allocation37]  }
 0xdc8   : > { %s5800_s6 = sshll.u32 %s5983_s8, 4  ;;  %s5801_s6 = int_to_ptr.vmem [resolvable:$false] %s5800_s6 }
 0xdc9   : > { %p5798_p13 = pnand %p5797_p5, %p7084_p3  ;;  %s5802_s7 = scalar_lea.vmem %s5801_s6, 64 }
 0xdca   : > { %p5803_p11 = scmp.lt.s32.totalorder %s6864_s3, %s5801_s6  ;;  %p5804_p12 = scmp.lt.s32.totalorder %s5802_s7, %s5796_s14 }
 0xdcb   : > { %p5799_p6 = pneg %p5798_p13 }
 0xdcc   : > { %p5805_p1 = por %p5804_p12, %p5803_p11 }
 0xdce   : > { %p5806_p8 = pnand %p5805_p1, %p5799_p6 }
 0xdd0   : > { %5809 = shalt.err (!%p5806_p8)
}
 0xdd1   : > { %s5810_s12 = scalar_lea.hbm %s6862_s2, 32  ;;  %s5814_s17 = scalar_lea.hbm %s6210_s1, 64 }
 0xdd2   : > { %p5811_p7 = scmp.ne.s32.totalorder %s6862_s2, %s5810_s12  ;;  %p5815_p10 = scmp.lt.u32.totalorder %s6862_s2, %s6210_s1 }
 0xdd3   : > { %p5816_p4 = scmp.lt.u32.totalorder %s5814_s17, %s5810_s12  ;;  %p5818_p5 = scmp.lt.u32.totalorder %s5810_s12, %s6862_s2 }
 0xdd4   : > { %p5812_p9 = pnand %p5811_p7, %p7084_p3 }
 0xdd5   : > { %p5817_p0 = por %p5816_p4, %p5815_p10 }
 0xdd6   : > { %p5813_p2 = pneg %p5812_p9 }
 0xdd7   : > { %p5819_p13 = por %p5818_p5, %p5817_p0 }
 0xdd9   : > { %p5820_p6 = pnand %p5819_p13, %p5813_p2 }
 0xddb   : > { %5823 = shalt.err (!%p5820_p6)
}
 0xddc   : > { %4960 = dma.vmem_to_hbm [thread:$0]  (%p7084_p3), %s6864_s3, 32, %s6862_s2, %s4022_s21  }
 0xddd PF: > { %s4064_s11 = sand.u32 1, %s5894_s0   ;;  %p7085_p11 = scmp.ne.s32.totalorder %s7032_s19, 0 }
 0xdde   : > { %p7086_p12 = scmp.ge.s32.totalorder %s5906_s22, 2  ;;  %s4065_s9 = scalar_lea.sflag [#allocation8], %s4064_s11 }
 0xde0   : > { %p5024_p1 = pnand %p7086_p12, %p7085_p11 }
 0xde2   : > { %5885 = dma.done.wait (!%p5024_p1), %s4065_s9, 32  }
 0xde3   : > { %5887 = vsyncadd (!%p5024_p1), %s4065_s9, 4294967264  ;;  %s4074_s10 = scalar_lea.sflag [#allocation39], %s4064_s11 }
 0xde4   : > { %5889 = dma.done.wait (!%p5024_p1), %s4074_s10, 16  }
 0xde5   : > { %5891 = vsyncadd (!%p5024_p1), %s4074_s10, 4294967280  ;;  %p132_p3 = scmp.ge.s32.totalorder %s6484_s16, 4   ;;  %s7087_s0 = smov %s5898_s5 }
 0xde6   : > { %s7088_s5 = smov %s5902_s20  ;;  %s7089_s20 = smov %s6495_s18 }
 0xde7   : > { %s7090_s22 = smov %s6484_s16  ;;  %134 = sbr.rel (!%p132_p3) target bundleno = 112 (0x70), region = 394 }
 0xdee   :  { %4078 = vsyncpa [#allocation7], 1 }
 0xdef   :  { %4080 = vsyncpa [#allocation7 + $0x1], 1 }
 0xdf0   :  { %4081 = vsyncpa [#allocation12], 1 }
 0xdf1   :  { %4082 = vsyncpa [#allocation15], 1 }
 0xdf2   :  { %4083 = vsyncpa [#allocation18], 1 }
 0xdf3   :  { %4084 = vsyncpa [#allocation21], 1 }
 0xdf4   :  { %4085 = vsyncpa [#allocation24], 1 }
 0xdf5   :  { %4086 = vsyncpa [#allocation27], 1 }
 0xdf6   :  { %4087 = vsyncpa [#allocation30], 1 }
 0xdf7   :  { %4088 = vsyncpa [#allocation33], 1 }
 0xdf8   :  { %4089 = vsyncpa [#allocation36], 1 }
 0xdf9   :  { %4090 = vsyncpa [#allocation8], 1 }
 0xdfa   :  { %4092 = vsyncpa [#allocation8 + $0x1], 1 }
 0xdfb   :  { %4093 = vsyncpa [#allocation39], 1 }
 0xdfc   :  { %4095 = vsyncpa [#allocation39 + $0x1], 1 }
 0xdfd   :  { %4096 = vsyncpa [#allocation9], 1 }
 0xdfe   :  { %4098 = vsyncpa [#allocation9 + $0x1], 1 }

</bundles_post_ra>
